<compile_context>
chip_gen: v6e
topology: v6e:2x2x1
jax: 0.10.0
libtpu: 0.0.40
codegen_flags: <defaults>
</compile_context>

<pallas_src>
import jax
import jax.numpy as jnp
import numpy as np
from jax.experimental import pallas as pl
from jax.experimental.pallas import tpu as pltpu

OUT_DIM = 784            # 28*28
OUT_PAD = 896            # 7 * 128 -> lane-dense final store


def _mlp_kernel(pos_ref, x_ref, w1_ref, b1_ref, w2_hbm, b2_ref, w3_hbm, b3_ref,
                out_ref, w2_vmem, w3_vmem, sem):
    # Kick off the big weight DMAs immediately so they overlap layer-1/2 compute.
    cp_w2 = pltpu.make_async_copy(w2_hbm, w2_vmem, sem.at[0])
    cp_w3 = pltpu.make_async_copy(w3_hbm, w3_vmem, sem.at[1])
    cp_w2.start()
    cp_w3.start()

    split = pos_ref.shape[1]      # 16 * num_class
    nc = x_ref.shape[1]           # num_class

    # ---- Layer 1: fused /100 scaling + split contraction, ReLU -------------
    pos_b = (pos_ref[...] * jnp.float32(0.01)).astype(jnp.bfloat16)
    x_b = x_ref[...].astype(jnp.bfloat16)
    h1 = jnp.dot(pos_b, w1_ref[pl.ds(0, split), :],
                 preferred_element_type=jnp.float32)
    h1 = h1 + jnp.dot(x_b, w1_ref[pl.ds(split, nc), :],
                      preferred_element_type=jnp.float32)
    h1 = jnp.maximum(h1 + b1_ref[...], 0.0)

    # ---- Layer 2: ReLU ------------------------------------------------------
    cp_w2.wait()
    h2 = jnp.dot(h1.astype(jnp.bfloat16), w2_vmem[...],
                 preferred_element_type=jnp.float32)
    h2 = jnp.maximum(h2 + b2_ref[...], 0.0)

    # ---- Layer 3: Sigmoid (lane-dense 896-wide; cols >= 784 are zero pad) ---
    cp_w3.wait()
    h3 = jnp.dot(h2.astype(jnp.bfloat16), w3_vmem[...],
                 preferred_element_type=jnp.float32)
    out_ref[...] = jax.nn.sigmoid(h3 + b3_ref[...])


def reconstruct_forward(pos, x, params, num_class):
    """Pallas implementation of RECONSTRUCT.forward.

    pos: [B, 16, num_class], x: [B, num_class]  ->  [B, 1, 28, 28]
    """
    w1, b1, w2, b2, w3, b3 = params

    pos_flat = pos.reshape((-1, 16 * num_class))   # metadata-only reshape
    B = pos_flat.shape[0]

    vmem = pl.BlockSpec(memory_space=pltpu.MemorySpace.VMEM)
    hbm = pl.BlockSpec(memory_space=pl.ANY)

    flops = 2 * B * (17 * num_class * 512 + 512 * 1024 + 1024 * OUT_PAD)
    bytes_accessed = ((w1.size + w2.size + w3.size) * 2            # bf16 weights
                      + (b1.size + b2.size + b3.size) * 4          # f32 biases
                      + (pos_flat.size + x.size + B * OUT_PAD) * 4)

    out = pl.pallas_call(
        _mlp_kernel,
        out_shape=jax.ShapeDtypeStruct((B, OUT_PAD), jnp.float32),
        in_specs=[vmem, vmem, vmem, vmem, hbm, vmem, hbm, vmem],
        out_specs=vmem,
        scratch_shapes=[
            pltpu.VMEM(w2.shape, w2.dtype),
            pltpu.VMEM(w3.shape, w3.dtype),
            pltpu.SemaphoreType.DMA((2,)),
        ],
        cost_estimate=pl.CostEstimate(
            flops=flops,
            transcendentals=B * OUT_PAD,
            bytes_accessed=bytes_accessed),
    )(pos_flat, x, w1, b1, w2, b2, w3, b3)

    return out[:, :OUT_DIM].reshape((-1, 1, 28, 28))


def init_params(key, num_class):
    """Deterministic synthetic params. Weights stored as [in, out] (y = x @ W + b),
    equivalent to torch's Linear with W_torch = W.T.  Weights shipped as bf16;
    layer-3 columns zero-padded 784 -> 896 for lane-dense output."""
    d_in = 17 * num_class
    k = jax.random.split(key, 6)

    def lin(kw, kb, din, dout):
        bound = 1.0 / np.sqrt(din)
        w = jax.random.uniform(kw, (din, dout), jnp.float32, -bound, bound)
        b = jax.random.uniform(kb, (1, dout), jnp.float32, -bound, bound)
        return w, b

    w1, b1 = lin(k[0], k[1], d_in, 512)
    w2, b2 = lin(k[2], k[3], 512, 1024)
    w3, b3 = lin(k[4], k[5], 1024, OUT_DIM)

    w3 = jnp.pad(w3, ((0, 0), (0, OUT_PAD - OUT_DIM)))
    b3 = jnp.pad(b3, ((0, 0), (0, OUT_PAD - OUT_DIM)))

    return (w1.astype(jnp.bfloat16), b1,
            w2.astype(jnp.bfloat16), b2,
            w3.astype(jnp.bfloat16), b3)


def reference_forward(pos, x, params, num_class):
    """Pure-JAX reference replicating the torch forward with the same
    mixed-precision scheme as the kernel (bf16 dot operands, f32 accumulation)."""
    w1, b1, w2, b2, w3, b3 = params
    p = pos.reshape((-1, 16 * num_class)) * jnp.float32(0.01)
    h = jnp.concatenate([p, x], axis=1)

    def layer(h, w, b):
        return jnp.dot(h.astype(jnp.bfloat16), w,
                       preferred_element_type=jnp.float32) + b

    h = jax.nn.relu(layer(h, w1, b1))
    h = jax.nn.relu(layer(h, w2, b2))
    h = jax.nn.sigmoid(layer(h, w3, b3))
    return h[:, :OUT_DIM].reshape((-1, 1, 28, 28))


if __name__ == "__main__":
    num_class = 4
    B = 8

    key = jax.random.PRNGKey(0)
    kp, kx, kparam = jax.random.split(key, 3)

    pos = jax.random.uniform(kp, (B, 16, num_class), jnp.float32, 0.0, 100.0)
    x = jax.random.normal(kx, (B, num_class), jnp.float32)
    params = init_params(kparam, num_class)

    out = reconstruct_forward(pos, x, params, num_class)
    out = jax.block_until_ready(out)

    ref = reference_forward(pos, x, params, num_class)
    ref = jax.block_until_ready(ref)

    assert out.shape == (B, 1, 28, 28), out.shape
    np.testing.assert_allclose(np.asarray(out), np.asarray(ref), rtol=2e-3, atol=2e-3)

    print("KERNEL_OK")
</pallas_src>

<mosaic_0001>
module attributes {stable_mosaic.version = 11 : i64} {
  func.func @_mlp_kernel(%arg0: memref<8x64xf32, #tpu.memory_space<vmem>>, %arg1: memref<8x4xf32, #tpu.memory_space<vmem>>, %arg2: memref<68x512xbf16, #tpu.memory_space<vmem>>, %arg3: memref<1x512xf32, #tpu.memory_space<vmem>>, %arg4: memref<512x1024xbf16, #tpu.memory_space<any>>, %arg5: memref<1x1024xf32, #tpu.memory_space<vmem>>, %arg6: memref<1024x896xbf16, #tpu.memory_space<any>>, %arg7: memref<1x896xf32, #tpu.memory_space<vmem>>, %arg8: memref<8x896xf32, #tpu.memory_space<vmem>>, %arg9: memref<512x1024xbf16, #tpu.memory_space<vmem>>, %arg10: memref<1024x896xbf16, #tpu.memory_space<vmem>>, %arg11: memref<2x!tpu.dma_semaphore, #tpu.memory_space<semaphore_mem>>) attributes {dimension_semantics = [], scalar_prefetch = 0 : i64, scratch_operands = 3 : i64, tpu.core_type = #tpu.core_type<tc>} {
    %c0_i32 = arith.constant 0 : i32
    %0 = tpu.memref_slice %arg11[%c0_i32] : memref<2x!tpu.dma_semaphore, #tpu.memory_space<semaphore_mem>> -> memref<1x!tpu.dma_semaphore, #tpu.memory_space<semaphore_mem>>
    %1 = tpu.memref_squeeze %0 : memref<1x!tpu.dma_semaphore, #tpu.memory_space<semaphore_mem>> -> memref<!tpu.dma_semaphore, #tpu.memory_space<semaphore_mem>>
    tpu.enqueue_dma source(%arg4 : memref<512x1024xbf16, #tpu.memory_space<any>>) target(%arg9 : memref<512x1024xbf16, #tpu.memory_space<vmem>>) target_semaphore(%1 : memref<!tpu.dma_semaphore, #tpu.memory_space<semaphore_mem>>)
    %c1_i32 = arith.constant 1 : i32
    %2 = tpu.memref_slice %arg11[%c1_i32] : memref<2x!tpu.dma_semaphore, #tpu.memory_space<semaphore_mem>> -> memref<1x!tpu.dma_semaphore, #tpu.memory_space<semaphore_mem>>
    %3 = tpu.memref_squeeze %2 : memref<1x!tpu.dma_semaphore, #tpu.memory_space<semaphore_mem>> -> memref<!tpu.dma_semaphore, #tpu.memory_space<semaphore_mem>>
    tpu.enqueue_dma source(%arg6 : memref<1024x896xbf16, #tpu.memory_space<any>>) target(%arg10 : memref<1024x896xbf16, #tpu.memory_space<vmem>>) target_semaphore(%3 : memref<!tpu.dma_semaphore, #tpu.memory_space<semaphore_mem>>)
    %c0 = arith.constant 0 : index
    %c0_0 = arith.constant 0 : index
    %4 = vector.load %arg0[%c0, %c0_0] : memref<8x64xf32, #tpu.memory_space<vmem>>, vector<8x64xf32>
    %cst = arith.constant 0.00999999977 : f32
    %5 = vector.broadcast %cst : f32 to vector<8x64xf32>
    %6 = arith.mulf %4, %5 : vector<8x64xf32>
    %7 = arith.truncf %6 : vector<8x64xf32> to vector<8x64xbf16>
    %c0_1 = arith.constant 0 : index
    %c0_2 = arith.constant 0 : index
    %8 = vector.load %arg1[%c0_1, %c0_2] : memref<8x4xf32, #tpu.memory_space<vmem>>, vector<8x4xf32>
    %9 = arith.truncf %8 : vector<8x4xf32> to vector<8x4xbf16>
    %c0_3 = arith.constant 0 : index
    %c0_4 = arith.constant 0 : index
    %10 = vector.load %arg2[%c0_3, %c0_4] : memref<68x512xbf16, #tpu.memory_space<vmem>>, vector<64x512xbf16>
    %cst_5 = arith.constant dense<0.000000e+00> : vector<8x512xf32>
    %11 = tpu.matmul %7, %10, %cst_5 {dimension_numbers = #tpu.dot_dimension_numbers<[1], [0], [0], [1], [0, 0, 1, 1], [], []>} : vector<8x64xbf16>, vector<64x512xbf16>, vector<8x512xf32> -> vector<8x512xf32>
    %c64 = arith.constant 64 : index
    %c0_6 = arith.constant 0 : index
    %12 = vector.load %arg2[%c64, %c0_6] : memref<68x512xbf16, #tpu.memory_space<vmem>>, vector<4x512xbf16>
    %cst_7 = arith.constant dense<0.000000e+00> : vector<8x512xf32>
    %13 = tpu.matmul %9, %12, %cst_7 {dimension_numbers = #tpu.dot_dimension_numbers<[1], [0], [0], [1], [0, 0, 1, 1], [], []>} : vector<8x4xbf16>, vector<4x512xbf16>, vector<8x512xf32> -> vector<8x512xf32>
    %14 = arith.addf %11, %13 : vector<8x512xf32>
    %c0_8 = arith.constant 0 : index
    %c0_9 = arith.constant 0 : index
    %15 = vector.load %arg3[%c0_8, %c0_9] : memref<1x512xf32, #tpu.memory_space<vmem>>, vector<1x512xf32>
    %16 = vector.broadcast %15 : vector<1x512xf32> to vector<8x512xf32>
    %17 = arith.addf %14, %16 : vector<8x512xf32>
    %cst_10 = arith.constant 0.000000e+00 : f32
    %18 = vector.broadcast %cst_10 : f32 to vector<8x512xf32>
    %19 = arith.maximumf %17, %18 : vector<8x512xf32>
    %c0_i32_11 = arith.constant 0 : i32
    %20 = tpu.memref_slice %arg11[%c0_i32_11] : memref<2x!tpu.dma_semaphore, #tpu.memory_space<semaphore_mem>> -> memref<1x!tpu.dma_semaphore, #tpu.memory_space<semaphore_mem>>
    %21 = tpu.memref_squeeze %20 : memref<1x!tpu.dma_semaphore, #tpu.memory_space<semaphore_mem>> -> memref<!tpu.dma_semaphore, #tpu.memory_space<semaphore_mem>>
    tpu.wait_dma2 semaphore(%21 : memref<!tpu.dma_semaphore, #tpu.memory_space<semaphore_mem>>) src(%arg4 : memref<512x1024xbf16, #tpu.memory_space<any>>) dst(%arg9 : memref<512x1024xbf16, #tpu.memory_space<vmem>>)
    %22 = arith.truncf %19 : vector<8x512xf32> to vector<8x512xbf16>
    %c0_12 = arith.constant 0 : index
    %c0_13 = arith.constant 0 : index
    %23 = vector.load %arg9[%c0_12, %c0_13] : memref<512x1024xbf16, #tpu.memory_space<vmem>>, vector<512x1024xbf16>
    %cst_14 = arith.constant dense<0.000000e+00> : vector<8x1024xf32>
    %24 = tpu.matmul %22, %23, %cst_14 {dimension_numbers = #tpu.dot_dimension_numbers<[1], [0], [0], [1], [0, 0, 1, 1], [], []>} : vector<8x512xbf16>, vector<512x1024xbf16>, vector<8x1024xf32> -> vector<8x1024xf32>
    %c0_15 = arith.constant 0 : index
    %c0_16 = arith.constant 0 : index
    %25 = vector.load %arg5[%c0_15, %c0_16] : memref<1x1024xf32, #tpu.memory_space<vmem>>, vector<1x1024xf32>
    %26 = vector.broadcast %25 : vector<1x1024xf32> to vector<8x1024xf32>
    %27 = arith.addf %24, %26 : vector<8x1024xf32>
    %cst_17 = arith.constant 0.000000e+00 : f32
    %28 = vector.broadcast %cst_17 : f32 to vector<8x1024xf32>
    %29 = arith.maximumf %27, %28 : vector<8x1024xf32>
    %c1_i32_18 = arith.constant 1 : i32
    %30 = tpu.memref_slice %arg11[%c1_i32_18] : memref<2x!tpu.dma_semaphore, #tpu.memory_space<semaphore_mem>> -> memref<1x!tpu.dma_semaphore, #tpu.memory_space<semaphore_mem>>
    %31 = tpu.memref_squeeze %30 : memref<1x!tpu.dma_semaphore, #tpu.memory_space<semaphore_mem>> -> memref<!tpu.dma_semaphore, #tpu.memory_space<semaphore_mem>>
    tpu.wait_dma2 semaphore(%31 : memref<!tpu.dma_semaphore, #tpu.memory_space<semaphore_mem>>) src(%arg6 : memref<1024x896xbf16, #tpu.memory_space<any>>) dst(%arg10 : memref<1024x896xbf16, #tpu.memory_space<vmem>>)
    %32 = arith.truncf %29 : vector<8x1024xf32> to vector<8x1024xbf16>
    %c0_19 = arith.constant 0 : index
    %c0_20 = arith.constant 0 : index
    %33 = vector.load %arg10[%c0_19, %c0_20] : memref<1024x896xbf16, #tpu.memory_space<vmem>>, vector<1024x896xbf16>
    %cst_21 = arith.constant dense<0.000000e+00> : vector<8x896xf32>
    %34 = tpu.matmul %32, %33, %cst_21 {dimension_numbers = #tpu.dot_dimension_numbers<[1], [0], [0], [1], [0, 0, 1, 1], [], []>} : vector<8x1024xbf16>, vector<1024x896xbf16>, vector<8x896xf32> -> vector<8x896xf32>
    %c0_22 = arith.constant 0 : index
    %c0_23 = arith.constant 0 : index
    %35 = vector.load %arg7[%c0_22, %c0_23] : memref<1x896xf32, #tpu.memory_space<vmem>>, vector<1x896xf32>
    %36 = vector.broadcast %35 : vector<1x896xf32> to vector<8x896xf32>
    %37 = arith.addf %34, %36 : vector<8x896xf32>
    %38 = arith.negf %37 : vector<8x896xf32>
    %39 = math.exp %38 : vector<8x896xf32>
    %cst_24 = arith.constant 1.000000e+00 : f32
    %40 = vector.broadcast %cst_24 : f32 to vector<8x896xf32>
    %41 = arith.addf %40, %39 : vector<8x896xf32>
    %42 = arith.divf %40, %41 : vector<8x896xf32>
    %c0_25 = arith.constant 0 : index
    %c0_26 = arith.constant 0 : index
    %43 = vector.load %arg8[%c0_25, %c0_26] : memref<8x896xf32, #tpu.memory_space<vmem>>, vector<8x896xf32>
    tpu.vector_store %arg8[%c0_25, %c0_26], %42 {strides = array<i32>} : memref<8x896xf32, #tpu.memory_space<vmem>>, vector<8x896xf32>,
    return
  }
}

</mosaic_0001>

<bundles_post_ra>
// kernel: tpu_custom_call.1
= control target key start
LH: loop header
LB: loop body
LE: loop exit
PB: predicated region body
PF: predicated region fallthrough
CT: control target
= control target key end

     0   :  { %13 = vsyncpa [#allocation6], 0  ;;  %s7940_s0 = inlined_call_operand.hbm [shape: f32[8,64], index: 0, kind: input, shape index: {}]   ;;  %s7941_s1 = inlined_call_operand.vmem [shape: f32[8,4], index: 1, kind: input, shape index: {}]   ;;  %s7942_s2 = inlined_call_operand.hbm [shape: bf16[68,512], index: 2, kind: input, shape index: {}]   ;;  %s7943_s3 = inlined_call_operand.hbm [shape: f32[1,512], index: 3, kind: input, shape index: {}]   ;;  %s7944_s4 = inlined_call_operand.hbm [shape: bf16[512,1024], index: 4, kind: input, shape index: {}]   ;;  %s7945_s5 = inlined_call_operand.hbm [shape: f32[1,1024], index: 5, kind: input, shape index: {}]   ;;  %s7946_s6 = inlined_call_operand.hbm [shape: bf16[1024,896], index: 6, kind: input, shape index: {}]   ;;  %s7947_s7 = inlined_call_operand.hbm [shape: f32[1,896], index: 7, kind: input, shape index: {}]   ;;  %s7948_s8 = inlined_call_operand.hbm [shape: f32[8,896], index: 8, kind: output, shape index: {}]  }
   0x1   :  { %14 = vsyncpa [#allocation9], 0 }
   0x2   :  { %15 = vsyncpa [#allocation12], 0 }
   0x3   :  { %16 = vsyncpa [#allocation7], 0  ;;  %s7662_s27 = smov [#allocation8]  }
   0x4   :  { %s34_s28 = sshll.u32 %s7662_s27, 4  ;;  %s35_s28 = int_to_ptr.vmem [resolvable:$true] %s34_s28 }
   0x5   :  { %s7498_s29 = scalar_lea.vmem %s35_s28, 2304  ;;  %p7503_p1 = scmp.lt.s32.totalorder %s35_s28, %s35_s28 }
   0x6   :  { %p7499_p0 = scmp.ne.s32.totalorder %s35_s28, %s7498_s29  ;;  %p7504_p2 = scmp.lt.s32.totalorder %s7498_s29, %s7498_s29 }
   0x8   :  { %p7505_p3 = por %p7504_p2, %p7503_p1 }
   0xa   :  { %p7506_p4 = pnand %p7505_p3, %p7499_p0 }
   0xc   :  { %7509 = shalt.err (!%p7506_p4)
}
   0xd   :  { %s7663_s30 = smov 256   ;;  %s7664_s9 = smov 16  }
   0xe   :  { %40 = dma.hbm_to_vmem [thread:$0]  %s7942_s2, 2304, %s35_s28, [#allocation9], %s7663_s30, %s7663_s30, %s7664_s9  }
   0xf   :  { %s7665_s12 = smov [#allocation11]   ;;  %s7666_s14 = smov [#allocation5]  }
  0x10   :  { %s57_s13 = sshll.u32 %s7665_s12, 4  ;;  %s23_s15 = sshll.u32 %s7666_s14, 4  ;;  %s58_s13 = int_to_ptr.vmem [resolvable:$true] %s57_s13  ;;  %s24_s15 = int_to_ptr.vmem [resolvable:$true] %s23_s15 }
  0x11   :  { %s7518_s16 = scalar_lea.vmem %s58_s13, 128  ;;  %p7523_p6 = scmp.lt.s32.totalorder %s58_s13, %s58_s13 }
  0x12   :  { %p7519_p5 = scmp.ne.s32.totalorder %s58_s13, %s7518_s16  ;;  %p7524_p7 = scmp.lt.s32.totalorder %s7518_s16, %s7518_s16 }
  0x14   :  { %p7525_p8 = por %p7524_p7, %p7523_p6 }
  0x16   :  { %p7526_p9 = pnand %p7525_p8, %p7519_p5 }
  0x18   :  { %7529 = shalt.err (!%p7526_p9)
}
  0x19   :  { %60 = dma.hbm_to_vmem [thread:$0]  %s7945_s5, 128, %s58_s13, [#allocation12]  }
  0x1a   :  { %s7538_s19 = scalar_lea.vmem %s24_s15, 128  ;;  %p7543_p11 = scmp.lt.s32.totalorder %s24_s15, %s24_s15 }
  0x1b   :  { %p7539_p10 = scmp.ne.s32.totalorder %s24_s15, %s7538_s19  ;;  %p7544_p12 = scmp.lt.s32.totalorder %s7538_s19, %s7538_s19 }
  0x1d   :  { %p7545_p13 = por %p7544_p12, %p7543_p11 }
  0x1f   :  { %p7546_p0 = pnand %p7545_p13, %p7539_p10 }
  0x21   :  { %7549 = shalt.err (!%p7546_p0)
}
  0x22   :  { %26 = dma.hbm_to_vmem [thread:$0]  %s7940_s0, 128, %s24_s15, [#allocation6]  }
  0x23   :  { %s7667_s21 = smov [#allocation10]   ;;  %s7668_s23 = smov [#allocation13]  }
  0x24   :  { %s47_s22 = sshll.u32 %s7667_s21, 4  ;;  %s67_s24 = sshll.u32 %s7668_s23, 4  ;;  %s48_s22 = int_to_ptr.vmem [resolvable:$true] %s47_s22  ;;  %s68_s24 = int_to_ptr.vmem [resolvable:$true] %s67_s24 }
  0x25   :  { %s7558_s25 = scalar_lea.vmem %s48_s22, 64  ;;  %p7563_p2 = scmp.lt.s32.totalorder %s48_s22, %s48_s22 }
  0x26   :  { %p7559_p1 = scmp.ne.s32.totalorder %s48_s22, %s7558_s25  ;;  %p7564_p3 = scmp.lt.s32.totalorder %s7558_s25, %s7558_s25 }
  0x28   :  { %p7565_p4 = por %p7564_p3, %p7563_p2 }
  0x2a   :  { %p7566_p5 = pnand %p7565_p4, %p7559_p1 }
  0x2c   :  { %7569 = shalt.err (!%p7566_p5)
}
  0x2d   :  { %50 = dma.hbm_to_vmem [thread:$0]  %s7943_s3, 64, %s48_s22, [#allocation9]  }
  0x2e   :  { %s7578_s27 = scalar_lea.vmem %s68_s24, 112  ;;  %s7582_s0 = scalar_lea.vmem %s68_s24, 128 }
  0x2f   :  { %p7579_p6 = scmp.ne.s32.totalorder %s68_s24, %s7578_s27  ;;  %p7583_p7 = scmp.lt.s32.totalorder %s68_s24, %s68_s24 }
  0x30   :  { %p7584_p8 = scmp.lt.s32.totalorder %s7582_s0, %s7578_s27 }
  0x32   :  { %p7585_p9 = por %p7584_p8, %p7583_p7 }
  0x34   :  { %p7586_p10 = pnand %p7585_p9, %p7579_p6 }
  0x36   :  { %7589 = shalt.err (!%p7586_p10)
}
  0x37   :  { %70 = dma.hbm_to_vmem [thread:$0]  %s7947_s7, 112, %s68_s24, [#allocation12]  }
  0x38   :  { %7650 = dma.done.wait [#allocation6], 128  }
  0x39   :  { %7651 = vsyncadd [#allocation6], 4294967168 }
  0x3a   :  { %7652 = dma.done.wait [#allocation9], 2368  }
  0x3b   :  { %7653 = vsyncadd [#allocation9], 4294964928 }
  0x3c   :  { %7654 = dma.done.wait [#allocation12], 240  }
  0x3d   :  { %7655 = vsyncadd [#allocation12], 4294967056  ;;  %v7669_v0 = vmov 0   ;;  %v131_v1 = vld [vmem:[#allocation8 + $0x80] sm:$0x33]  ;;  %vm147_vm0 = vcmask 1041408  }
  0x3e   :  { %192 = vmatprep.mubr.bf16.mxu0 %v7669_v0  ;;  %233 = vmatprep.mubr.bf16.mxu1 %v7669_v0  ;;  %v132_v2 = vld [vmem:[#allocation8 + $0x88] sm:$0x33]  ;;  %v113_v3 = vld [vmem:[%s7941_s1] sm:$0xff]  ;;  %v5957_v4 = vcombine.high %v131_v1, %v131_v1  ;;  %v5956_v6 = vcombine.low %v131_v1, %v131_v1  ;;  %v6800_v8 = vld [vmem:[#allocation8 + $0x64] ss:$16 sps:$4 sm:$0xff]   ;;  %vm143_vm1 = vcmask 31744  }
  0x3f   :  { %v5959_v5 = vcombine.high %v132_v2, %v132_v2  ;;  %v5958_v7 = vcombine.low %v132_v2, %v132_v2  ;;  %v114_v11 = vpack.c.bf16 %v113_v3, %v113_v3  ;;  %v6798_v12 = vld [vmem:[#allocation8 + $0x60] ss:$16 sps:$4 sm:$0xff]   ;;  %v6803_v13 = vld [vmem:[#allocation8 + $0x6c] ss:$16 sps:$4 sm:$0xff]   ;;  %v6801_v14 = vld [vmem:[#allocation8 + $0x68] ss:$16 sps:$4 sm:$0xff]  }
  0x40   :  { %5960 = vmatprep.subr.msk.bf16.mxu0 %vm147_vm0, %v5957_v4  ;;  %v149_v9 = vsel %vm147_vm0, %v5956_v6, 0  ;;  %v6806_v15 = vld [vmem:[#allocation8 + $0x44] ss:$16 sps:$4 sm:$0xff]   ;;  %v6809_v16 = vld [vmem:[#allocation8 + $0x4c] ss:$16 sps:$4 sm:$0xff]   ;;  %vm322_vm2 = vcmask 523264  }
  0x41   :  { %5962 = vmatprep.subr.msk.bf16.mxu1 %vm147_vm0, %v5959_v5  ;;  %v155_v10 = vsel %vm147_vm0, %v5958_v7, 0  ;;  %175 = vmatpush1.bf16.msra.mxu0 %v149_v9  ;;  %v6804_v17 = vld [vmem:[#allocation8 + $0x40] ss:$16 sps:$4 sm:$0xff]   ;;  %v6807_v18 = vld [vmem:[#allocation8 + $0x48] ss:$16 sps:$4 sm:$0xff]   ;;  %s7670_s1 = smov [#allocation2]  }
  0x42   :  { %216 = vmatpush1.bf16.msra.mxu1 %v155_v10  ;;  %334 = vmatprep.subr.bf16.mxu0 %v6800_v8  ;;  %v6812_v19 = vld [vmem:[#allocation8 + $0x24] ss:$16 sps:$4 sm:$0xff]   ;;  %v6815_v20 = vld [vmem:[#allocation8 + $0x2c] ss:$16 sps:$4 sm:$0xff]   ;;  %v6810_v21 = vld [vmem:[#allocation8 + $0x20] ss:$16 sps:$4 sm:$0xff]  }
  0x43   :  { %375 = vmatprep.subr.bf16.mxu1 %v6803_v13  ;;  %v6813_v22 = vld [vmem:[#allocation8 + $0x28] ss:$16 sps:$4 sm:$0xff]   ;;  %v6818_v24 = vld [vmem:[#allocation8 + $0x4] ss:$16 sps:$4 sm:$0xff]   ;;  %v6821_v25 = vld [vmem:[#allocation8 + $0xc] ss:$16 sps:$4 sm:$0xff]  }
  0x44   :  { %5961 = vmatmul.mubr.msk.bf16.vlgmr.msra.gmra.mxu0 %vm143_vm1, %v114_v11  ;;  %v110_v23 = vld [vmem:[#allocation5] sm:$0xff]  ;;  %v6816_v27 = vld [vmem:[#allocation8] ss:$16 sps:$4 sm:$0xff]   ;;  %s94_s7 = sshll.u32 %s7670_s1, 4  ;;  %s7671_s9 = smov [#allocation3]   ;;  %s95_s7 = int_to_ptr.vmem [resolvable:$true] %s94_s7 }
  0x45   :  { %5963 = vmatmul.mubr.msk.bf16.vlgmr.msra.gmra.mxu1 %vm143_vm1, %v114_v11  ;;  %335 = vmatpush1.bf16.msra.mxu0 %v6798_v12  ;;  %v111_v26 = vmul.f32 0.01, %v110_v23  ;;  %v6819_v28 = vld [vmem:[#allocation8 + $0x8] ss:$16 sps:$4 sm:$0xff]   ;;  %s106_s10 = sshll.u32 %s7671_s9, 4  ;;  %s7598_s11 = scalar_lea.vmem %s95_s7, 32768  ;;  %s107_s10 = int_to_ptr.vmem [resolvable:$true] %s106_s10 }
  0x46   :  { %376 = vmatpush1.bf16.msra.mxu1 %v6801_v14  ;;  %336 = vmatprep.subr.bf16.mxu0 %v6806_v15  ;;  %p7599_p11 = scmp.ne.s32.totalorder %s95_s7, %s7598_s11  ;;  %p7603_p12 = scmp.lt.s32.totalorder %s95_s7, %s95_s7 }
  0x47   :  { %377 = vmatprep.subr.bf16.mxu1 %v6809_v16  ;;  %358 = vmatprep.mubr.bf16.mxu0 %v7669_v0  ;;  %v112_v29 = vpack.c.bf16 %v111_v26, %v111_v26  ;;  %p7604_p13 = scmp.lt.s32.totalorder %s7598_s11, %s7598_s11 }
  0x48   :  { %399 = vmatprep.mubr.bf16.mxu1 %v7669_v0 }
  0x49   :  { %337 = vmatpush1.bf16.msra.mxu0 %v6804_v17  ;;  %p7605_p0 = por %p7604_p13, %p7603_p12 }
  0x4a   :  { %378 = vmatpush1.bf16.msra.mxu1 %v6807_v18  ;;  %338 = vmatprep.subr.bf16.mxu0 %v6812_v19 }
  0x4b   :  { %379 = vmatprep.subr.bf16.mxu1 %v6815_v20  ;;  %p7606_p1 = pnand %p7605_p0, %p7599_p11 }
  0x4d   :  { %339 = vmatpush1.bf16.msra.mxu0 %v6810_v21 }
  0x4e   :  { %380 = vmatpush1.bf16.msra.mxu1 %v6813_v22  ;;  %340 = vmatprep.subr.bf16.mxu0 %v6818_v24 }
  0x4f   :  { %381 = vmatprep.subr.bf16.mxu1 %v6821_v25 }
  0x51   :  { %341 = vmatpush1.bf16.msra.mxu0 %v6816_v27 }
  0x52   :  { %382 = vmatpush1.bf16.msra.mxu1 %v6819_v28 }
  0x54   :  { %5980 = vmatmul.mubr.msk.bf16.vlgmr.msra.gmra.mxu0 %vm322_vm2, %v112_v29 }
  0x55   :  { %5981 = vmatmul.mubr.msk.bf16.vlgmr.msra.gmra.mxu1 %vm322_vm2, %v112_v29 }
  0x56   :  { %7609 = shalt.err (!%p7606_p1)  }
  0x57   :  { %97 = dma.hbm_to_vmem [thread:$0]  %s7944_s4, 32768, %s95_s7, [#allocation4] }
  0x58   :  { %s7618_s14 = scalar_lea.vmem %s107_s10, 57344  ;;  %p7623_p3 = scmp.lt.s32.totalorder %s107_s10, %s107_s10 }
  0x59   :  { %p7619_p2 = scmp.ne.s32.totalorder %s107_s10, %s7618_s14  ;;  %p7624_p4 = scmp.lt.s32.totalorder %s7618_s14, %s7618_s14 }
  0x5b   :  { %p7625_p5 = por %p7624_p4, %p7623_p3 }
  0x5d   :  { %p7626_p6 = pnand %p7625_p5, %p7619_p2 }
  0x5f   :  { %7629 = shalt.err (!%p7626_p6)  }
  0x60   :  { %109 = dma.hbm_to_vmem [thread:$0]  %s7946_s6, 57344, %s107_s10, [#allocation4 + $0x1]  ;;  %v410_v34 = vlaneseq  ;;  %v408_v42 = vld [vmem:[#allocation10] sm:$0xf] }
  0x62   :  { %v7742_v39 = vshrl.u32 %v410_v34, 7 }
  0x64   :  { %v7745_v40 = vsub.s32 0, %v7742_v39  ;;  %v7748_v41 = vsub.s32 2, %v7742_v39  ;;  %v7751_v43 = vsub.s32 1, %v7742_v39  ;;  %v7754_v44 = vsub.s32 3, %v7742_v39 }
  0x66   :  { %v413_v45 = vrot.slane %v408_v42, %v7745_v40  ;;  %v421_v46 = vrot.slane %v408_v42, %v7748_v41  ;;  %v417_v51 = vrot.slane %v408_v42, %v7751_v43  ;;  %v425_v52 = vrot.slane %v408_v42, %v7754_v44 }
 0x104   :  { %v194_v30 = vpop.f32.mrf.mxu0 }
 0x105   :  { %v235_v31 = vpop.f32.mrf.mxu1 }
 0x106   :  { %v196_v32 = vpop.f32.mrf.mxu0 }
 0x107   :  { %v237_v33 = vpop.f32.mrf.mxu1 }
 0x108   :  { %v198_v35 = vpop.f32.mrf.mxu0 }
 0x109   :  { %v239_v36 = vpop.f32.mrf.mxu1 }
 0x10a   :  { %v199_v37 = vpop.f32.mrf.mxu0 }
 0x10b   :  { %v240_v38 = vpop.f32.mrf.mxu1 }
 0x114   :  { %v360_v47 = vpop.f32.mrf.mxu0 }
 0x115   :  { %v401_v48 = vpop.f32.mrf.mxu1  ;;  %v361_v49 = vadd.f32 %v360_v47, %v194_v30 }
 0x116   :  { %v402_v50 = vadd.f32 %v401_v48, %v235_v31  ;;  %v362_v53 = vpop.f32.mrf.mxu0 }
 0x117   :  { %v403_v54 = vpop.f32.mrf.mxu1  ;;  %v7760_v55 = vadd.f32 %v413_v45, %v361_v49  ;;  %v363_v57 = vadd.f32 %v362_v53, %v196_v32 }
 0x118   :  { %v7762_v56 = vadd.f32 %v421_v46, %v402_v50  ;;  %v404_v58 = vadd.f32 %v403_v54, %v237_v33  ;;  %v364_v59 = vpop.f32.mrf.mxu0 }
 0x119   :  { %v405_v60 = vpop.f32.mrf.mxu1  ;;  %v434_v61 = vmax.f32 %v7760_v55, 0.0  ;;  %v431_v63 = vadd.f32 %v417_v51, %v363_v57 }
 0x11a   :  { %v436_v62 = vmax.f32 %v7762_v56, 0.0  ;;  %v433_v0 = vadd.f32 %v425_v52, %v404_v58  ;;  %v365_v1 = vpop.f32.mrf.mxu0 }
 0x11b   :  { %v406_v2 = vpop.f32.mrf.mxu1  ;;  %v435_v3 = vmax.f32 %v431_v63, 0.0 }
 0x11c   :  { %v437_v4 = vmax.f32 %v433_v0, 0.0 }
 0x11d   :  { %7656 = dma.done.wait [#allocation4], 32768 }
 0x11e   :  { %7657 = vsyncadd [#allocation4], 4294934528  ;;  %v7766_v5 = vpack.c.bf16 %v435_v3, %v435_v3  ;;  %v7768_v6 = vpack.c.bf16 %v437_v4, %v437_v4  ;;  %v502_v7 = vld [vmem:[#allocation2 + $0x1c0] sm:$0xff]  ;;  %v491_v55 = vld [vmem:[#allocation2 + $0x168] sm:$0xff] }
 0x11f   :  { %v506_v8 = vld [vmem:[#allocation2 + $0x1e0] sm:$0xff] }
 0x120   :  { %2056 = vmatprep.mubr.bf16.mxu0 %v7766_v5  ;;  %2097 = vmatprep.mubr.bf16.mxu1 %v7768_v6  ;;  %v630_v9 = vld [vmem:[#allocation2 + $0x5c0] sm:$0xff]  ;;  %v6039_v10 = vcombine.high %v502_v7, %v506_v8  ;;  %v6038_v12 = vcombine.low %v502_v7, %v506_v8 }
 0x121   :  { %v634_v11 = vld [vmem:[#allocation2 + $0x5e0] sm:$0xff] }
 0x122   :  { %v494_v13 = vld [vmem:[#allocation2 + $0x180] sm:$0xff]  ;;  %v6167_v15 = vcombine.high %v630_v9, %v634_v11  ;;  %v6166_v16 = vcombine.low %v630_v9, %v634_v11  ;;  %2024 = vmatprep.subr.bf16.mxu0 %v6039_v10 }
 0x123   :  { %v498_v14 = vld [vmem:[#allocation2 + $0x1a0] sm:$0xff]  ;;  %2025 = vmatpush1.bf16.msra.mxu0 %v6038_v12 }
 0x124   :  { %v6031_v17 = vcombine.high %v494_v13, %v498_v14  ;;  %v622_v18 = vld [vmem:[#allocation2 + $0x580] sm:$0xff]  ;;  %2065 = vmatprep.subr.bf16.mxu1 %v6167_v15  ;;  %v6030_v25 = vcombine.low %v494_v13, %v498_v14 }
 0x125   :  { %v626_v19 = vld [vmem:[#allocation2 + $0x5a0] sm:$0xff]  ;;  %2066 = vmatpush1.bf16.msra.mxu1 %v6166_v16 }
 0x126   :  { %v486_v20 = vld [vmem:[#allocation2 + $0x140] sm:$0xff]  ;;  %v6159_v21 = vcombine.high %v622_v18, %v626_v19  ;;  %2026 = vmatprep.subr.bf16.mxu0 %v6031_v17  ;;  %v6158_v26 = vcombine.low %v622_v18, %v626_v19 }
 0x127   :  { %v490_v22 = vld [vmem:[#allocation2 + $0x160] sm:$0xff]  ;;  %2027 = vmatpush1.bf16.msra.mxu0 %v6030_v25 }
 0x128   :  { %v614_v23 = vld [vmem:[#allocation2 + $0x540] sm:$0xff]  ;;  %v6023_v27 = vcombine.high %v486_v20, %v490_v22  ;;  %2067 = vmatprep.subr.bf16.mxu1 %v6159_v21  ;;  %v6022_v33 = vcombine.low %v486_v20, %v490_v22 }
 0x129   :  { %v618_v24 = vld [vmem:[#allocation2 + $0x560] sm:$0xff]  ;;  %2068 = vmatpush1.bf16.msra.mxu1 %v6158_v26 }
 0x12a   :  { %v6151_v28 = vcombine.high %v614_v23, %v618_v24  ;;  %v478_v29 = vld [vmem:[#allocation2 + $0x100] sm:$0xff]  ;;  %2028 = vmatprep.subr.bf16.mxu0 %v6023_v27  ;;  %v6150_v34 = vcombine.low %v614_v23, %v618_v24 }
 0x12b   :  { %v482_v30 = vld [vmem:[#allocation2 + $0x120] sm:$0xff]  ;;  %2029 = vmatpush1.bf16.msra.mxu0 %v6022_v33 }
 0x12c   :  { %v606_v31 = vld [vmem:[#allocation2 + $0x500] sm:$0xff]  ;;  %v6015_v35 = vcombine.high %v478_v29, %v482_v30  ;;  %2069 = vmatprep.subr.bf16.mxu1 %v6151_v28  ;;  %v6014_v46 = vcombine.low %v478_v29, %v482_v30 }
 0x12d   :  { %v610_v32 = vld [vmem:[#allocation2 + $0x520] sm:$0xff]  ;;  %2070 = vmatpush1.bf16.msra.mxu1 %v6150_v34 }
 0x12e   :  { %v6143_v36 = vcombine.high %v606_v31, %v610_v32  ;;  %v470_v37 = vld [vmem:[#allocation2 + $0xc0] sm:$0xff]  ;;  %2030 = vmatprep.subr.bf16.mxu0 %v6015_v35  ;;  %v6142_v47 = vcombine.low %v606_v31, %v610_v32 }
 0x12f   :  { %v474_v38 = vld [vmem:[#allocation2 + $0xe0] sm:$0xff]  ;;  %2031 = vmatpush1.bf16.msra.mxu0 %v6014_v46 }
 0x130   :  { %v598_v42 = vld [vmem:[#allocation2 + $0x4c0] sm:$0xff]  ;;  %v6007_v48 = vcombine.high %v470_v37, %v474_v38  ;;  %2071 = vmatprep.subr.bf16.mxu1 %v6143_v36  ;;  %v6006_v54 = vcombine.low %v470_v37, %v474_v38 }
 0x131   :  { %v602_v45 = vld [vmem:[#allocation2 + $0x4e0] sm:$0xff]  ;;  %2072 = vmatpush1.bf16.msra.mxu1 %v6142_v47 }
 0x132   :  { %v6135_v49 = vcombine.high %v598_v42, %v602_v45  ;;  %v462_v50 = vld [vmem:[#allocation2 + $0x80] sm:$0xff]  ;;  %2032 = vmatprep.subr.bf16.mxu0 %v6007_v48  ;;  %v6134_v57 = vcombine.low %v598_v42, %v602_v45 }
 0x133   :  { %v466_v51 = vld [vmem:[#allocation2 + $0xa0] sm:$0xff]  ;;  %2033 = vmatpush1.bf16.msra.mxu0 %v6006_v54 }
 0x134   :  { %v590_v52 = vld [vmem:[#allocation2 + $0x480] sm:$0xff]  ;;  %v5999_v58 = vcombine.high %v462_v50, %v466_v51  ;;  %2073 = vmatprep.subr.bf16.mxu1 %v6135_v49  ;;  %v5998_v2 = vcombine.low %v462_v50, %v466_v51 }
 0x135   :  { %v594_v53 = vld [vmem:[#allocation2 + $0x4a0] sm:$0xff]  ;;  %2074 = vmatpush1.bf16.msra.mxu1 %v6134_v57 }
 0x136   :  { %v6127_v59 = vcombine.high %v590_v52, %v594_v53  ;;  %v454_v60 = vld [vmem:[#allocation2 + $0x40] sm:$0xff]  ;;  %2034 = vmatprep.subr.bf16.mxu0 %v5999_v58  ;;  %v6126_v3 = vcombine.low %v590_v52, %v594_v53 }
 0x137   :  { %v458_v63 = vld [vmem:[#allocation2 + $0x60] sm:$0xff]  ;;  %2035 = vmatpush1.bf16.msra.mxu0 %v5998_v2 }
 0x138   :  { %v582_v0 = vld [vmem:[#allocation2 + $0x440] sm:$0xff]  ;;  %v5991_v4 = vcombine.high %v454_v60, %v458_v63  ;;  %2075 = vmatprep.subr.bf16.mxu1 %v6127_v59  ;;  %v5990_v12 = vcombine.low %v454_v60, %v458_v63 }
 0x139   :  { %v586_v1 = vld [vmem:[#allocation2 + $0x460] sm:$0xff]  ;;  %2076 = vmatpush1.bf16.msra.mxu1 %v6126_v3 }
 0x13a   :  { %v6119_v7 = vcombine.high %v582_v0, %v586_v1  ;;  %v446_v8 = vld [vmem:[#allocation2] sm:$0xff]  ;;  %2036 = vmatprep.subr.bf16.mxu0 %v5991_v4  ;;  %v6118_v13 = vcombine.low %v582_v0, %v586_v1 }
 0x13b   :  { %v450_v9 = vld [vmem:[#allocation2 + $0x20] sm:$0xff]  ;;  %2037 = vmatpush1.bf16.msra.mxu0 %v5990_v12 }
 0x13c   :  { %v574_v10 = vld [vmem:[#allocation2 + $0x400] sm:$0xff]  ;;  %v5983_v14 = vcombine.high %v446_v8, %v450_v9  ;;  %2077 = vmatprep.subr.bf16.mxu1 %v6119_v7  ;;  %v5982_v20 = vcombine.low %v446_v8, %v450_v9 }
 0x13d   :  { %v578_v11 = vld [vmem:[#allocation2 + $0x420] sm:$0xff]  ;;  %2078 = vmatpush1.bf16.msra.mxu1 %v6118_v13 }
 0x13e   :  { %v6111_v15 = vcombine.high %v574_v10, %v578_v11  ;;  %v566_v16 = vld [vmem:[#allocation2 + $0x3c0] sm:$0xff]  ;;  %2038 = vmatprep.subr.bf16.mxu0 %v5983_v14  ;;  %v6110_v21 = vcombine.low %v574_v10, %v578_v11 }
 0x13f   :  { %v570_v17 = vld [vmem:[#allocation2 + $0x3e0] sm:$0xff]  ;;  %2039 = vmatpush1.bf16.msra.mxu0 %v5982_v20 }
 0x140   :  { %v694_v18 = vld [vmem:[#allocation2 + $0x7c0] sm:$0xff]  ;;  %v6103_v22 = vcombine.high %v566_v16, %v570_v17  ;;  %2079 = vmatprep.subr.bf16.mxu1 %v6111_v15  ;;  %v6102_v28 = vcombine.low %v566_v16, %v570_v17 }
 0x141   :  { %v698_v19 = vld [vmem:[#allocation2 + $0x7e0] sm:$0xff]  ;;  %2080 = vmatpush1.bf16.msra.mxu1 %v6110_v21 }
 0x142   :  { %v6231_v23 = vcombine.high %v694_v18, %v698_v19  ;;  %v558_v24 = vld [vmem:[#allocation2 + $0x380] sm:$0xff]  ;;  %2040 = vmatprep.subr.bf16.mxu0 %v6103_v22  ;;  %v6230_v29 = vcombine.low %v694_v18, %v698_v19 }
 0x143   :  { %v562_v25 = vld [vmem:[#allocation2 + $0x3a0] sm:$0xff]  ;;  %2041 = vmatpush2.bf16.msra.mxu0 %v6102_v28  ;;  %v507_v28 = vld [vmem:[#allocation2 + $0x1e8] sm:$0xff] }
 0x144   :  { %v686_v26 = vld [vmem:[#allocation2 + $0x780] sm:$0xff]  ;;  %v6095_v30 = vcombine.high %v558_v24, %v562_v25  ;;  %2081 = vmatprep.subr.bf16.mxu1 %v6231_v23  ;;  %v6094_v36 = vcombine.low %v558_v24, %v562_v25 }
 0x145   :  { %v690_v27 = vld [vmem:[#allocation2 + $0x7a0] sm:$0xff]  ;;  %2082 = vmatpush2.bf16.msra.mxu1 %v6230_v29  ;;  %v631_v29 = vld [vmem:[#allocation2 + $0x5c8] sm:$0xff] }
 0x146   :  { %v6223_v31 = vcombine.high %v686_v26, %v690_v27  ;;  %v550_v32 = vld [vmem:[#allocation2 + $0x340] sm:$0xff]  ;;  %2042 = vmatprep.subr.bf16.mxu0 %v6095_v30  ;;  %v6222_v37 = vcombine.low %v686_v26, %v690_v27  ;;  %v503_v27 = vld [vmem:[#allocation2 + $0x1c8] sm:$0xff] }
 0x147   :  { %v554_v33 = vld [vmem:[#allocation2 + $0x360] sm:$0xff]  ;;  %2043 = vmatpush2.bf16.msra.mxu0 %v6094_v36  ;;  %v635_v30 = vld [vmem:[#allocation2 + $0x5e8] sm:$0xff] }
 0x148   :  { %v678_v34 = vld [vmem:[#allocation2 + $0x740] sm:$0xff]  ;;  %v6087_v38 = vcombine.high %v550_v32, %v554_v33  ;;  %2083 = vmatprep.subr.bf16.mxu1 %v6223_v31  ;;  %v6086_v49 = vcombine.low %v550_v32, %v554_v33  ;;  %v6041_v33 = vcombine.high %v503_v27, %v507_v28  ;;  %v499_v36 = vld [vmem:[#allocation2 + $0x1a8] sm:$0xff] }
 0x149   :  { %v682_v35 = vld [vmem:[#allocation2 + $0x760] sm:$0xff]  ;;  %2084 = vmatpush2.bf16.msra.mxu1 %v6222_v37  ;;  %v7775_v37 = vpack.c.bf16 %v434_v61, %v434_v61  ;;  %v615_v61 = vld [vmem:[#allocation2 + $0x548] sm:$0xff] }
 0x14a   :  { %v6215_v42 = vcombine.high %v678_v34, %v682_v35  ;;  %v542_v45 = vld [vmem:[#allocation2 + $0x300] sm:$0xff]  ;;  %2044 = vmatprep.subr.bf16.mxu0 %v6087_v38  ;;  %v6214_v50 = vcombine.low %v678_v34, %v682_v35  ;;  %v6169_v34 = vcombine.high %v631_v29, %v635_v30  ;;  %v495_v35 = vld [vmem:[#allocation2 + $0x188] sm:$0xff] }
 0x14b   :  { %v546_v46 = vld [vmem:[#allocation2 + $0x320] sm:$0xff]  ;;  %2045 = vmatpush2.bf16.msra.mxu0 %v6086_v49  ;;  %v623_v38 = vld [vmem:[#allocation2 + $0x588] sm:$0xff]  ;;  %v6032_v56 = vcombine.low %v495_v35, %v499_v36 }
 0x14c   :  { %v670_v47 = vld [vmem:[#allocation2 + $0x700] sm:$0xff]  ;;  %v6079_v51 = vcombine.high %v542_v45, %v546_v46  ;;  %2085 = vmatprep.subr.bf16.mxu1 %v6215_v42  ;;  %v6078_v59 = vcombine.low %v542_v45, %v546_v46  ;;  %v627_v42 = vld [vmem:[#allocation2 + $0x5a8] sm:$0xff]  ;;  %v7780_v45 = vpack.c.bf16 %v436_v62, %v436_v62  ;;  %v6040_v46 = vcombine.low %v503_v27, %v507_v28 }
 0x14d   :  { %v674_v48 = vld [vmem:[#allocation2 + $0x720] sm:$0xff]  ;;  %2086 = vmatpush2.bf16.msra.mxu1 %v6214_v50  ;;  %v6161_v49 = vcombine.high %v623_v38, %v627_v42  ;;  %v487_v50 = vld [vmem:[#allocation2 + $0x148] sm:$0xff]  ;;  %v6160_v62 = vcombine.low %v623_v38, %v627_v42 }
 0x14e   :  { %v6207_v52 = vcombine.high %v670_v47, %v674_v48  ;;  %v534_v53 = vld [vmem:[#allocation2 + $0x2c0] sm:$0xff]  ;;  %2046 = vmatprep.subr.bf16.mxu0 %v6079_v51  ;;  %v6206_v60 = vcombine.low %v670_v47, %v674_v48  ;;  %v6168_v47 = vcombine.low %v631_v29, %v635_v30  ;;  %v6033_v48 = vcombine.high %v495_v35, %v499_v36  ;;  %v619_v51 = vld [vmem:[#allocation2 + $0x568] sm:$0xff] }
 0x14f   :  { %v538_v54 = vld [vmem:[#allocation2 + $0x2e0] sm:$0xff]  ;;  %2047 = vmatpush2.bf16.msra.mxu0 %v6078_v59  ;;  %v611_v59 = vld [vmem:[#allocation2 + $0x528] sm:$0xff] }
 0x150   :  { %v662_v57 = vld [vmem:[#allocation2 + $0x6c0] sm:$0xff]  ;;  %v6071_v63 = vcombine.high %v534_v53, %v538_v54  ;;  %2087 = vmatprep.subr.bf16.mxu1 %v6207_v52  ;;  %v6070_v7 = vcombine.low %v534_v53, %v538_v54  ;;  %v6025_v52 = vcombine.high %v487_v50, %v491_v55  ;;  %v6153_v53 = vcombine.high %v615_v61, %v619_v51  ;;  %v479_v54 = vld [vmem:[#allocation2 + $0x108] sm:$0xff] }
 0x151   :  { %v666_v58 = vld [vmem:[#allocation2 + $0x6e0] sm:$0xff]  ;;  %2088 = vmatpush2.bf16.msra.mxu1 %v6206_v60  ;;  %v6024_v60 = vcombine.low %v487_v50, %v491_v55  ;;  %v447_v28 = vld [vmem:[#allocation2 + $0x8] sm:$0xff] }
 0x152   :  { %v6199_v0 = vcombine.high %v662_v57, %v666_v58  ;;  %v526_v1 = vld [vmem:[#allocation2 + $0x280] sm:$0xff]  ;;  %2048 = vmatprep.subr.bf16.mxu0 %v6071_v63  ;;  %v6198_v8 = vcombine.low %v662_v57, %v666_v58  ;;  %v483_v57 = vld [vmem:[#allocation2 + $0x128] sm:$0xff]  ;;  %v6152_v63 = vcombine.low %v615_v61, %v619_v51 }
 0x153   :  { %v530_v2 = vld [vmem:[#allocation2 + $0x2a0] sm:$0xff]  ;;  %2049 = vmatpush2.bf16.msra.mxu0 %v6070_v7  ;;  %v607_v58 = vld [vmem:[#allocation2 + $0x508] sm:$0xff] }
 0x154   :  { %v654_v3 = vld [vmem:[#allocation2 + $0x680] sm:$0xff]  ;;  %v6063_v9 = vcombine.high %v526_v1, %v530_v2  ;;  %2089 = vmatprep.subr.bf16.mxu1 %v6199_v0  ;;  %v6062_v15 = vcombine.low %v526_v1, %v530_v2  ;;  %v6017_v0 = vcombine.high %v479_v54, %v483_v57  ;;  %v6145_v1 = vcombine.high %v607_v58, %v611_v59  ;;  %v471_v2 = vld [vmem:[#allocation2 + $0xc8] sm:$0xff] }
 0x155   :  { %v658_v4 = vld [vmem:[#allocation2 + $0x6a0] sm:$0xff]  ;;  %2090 = vmatpush2.bf16.msra.mxu1 %v6198_v8  ;;  %v603_v7 = vld [vmem:[#allocation2 + $0x4e8] sm:$0xff]  ;;  %v6016_v8 = vcombine.low %v479_v54, %v483_v57 }
 0x156   :  { %v6191_v10 = vcombine.high %v654_v3, %v658_v4  ;;  %v518_v11 = vld [vmem:[#allocation2 + $0x240] sm:$0xff]  ;;  %2050 = vmatprep.subr.bf16.mxu0 %v6063_v9  ;;  %v6190_v16 = vcombine.low %v654_v3, %v658_v4  ;;  %v475_v3 = vld [vmem:[#allocation2 + $0xe8] sm:$0xff]  ;;  %v6144_v9 = vcombine.low %v607_v58, %v611_v59 }
 0x157   :  { %v522_v12 = vld [vmem:[#allocation2 + $0x260] sm:$0xff]  ;;  %2051 = vmatpush2.bf16.msra.mxu0 %v6062_v15  ;;  %v599_v4 = vld [vmem:[#allocation2 + $0x4c8] sm:$0xff] }
 0x158   :  { %v646_v13 = vld [vmem:[#allocation2 + $0x640] sm:$0xff]  ;;  %v6055_v17 = vcombine.high %v518_v11, %v522_v12  ;;  %2091 = vmatprep.subr.bf16.mxu1 %v6191_v10  ;;  %v6054_v23 = vcombine.low %v518_v11, %v522_v12  ;;  %v6009_v10 = vcombine.high %v471_v2, %v475_v3  ;;  %v6137_v11 = vcombine.high %v599_v4, %v603_v7  ;;  %v463_v12 = vld [vmem:[#allocation2 + $0x88] sm:$0xff] }
 0x159   :  { %v650_v14 = vld [vmem:[#allocation2 + $0x660] sm:$0xff]  ;;  %2092 = vmatpush2.bf16.msra.mxu1 %v6190_v16  ;;  %v595_v15 = vld [vmem:[#allocation2 + $0x4a8] sm:$0xff]  ;;  %v6008_v16 = vcombine.low %v471_v2, %v475_v3 }
 0x15a   :  { %v6183_v18 = vcombine.high %v646_v13, %v650_v14  ;;  %v510_v19 = vld [vmem:[#allocation2 + $0x200] sm:$0xff]  ;;  %2052 = vmatprep.subr.bf16.mxu0 %v6055_v17  ;;  %v6182_v24 = vcombine.low %v646_v13, %v650_v14  ;;  %v467_v13 = vld [vmem:[#allocation2 + $0xa8] sm:$0xff]  ;;  %v6136_v17 = vcombine.low %v599_v4, %v603_v7 }
 0x15b   :  { %v514_v20 = vld [vmem:[#allocation2 + $0x220] sm:$0xff]  ;;  %2053 = vmatpush2.bf16.msra.mxu0 %v6054_v23  ;;  %v591_v14 = vld [vmem:[#allocation2 + $0x488] sm:$0xff] }
 0x15c   :  { %v638_v21 = vld [vmem:[#allocation2 + $0x600] sm:$0xff]  ;;  %v6047_v25 = vcombine.high %v510_v19, %v514_v20  ;;  %2093 = vmatprep.subr.bf16.mxu1 %v6183_v18  ;;  %v6046_v31 = vcombine.low %v510_v19, %v514_v20  ;;  %v6001_v18 = vcombine.high %v463_v12, %v467_v13  ;;  %v6129_v19 = vcombine.high %v591_v14, %v595_v15  ;;  %v455_v20 = vld [vmem:[#allocation2 + $0x48] sm:$0xff] }
 0x15d   :  { %v642_v22 = vld [vmem:[#allocation2 + $0x620] sm:$0xff]  ;;  %2094 = vmatpush2.bf16.msra.mxu1 %v6182_v24  ;;  %v587_v23 = vld [vmem:[#allocation2 + $0x468] sm:$0xff]  ;;  %v6000_v24 = vcombine.low %v463_v12, %v467_v13 }
 0x15e   :  { %v6175_v26 = vcombine.high %v638_v21, %v642_v22  ;;  %2054 = vmatprep.subr.bf16.mxu0 %v6047_v25  ;;  %v6174_v32 = vcombine.low %v638_v21, %v642_v22  ;;  %v459_v21 = vld [vmem:[#allocation2 + $0x68] sm:$0xff]  ;;  %v6128_v25 = vcombine.low %v591_v14, %v595_v15 }
 0x15f   :  { %2055 = vmatpush2.bf16.msra.mxu0 %v6046_v31  ;;  %v583_v22 = vld [vmem:[#allocation2 + $0x448] sm:$0xff] }
 0x160   :  { %2095 = vmatprep.subr.bf16.mxu1 %v6175_v26  ;;  %2106 = vmatprep.subr.bf16.mxu0 %v6041_v33  ;;  %v5993_v26 = vcombine.high %v455_v20, %v459_v21  ;;  %v6121_v27 = vcombine.high %v583_v22, %v587_v23  ;;  %v451_v29 = vld [vmem:[#allocation2 + $0x28] sm:$0xff]  ;;  %v6120_v33 = vcombine.low %v583_v22, %v587_v23 }
 0x161   :  { %2096 = vmatpush2.bf16.msra.mxu1 %v6174_v32  ;;  %v575_v30 = vld [vmem:[#allocation2 + $0x408] sm:$0xff]  ;;  %v5992_v32 = vcombine.low %v455_v20, %v459_v21 }
 0x162   :  { %2147 = vmatprep.subr.bf16.mxu1 %v6169_v34  ;;  %2057 = vmatmul.mubr.bf16.vlgmr.msra.gmra.mxu0 %v7775_v37  ;;  %v579_v31 = vld [vmem:[#allocation2 + $0x428] sm:$0xff]  ;;  %v5985_v34 = vcombine.high %v447_v28, %v451_v29 }
 0x163   :  { %2107 = vmatpush1.bf16.msra.mxu0 %v6040_v46  ;;  %2138 = vmatprep.mubr.bf16.mxu0 %v7766_v5  ;;  %v6113_v35 = vcombine.high %v575_v30, %v579_v31  ;;  %v567_v36 = vld [vmem:[#allocation2 + $0x3c8] sm:$0xff] }
 0x164   :  { %2098 = vmatmul.mubr.bf16.vlgmr.msra.gmra.mxu1 %v7780_v45  ;;  %2108 = vmatprep.subr.bf16.mxu0 %v6033_v48  ;;  %v571_v38 = vld [vmem:[#allocation2 + $0x3e8] sm:$0xff]  ;;  %v6112_v48 = vcombine.low %v575_v30, %v579_v31 }
 0x165   :  { %2148 = vmatpush1.bf16.msra.mxu1 %v6168_v47  ;;  %2179 = vmatprep.mubr.bf16.mxu1 %v7768_v6  ;;  %v695_v42 = vld [vmem:[#allocation2 + $0x7c8] sm:$0xff]  ;;  %v5984_v47 = vcombine.low %v447_v28, %v451_v29 }
 0x166   :  { %2149 = vmatprep.subr.bf16.mxu1 %v6161_v49  ;;  %v699_v46 = vld [vmem:[#allocation2 + $0x7e8] sm:$0xff]  ;;  %v6105_v49 = vcombine.high %v567_v36, %v571_v38 }
 0x167   :  { %2109 = vmatpush1.bf16.msra.mxu0 %v6032_v56  ;;  %v6233_v50 = vcombine.high %v695_v42, %v699_v46  ;;  %v559_v55 = vld [vmem:[#allocation2 + $0x388] sm:$0xff] }
 0x168   :  { %2110 = vmatprep.subr.bf16.mxu0 %v6025_v52  ;;  %v563_v61 = vld [vmem:[#allocation2 + $0x3a8] sm:$0xff]  ;;  %v6232_v52 = vcombine.low %v695_v42, %v699_v46 }
 0x169   :  { %2150 = vmatpush1.bf16.msra.mxu1 %v6160_v62  ;;  %v687_v51 = vld [vmem:[#allocation2 + $0x788] sm:$0xff]  ;;  %v6104_v62 = vcombine.low %v567_v36, %v571_v38 }
 0x16a   :  { %2151 = vmatprep.subr.bf16.mxu1 %v6153_v53  ;;  %v691_v56 = vld [vmem:[#allocation2 + $0x7a8] sm:$0xff]  ;;  %v6097_v53 = vcombine.high %v559_v55, %v563_v61 }
 0x16b   :  { %2111 = vmatpush1.bf16.msra.mxu0 %v6024_v60  ;;  %v6225_v54 = vcombine.high %v687_v51, %v691_v56  ;;  %v551_v57 = vld [vmem:[#allocation2 + $0x348] sm:$0xff] }
 0x16c   :  { %2112 = vmatprep.subr.bf16.mxu0 %v6017_v0  ;;  %v555_v58 = vld [vmem:[#allocation2 + $0x368] sm:$0xff]  ;;  %v6224_v0 = vcombine.low %v687_v51, %v691_v56  ;;  %v508_v51 = vld [vmem:[#allocation2 + $0x1f0] sm:$0xff] }
 0x16d   :  { %2152 = vmatpush1.bf16.msra.mxu1 %v6152_v63  ;;  %v679_v59 = vld [vmem:[#allocation2 + $0x748] sm:$0xff]  ;;  %v6096_v63 = vcombine.low %v559_v55, %v563_v61  ;;  %v504_v61 = vld [vmem:[#allocation2 + $0x1d0] sm:$0xff] }
 0x16e   :  { %2153 = vmatprep.subr.bf16.mxu1 %v6145_v1  ;;  %v683_v60 = vld [vmem:[#allocation2 + $0x768] sm:$0xff]  ;;  %v6089_v1 = vcombine.high %v551_v57, %v555_v58  ;;  %v632_v56 = vld [vmem:[#allocation2 + $0x5d0] sm:$0xff] }
 0x16f   :  { %2113 = vmatpush1.bf16.msra.mxu0 %v6016_v8  ;;  %v6217_v2 = vcombine.high %v679_v59, %v683_v60  ;;  %v543_v3 = vld [vmem:[#allocation2 + $0x308] sm:$0xff] }
 0x170   :  { %2114 = vmatprep.subr.bf16.mxu0 %v6009_v10  ;;  %v547_v4 = vld [vmem:[#allocation2 + $0x328] sm:$0xff]  ;;  %v6216_v10 = vcombine.low %v679_v59, %v683_v60  ;;  %v500_v59 = vld [vmem:[#allocation2 + $0x1b0] sm:$0xff] }
 0x171   :  { %2154 = vmatpush1.bf16.msra.mxu1 %v6144_v9  ;;  %v671_v7 = vld [vmem:[#allocation2 + $0x708] sm:$0xff]  ;;  %v6088_v9 = vcombine.low %v551_v57, %v555_v58  ;;  %v496_v58 = vld [vmem:[#allocation2 + $0x190] sm:$0xff] }
 0x172   :  { %2155 = vmatprep.subr.bf16.mxu1 %v6137_v11  ;;  %v675_v8 = vld [vmem:[#allocation2 + $0x728] sm:$0xff]  ;;  %v6081_v11 = vcombine.high %v543_v3, %v547_v4  ;;  %v624_v60 = vld [vmem:[#allocation2 + $0x590] sm:$0xff] }
 0x173   :  { %2115 = vmatpush1.bf16.msra.mxu0 %v6008_v16  ;;  %v6209_v12 = vcombine.high %v671_v7, %v675_v8  ;;  %v535_v13 = vld [vmem:[#allocation2 + $0x2c8] sm:$0xff] }
 0x174   :  { %2116 = vmatprep.subr.bf16.mxu0 %v6001_v18  ;;  %v539_v14 = vld [vmem:[#allocation2 + $0x2e8] sm:$0xff]  ;;  %v6208_v18 = vcombine.low %v671_v7, %v675_v8  ;;  %v492_v7 = vld [vmem:[#allocation2 + $0x170] sm:$0xff] }
 0x175   :  { %2156 = vmatpush1.bf16.msra.mxu1 %v6136_v17  ;;  %v663_v15 = vld [vmem:[#allocation2 + $0x6c8] sm:$0xff]  ;;  %v6080_v17 = vcombine.low %v543_v3, %v547_v4  ;;  %v488_v4 = vld [vmem:[#allocation2 + $0x150] sm:$0xff] }
 0x176   :  { %2157 = vmatprep.subr.bf16.mxu1 %v6129_v19  ;;  %v667_v16 = vld [vmem:[#allocation2 + $0x6e8] sm:$0xff]  ;;  %v6073_v19 = vcombine.high %v535_v13, %v539_v14  ;;  %v616_v8 = vld [vmem:[#allocation2 + $0x550] sm:$0xff] }
 0x177   :  { %2117 = vmatpush1.bf16.msra.mxu0 %v6000_v24  ;;  %v6201_v20 = vcombine.high %v663_v15, %v667_v16  ;;  %v527_v21 = vld [vmem:[#allocation2 + $0x288] sm:$0xff] }
 0x178   :  { %2118 = vmatprep.subr.bf16.mxu0 %v5993_v26  ;;  %v531_v22 = vld [vmem:[#allocation2 + $0x2a8] sm:$0xff]  ;;  %v6200_v26 = vcombine.low %v663_v15, %v667_v16  ;;  %v484_v15 = vld [vmem:[#allocation2 + $0x130] sm:$0xff] }
 0x179   :  { %2158 = vmatpush1.bf16.msra.mxu1 %v6128_v25  ;;  %v655_v23 = vld [vmem:[#allocation2 + $0x688] sm:$0xff]  ;;  %v6072_v25 = vcombine.low %v535_v13, %v539_v14  ;;  %v480_v14 = vld [vmem:[#allocation2 + $0x110] sm:$0xff] }
 0x17a   :  { %2159 = vmatprep.subr.bf16.mxu1 %v6121_v27  ;;  %v659_v24 = vld [vmem:[#allocation2 + $0x6a8] sm:$0xff]  ;;  %v6065_v27 = vcombine.high %v527_v21, %v531_v22  ;;  %v608_v16 = vld [vmem:[#allocation2 + $0x510] sm:$0xff] }
 0x17b   :  { %2119 = vmatpush1.bf16.msra.mxu0 %v5992_v32  ;;  %v6193_v28 = vcombine.high %v655_v23, %v659_v24  ;;  %v519_v29 = vld [vmem:[#allocation2 + $0x248] sm:$0xff] }
 0x17c   :  { %2120 = vmatprep.subr.bf16.mxu0 %v5985_v34  ;;  %v523_v30 = vld [vmem:[#allocation2 + $0x268] sm:$0xff]  ;;  %v6192_v34 = vcombine.low %v655_v23, %v659_v24  ;;  %v476_v23 = vld [vmem:[#allocation2 + $0xf0] sm:$0xff] }
 0x17d   :  { %2160 = vmatpush1.bf16.msra.mxu1 %v6120_v33  ;;  %v647_v31 = vld [vmem:[#allocation2 + $0x648] sm:$0xff]  ;;  %v6064_v33 = vcombine.low %v527_v21, %v531_v22  ;;  %v472_v22 = vld [vmem:[#allocation2 + $0xd0] sm:$0xff] }
 0x17e   :  { %2161 = vmatprep.subr.bf16.mxu1 %v6113_v35  ;;  %v651_v32 = vld [vmem:[#allocation2 + $0x668] sm:$0xff]  ;;  %v6057_v35 = vcombine.high %v519_v29, %v523_v30  ;;  %v600_v24 = vld [vmem:[#allocation2 + $0x4d0] sm:$0xff] }
 0x17f   :  { %2121 = vmatpush1.bf16.msra.mxu0 %v5984_v47  ;;  %v6185_v36 = vcombine.high %v647_v31, %v651_v32  ;;  %v511_v38 = vld [vmem:[#allocation2 + $0x208] sm:$0xff] }
 0x180   :  { %2122 = vmatprep.subr.bf16.mxu0 %v6105_v49  ;;  %v515_v42 = vld [vmem:[#allocation2 + $0x228] sm:$0xff]  ;;  %v6184_v49 = vcombine.low %v647_v31, %v651_v32  ;;  %v468_v31 = vld [vmem:[#allocation2 + $0xb0] sm:$0xff] }
 0x181   :  { %2162 = vmatpush1.bf16.msra.mxu1 %v6112_v48  ;;  %v639_v46 = vld [vmem:[#allocation2 + $0x608] sm:$0xff]  ;;  %v6056_v48 = vcombine.low %v519_v29, %v523_v30  ;;  %v464_v30 = vld [vmem:[#allocation2 + $0x90] sm:$0xff] }
 0x182   :  { %2163 = vmatprep.subr.bf16.mxu1 %v6233_v50  ;;  %v643_v47 = vld [vmem:[#allocation2 + $0x628] sm:$0xff]  ;;  %v6049_v50 = vcombine.high %v511_v38, %v515_v42  ;;  %v592_v32 = vld [vmem:[#allocation2 + $0x490] sm:$0xff] }
 0x183   :  { %2123 = vmatpush2.bf16.msra.mxu0 %v6104_v62  ;;  %v6177_v55 = vcombine.high %v639_v46, %v643_v47  ;;  %v636_v62 = vld [vmem:[#allocation2 + $0x5f0] sm:$0xff] }
 0x184   :  { %2124 = vmatprep.subr.bf16.mxu0 %v6097_v53  ;;  %v6176_v53 = vcombine.low %v639_v46, %v643_v47  ;;  %v6171_v57 = vcombine.high %v632_v56, %v636_v62  ;;  %v460_v46 = vld [vmem:[#allocation2 + $0x70] sm:$0xff] }
 0x185   :  { %2164 = vmatpush2.bf16.msra.mxu1 %v6232_v52  ;;  %v6048_v52 = vcombine.low %v511_v38, %v515_v42  ;;  %v456_v42 = vld [vmem:[#allocation2 + $0x50] sm:$0xff] }
 0x186   :  { %2165 = vmatprep.subr.bf16.mxu1 %v6225_v54  ;;  %v6043_v54 = vcombine.high %v504_v61, %v508_v51  ;;  %v584_v47 = vld [vmem:[#allocation2 + $0x450] sm:$0xff] }
 0x187   :  { %2125 = vmatpush2.bf16.msra.mxu0 %v6096_v63  ;;  %v628_v63 = vld [vmem:[#allocation2 + $0x5b0] sm:$0xff] }
 0x188   :  { %2126 = vmatprep.subr.bf16.mxu0 %v6089_v1  ;;  %v6170_v1 = vcombine.low %v632_v56, %v636_v62  ;;  %v6163_v3 = vcombine.high %v624_v60, %v628_v63  ;;  %v452_v56 = vld [vmem:[#allocation2 + $0x30] sm:$0xff] }
 0x189   :  { %2166 = vmatpush2.bf16.msra.mxu1 %v6224_v0  ;;  %v6042_v0 = vcombine.low %v504_v61, %v508_v51  ;;  %v448_v51 = vld [vmem:[#allocation2 + $0x10] sm:$0xff] }
 0x18a   :  { %2167 = vmatprep.subr.bf16.mxu1 %v6217_v2  ;;  %v6035_v2 = vcombine.high %v496_v58, %v500_v59  ;;  %v576_v62 = vld [vmem:[#allocation2 + $0x410] sm:$0xff] }
 0x18b   :  { %2127 = vmatpush2.bf16.msra.mxu0 %v6088_v9  ;;  %v620_v9 = vld [vmem:[#allocation2 + $0x570] sm:$0xff] }
 0x18c   :  { %2128 = vmatprep.subr.bf16.mxu0 %v6081_v11  ;;  %v6162_v11 = vcombine.low %v624_v60, %v628_v63  ;;  %v6155_v13 = vcombine.high %v616_v8, %v620_v9  ;;  %v572_v60 = vld [vmem:[#allocation2 + $0x3f0] sm:$0xff] }
 0x18d   :  { %2168 = vmatpush2.bf16.msra.mxu1 %v6216_v10  ;;  %v6034_v10 = vcombine.low %v496_v58, %v500_v59  ;;  %v568_v59 = vld [vmem:[#allocation2 + $0x3d0] sm:$0xff] }
 0x18e   :  { %2169 = vmatprep.subr.bf16.mxu1 %v6209_v12  ;;  %v6027_v12 = vcombine.high %v488_v4, %v492_v7  ;;  %v696_v63 = vld [vmem:[#allocation2 + $0x7d0] sm:$0xff] }
 0x18f   :  { %2129 = vmatpush2.bf16.msra.mxu0 %v6080_v17  ;;  %v612_v17 = vld [vmem:[#allocation2 + $0x530] sm:$0xff] }
 0x190   :  { %2130 = vmatprep.subr.bf16.mxu0 %v6073_v19  ;;  %v6154_v19 = vcombine.low %v616_v8, %v620_v9  ;;  %v6147_v21 = vcombine.high %v608_v16, %v612_v17  ;;  %v564_v8 = vld [vmem:[#allocation2 + $0x3b0] sm:$0xff] }
 0x191   :  { %2170 = vmatpush2.bf16.msra.mxu1 %v6208_v18  ;;  %v6026_v18 = vcombine.low %v488_v4, %v492_v7  ;;  %v560_v7 = vld [vmem:[#allocation2 + $0x390] sm:$0xff] }
 0x192   :  { %2171 = vmatprep.subr.bf16.mxu1 %v6201_v20  ;;  %v6019_v20 = vcombine.high %v480_v14, %v484_v15  ;;  %v688_v9 = vld [vmem:[#allocation2 + $0x790] sm:$0xff] }
 0x193   :  { %2131 = vmatpush2.bf16.msra.mxu0 %v6072_v25  ;;  %v604_v25 = vld [vmem:[#allocation2 + $0x4f0] sm:$0xff] }
 0x194   :  { %2132 = vmatprep.subr.bf16.mxu0 %v6065_v27  ;;  %v6146_v27 = vcombine.low %v608_v16, %v612_v17  ;;  %v6139_v29 = vcombine.high %v600_v24, %v604_v25  ;;  %v556_v16 = vld [vmem:[#allocation2 + $0x370] sm:$0xff] }
 0x195   :  { %2172 = vmatpush2.bf16.msra.mxu1 %v6200_v26  ;;  %v6018_v26 = vcombine.low %v480_v14, %v484_v15  ;;  %v552_v15 = vld [vmem:[#allocation2 + $0x350] sm:$0xff] }
 0x196   :  { %2173 = vmatprep.subr.bf16.mxu1 %v6193_v28  ;;  %v6011_v28 = vcombine.high %v472_v22, %v476_v23  ;;  %v680_v17 = vld [vmem:[#allocation2 + $0x750] sm:$0xff] }
 0x197   :  { %2133 = vmatpush2.bf16.msra.mxu0 %v6064_v33  ;;  %v596_v33 = vld [vmem:[#allocation2 + $0x4b0] sm:$0xff] }
 0x198   :  { %2134 = vmatprep.subr.bf16.mxu0 %v6057_v35  ;;  %v6138_v35 = vcombine.low %v600_v24, %v604_v25  ;;  %v6131_v38 = vcombine.high %v592_v32, %v596_v33  ;;  %v548_v24 = vld [vmem:[#allocation2 + $0x330] sm:$0xff] }
 0x199   :  { %2174 = vmatpush2.bf16.msra.mxu1 %v6192_v34  ;;  %v6010_v34 = vcombine.low %v472_v22, %v476_v23  ;;  %v544_v23 = vld [vmem:[#allocation2 + $0x310] sm:$0xff] }
 0x19a   :  { %2175 = vmatprep.subr.bf16.mxu1 %v6185_v36  ;;  %v6003_v36 = vcombine.high %v464_v30, %v468_v31  ;;  %v672_v25 = vld [vmem:[#allocation2 + $0x710] sm:$0xff] }
 0x19b   :  { %2135 = vmatpush2.bf16.msra.mxu0 %v6056_v48  ;;  %v588_v48 = vld [vmem:[#allocation2 + $0x470] sm:$0xff] }
 0x19c   :  { %2136 = vmatprep.subr.bf16.mxu0 %v6049_v50  ;;  %v6130_v50 = vcombine.low %v592_v32, %v596_v33  ;;  %v6123_v61 = vcombine.high %v584_v47, %v588_v48  ;;  %v540_v32 = vld [vmem:[#allocation2 + $0x2f0] sm:$0xff] }
 0x19d   :  { %2176 = vmatpush2.bf16.msra.mxu1 %v6184_v49  ;;  %v6002_v49 = vcombine.low %v464_v30, %v468_v31  ;;  %v536_v31 = vld [vmem:[#allocation2 + $0x2d0] sm:$0xff] }
 0x19e   :  { %2177 = vmatprep.subr.bf16.mxu1 %v6177_v55  ;;  %v5995_v55 = vcombine.high %v456_v42, %v460_v46  ;;  %v664_v33 = vld [vmem:[#allocation2 + $0x6d0] sm:$0xff] }
 0x19f   :  { %2137 = vmatpush2.bf16.msra.mxu0 %v6048_v52  ;;  %v580_v52 = vld [vmem:[#allocation2 + $0x430] sm:$0xff] }
 0x1a0   :  { %2188 = vmatprep.subr.bf16.mxu0 %v6043_v54  ;;  %v6122_v54 = vcombine.low %v584_v47, %v588_v48  ;;  %v6115_v58 = vcombine.high %v576_v62, %v580_v52  ;;  %v532_v47 = vld [vmem:[#allocation2 + $0x2b0] sm:$0xff] }
 0x1a1   :  { %2178 = vmatpush2.bf16.msra.mxu1 %v6176_v53  ;;  %v5994_v53 = vcombine.low %v456_v42, %v460_v46  ;;  %v528_v46 = vld [vmem:[#allocation2 + $0x290] sm:$0xff] }
 0x1a2   :  { %2229 = vmatprep.subr.bf16.mxu1 %v6171_v57  ;;  %2139 = vmatmul.mubr.bf16.vlgmr.msra.gmra.mxu0 %v7775_v37  ;;  %v5987_v57 = vcombine.high %v448_v51, %v452_v56  ;;  %v656_v48 = vld [vmem:[#allocation2 + $0x690] sm:$0xff] }
 0x1a3   :  { %2189 = vmatpush1.bf16.msra.mxu0 %v6042_v0  ;;  %2220 = vmatprep.mubr.bf16.mxu0 %v7766_v5  ;;  %v700_v0 = vld [vmem:[#allocation2 + $0x7f0] sm:$0xff] }
 0x1a4   :  { %2180 = vmatmul.mubr.bf16.vlgmr.msra.gmra.mxu1 %v7780_v45  ;;  %2190 = vmatprep.subr.bf16.mxu0 %v6035_v2  ;;  %v6114_v2 = vcombine.low %v576_v62, %v580_v52  ;;  %v6235_v4 = vcombine.high %v696_v63, %v700_v0  ;;  %v524_v62 = vld [vmem:[#allocation2 + $0x270] sm:$0xff] }
 0x1a5   :  { %2230 = vmatpush1.bf16.msra.mxu1 %v6170_v1  ;;  %2261 = vmatprep.mubr.bf16.mxu1 %v7768_v6  ;;  %v5986_v1 = vcombine.low %v448_v51, %v452_v56  ;;  %v520_v56 = vld [vmem:[#allocation2 + $0x250] sm:$0xff] }
 0x1a6   :  { %2231 = vmatprep.subr.bf16.mxu1 %v6163_v3  ;;  %v6107_v3 = vcombine.high %v568_v59, %v572_v60  ;;  %v648_v52 = vld [vmem:[#allocation2 + $0x650] sm:$0xff] }
 0x1a7   :  { %2191 = vmatpush1.bf16.msra.mxu0 %v6034_v10  ;;  %v692_v10 = vld [vmem:[#allocation2 + $0x7b0] sm:$0xff] }
 0x1a8   :  { %2192 = vmatprep.subr.bf16.mxu0 %v6027_v12  ;;  %v6234_v12 = vcombine.low %v696_v63, %v700_v0  ;;  %v6227_v14 = vcombine.high %v688_v9, %v692_v10  ;;  %v516_v63 = vld [vmem:[#allocation2 + $0x230] sm:$0xff] }
 0x1a9   :  { %2232 = vmatpush1.bf16.msra.mxu1 %v6162_v11  ;;  %v6106_v11 = vcombine.low %v568_v59, %v572_v60  ;;  %v512_v60 = vld [vmem:[#allocation2 + $0x210] sm:$0xff] }
 0x1aa   :  { %2233 = vmatprep.subr.bf16.mxu1 %v6155_v13  ;;  %v6099_v13 = vcombine.high %v560_v7, %v564_v8  ;;  %v640_v0 = vld [vmem:[#allocation2 + $0x610] sm:$0xff] }
 0x1ab   :  { %2193 = vmatpush1.bf16.msra.mxu0 %v6026_v18  ;;  %v684_v18 = vld [vmem:[#allocation2 + $0x770] sm:$0xff] }
 0x1ac   :  { %2194 = vmatprep.subr.bf16.mxu0 %v6019_v20  ;;  %v6226_v20 = vcombine.low %v688_v9, %v692_v10  ;;  %v6219_v22 = vcombine.high %v680_v17, %v684_v18  ;;  %v509_v9 = vld [vmem:[#allocation2 + $0x1f8] sm:$0xff] }
 0x1ad   :  { %2234 = vmatpush1.bf16.msra.mxu1 %v6154_v19  ;;  %v6098_v19 = vcombine.low %v560_v7, %v564_v8  ;;  %v505_v8 = vld [vmem:[#allocation2 + $0x1d8] sm:$0xff] }
 0x1ae   :  { %2235 = vmatprep.subr.bf16.mxu1 %v6147_v21  ;;  %v6091_v21 = vcombine.high %v552_v15, %v556_v16  ;;  %v633_v10 = vld [vmem:[#allocation2 + $0x5d8] sm:$0xff] }
 0x1af   :  { %2195 = vmatpush1.bf16.msra.mxu0 %v6018_v26  ;;  %v676_v26 = vld [vmem:[#allocation2 + $0x730] sm:$0xff] }
 0x1b0   :  { %2196 = vmatprep.subr.bf16.mxu0 %v6011_v28  ;;  %v6218_v28 = vcombine.low %v680_v17, %v684_v18  ;;  %v6211_v30 = vcombine.high %v672_v25, %v676_v26  ;;  %v501_v17 = vld [vmem:[#allocation2 + $0x1b8] sm:$0xff] }
 0x1b1   :  { %2236 = vmatpush1.bf16.msra.mxu1 %v6146_v27  ;;  %v6090_v27 = vcombine.low %v552_v15, %v556_v16  ;;  %v497_v16 = vld [vmem:[#allocation2 + $0x198] sm:$0xff] }
 0x1b2   :  { %2237 = vmatprep.subr.bf16.mxu1 %v6139_v29  ;;  %v6083_v29 = vcombine.high %v544_v23, %v548_v24  ;;  %v625_v18 = vld [vmem:[#allocation2 + $0x598] sm:$0xff] }
 0x1b3   :  { %2197 = vmatpush1.bf16.msra.mxu0 %v6010_v34  ;;  %v668_v34 = vld [vmem:[#allocation2 + $0x6f0] sm:$0xff] }
 0x1b4   :  { %2198 = vmatprep.subr.bf16.mxu0 %v6003_v36  ;;  %v6210_v36 = vcombine.low %v672_v25, %v676_v26  ;;  %v6203_v42 = vcombine.high %v664_v33, %v668_v34  ;;  %v493_v25 = vld [vmem:[#allocation2 + $0x178] sm:$0xff] }
 0x1b5   :  { %2238 = vmatpush1.bf16.msra.mxu1 %v6138_v35  ;;  %v6082_v35 = vcombine.low %v544_v23, %v548_v24  ;;  %v489_v24 = vld [vmem:[#allocation2 + $0x158] sm:$0xff] }
 0x1b6   :  { %2239 = vmatprep.subr.bf16.mxu1 %v6131_v38  ;;  %v6075_v38 = vcombine.high %v536_v31, %v540_v32  ;;  %v617_v26 = vld [vmem:[#allocation2 + $0x558] sm:$0xff] }
 0x1b7   :  { %2199 = vmatpush1.bf16.msra.mxu0 %v6002_v49  ;;  %v660_v49 = vld [vmem:[#allocation2 + $0x6b0] sm:$0xff] }
 0x1b8   :  { %2200 = vmatprep.subr.bf16.mxu0 %v5995_v55  ;;  %v6202_v55 = vcombine.low %v664_v33, %v668_v34  ;;  %v6195_v51 = vcombine.high %v656_v48, %v660_v49  ;;  %v485_v33 = vld [vmem:[#allocation2 + $0x138] sm:$0xff] }
 0x1b9   :  { %2240 = vmatpush1.bf16.msra.mxu1 %v6130_v50  ;;  %v6074_v50 = vcombine.low %v536_v31, %v540_v32  ;;  %v481_v32 = vld [vmem:[#allocation2 + $0x118] sm:$0xff] }
 0x1ba   :  { %2241 = vmatprep.subr.bf16.mxu1 %v6123_v61  ;;  %v6067_v61 = vcombine.high %v528_v46, %v532_v47  ;;  %v609_v34 = vld [vmem:[#allocation2 + $0x518] sm:$0xff] }
 0x1bb   :  { %2201 = vmatpush1.bf16.msra.mxu0 %v5994_v53  ;;  %v652_v53 = vld [vmem:[#allocation2 + $0x670] sm:$0xff] }
 0x1bc   :  { %2202 = vmatprep.subr.bf16.mxu0 %v5987_v57  ;;  %v6194_v57 = vcombine.low %v656_v48, %v660_v49  ;;  %v6187_v59 = vcombine.high %v648_v52, %v652_v53  ;;  %v477_v48 = vld [vmem:[#allocation2 + $0xf8] sm:$0xff] }
 0x1bd   :  { %2242 = vmatpush1.bf16.msra.mxu1 %v6122_v54  ;;  %v6066_v54 = vcombine.low %v528_v46, %v532_v47  ;;  %v473_v47 = vld [vmem:[#allocation2 + $0xd8] sm:$0xff] }
 0x1be   :  { %2243 = vmatprep.subr.bf16.mxu1 %v6115_v58  ;;  %v6059_v58 = vcombine.high %v520_v56, %v524_v62  ;;  %v601_v49 = vld [vmem:[#allocation2 + $0x4d8] sm:$0xff] }
 0x1bf   :  { %2203 = vmatpush1.bf16.msra.mxu0 %v5986_v1  ;;  %v644_v1 = vld [vmem:[#allocation2 + $0x630] sm:$0xff] }
 0x1c0   :  { %2204 = vmatprep.subr.bf16.mxu0 %v6107_v3  ;;  %v6186_v3 = vcombine.low %v648_v52, %v652_v53  ;;  %v6179_v7 = vcombine.high %v640_v0, %v644_v1  ;;  %v597_v52 = vld [vmem:[#allocation2 + $0x4b8] sm:$0xff]  ;;  %v6012_v53 = vcombine.low %v473_v47, %v477_v48 }
 0x1c1   :  { %2244 = vmatpush1.bf16.msra.mxu1 %v6114_v2  ;;  %v6058_v2 = vcombine.low %v520_v56, %v524_v62  ;;  %v469_v56 = vld [vmem:[#allocation2 + $0xb8] sm:$0xff] }
 0x1c2   :  { %2245 = vmatprep.subr.bf16.mxu1 %v6235_v4  ;;  %v6051_v4 = vcombine.high %v512_v60, %v516_v63  ;;  %v593_v62 = vld [vmem:[#allocation2 + $0x498] sm:$0xff] }
 0x1c3   :  { %2205 = vmatpush2.bf16.msra.mxu0 %v6106_v11  ;;  %v637_v11 = vld [vmem:[#allocation2 + $0x5f8] sm:$0xff] }
 0x1c4   :  { %2206 = vmatprep.subr.bf16.mxu0 %v6099_v13  ;;  %v6178_v13 = vcombine.low %v640_v0, %v644_v1  ;;  %v6173_v15 = vcombine.high %v633_v10, %v637_v11  ;;  %v589_v0 = vld [vmem:[#allocation2 + $0x478] sm:$0xff] }
 0x1c5   :  { %2246 = vmatpush2.bf16.msra.mxu1 %v6234_v12  ;;  %v6050_v12 = vcombine.low %v512_v60, %v516_v63  ;;  %v461_v60 = vld [vmem:[#allocation2 + $0x78] sm:$0xff] }
 0x1c6   :  { %2247 = vmatprep.subr.bf16.mxu1 %v6227_v14  ;;  %v6045_v14 = vcombine.high %v505_v8, %v509_v9  ;;  %v585_v63 = vld [vmem:[#allocation2 + $0x458] sm:$0xff] }
 0x1c7   :  { %2207 = vmatpush2.bf16.msra.mxu0 %v6098_v19  ;;  %v629_v19 = vld [vmem:[#allocation2 + $0x5b8] sm:$0xff] }
 0x1c8   :  { %2208 = vmatprep.subr.bf16.mxu0 %v6091_v21  ;;  %v6172_v21 = vcombine.low %v633_v10, %v637_v11  ;;  %v6165_v23 = vcombine.high %v625_v18, %v629_v19  ;;  %v581_v10 = vld [vmem:[#allocation2 + $0x438] sm:$0xff] }
 0x1c9   :  { %2248 = vmatpush2.bf16.msra.mxu1 %v6226_v20  ;;  %v6044_v20 = vcombine.low %v505_v8, %v509_v9  ;;  %v453_v8 = vld [vmem:[#allocation2 + $0x38] sm:$0xff] }
 0x1ca   :  { %2249 = vmatprep.subr.bf16.mxu1 %v6219_v22  ;;  %v6037_v22 = vcombine.high %v497_v16, %v501_v17  ;;  %v577_v9 = vld [vmem:[#allocation2 + $0x418] sm:$0xff] }
 0x1cb   :  { %2209 = vmatpush2.bf16.msra.mxu0 %v6090_v27  ;;  %v621_v27 = vld [vmem:[#allocation2 + $0x578] sm:$0xff] }
 0x1cc   :  { %2210 = vmatprep.subr.bf16.mxu0 %v6083_v29  ;;  %v6164_v29 = vcombine.low %v625_v18, %v629_v19  ;;  %v6157_v31 = vcombine.high %v617_v26, %v621_v27  ;;  %v701_v18 = vld [vmem:[#allocation2 + $0x7f8] sm:$0xff] }
 0x1cd   :  { %2250 = vmatpush2.bf16.msra.mxu1 %v6218_v28  ;;  %v6036_v28 = vcombine.low %v497_v16, %v501_v17  ;;  %v573_v16 = vld [vmem:[#allocation2 + $0x3f8] sm:$0xff] }
 0x1ce   :  { %2251 = vmatprep.subr.bf16.mxu1 %v6211_v30  ;;  %v6029_v30 = vcombine.high %v489_v24, %v493_v25  ;;  %v697_v17 = vld [vmem:[#allocation2 + $0x7d8] sm:$0xff] }
 0x1cf   :  { %2211 = vmatpush2.bf16.msra.mxu0 %v6082_v35  ;;  %v613_v35 = vld [vmem:[#allocation2 + $0x538] sm:$0xff] }
 0x1d0   :  { %2212 = vmatprep.subr.bf16.mxu0 %v6075_v38  ;;  %v6156_v38 = vcombine.low %v617_v26, %v621_v27  ;;  %v6149_v46 = vcombine.high %v609_v34, %v613_v35  ;;  %v693_v26 = vld [vmem:[#allocation2 + $0x7b8] sm:$0xff] }
 0x1d1   :  { %2252 = vmatpush2.bf16.msra.mxu1 %v6210_v36  ;;  %v6028_v36 = vcombine.low %v489_v24, %v493_v25  ;;  %v565_v24 = vld [vmem:[#allocation2 + $0x3b8] sm:$0xff] }
 0x1d2   :  { %2253 = vmatprep.subr.bf16.mxu1 %v6203_v42  ;;  %v6021_v42 = vcombine.high %v481_v32, %v485_v33  ;;  %v689_v25 = vld [vmem:[#allocation2 + $0x798] sm:$0xff] }
 0x1d3   :  { %2213 = vmatpush2.bf16.msra.mxu0 %v6074_v50  ;;  %v605_v50 = vld [vmem:[#allocation2 + $0x4f8] sm:$0xff] }
 0x1d4   :  { %2214 = vmatprep.subr.bf16.mxu0 %v6067_v61  ;;  %v6013_v61 = vcombine.high %v473_v47, %v477_v48  ;;  %v549_v47 = vld [vmem:[#allocation2 + $0x338] sm:$0xff] }
 0x1d5   :  { %2254 = vmatpush2.bf16.msra.mxu1 %v6202_v55  ;;  %v6020_v55 = vcombine.low %v481_v32, %v485_v33  ;;  %v557_v32 = vld [vmem:[#allocation2 + $0x378] sm:$0xff] }
 0x1d6   :  { %2255 = vmatprep.subr.bf16.mxu1 %v6195_v51  ;;  %v465_v51 = vld [vmem:[#allocation2 + $0x98] sm:$0xff] }
 0x1d7   :  { %2215 = vmatpush2.bf16.msra.mxu0 %v6066_v54  ;;  %v6140_v54 = vcombine.low %v601_v49, %v605_v50  ;;  %v6004_v1 = vcombine.low %v465_v51, %v469_v56  ;;  %v681_v33 = vld [vmem:[#allocation2 + $0x758] sm:$0xff] }
 0x1d8   :  { %2216 = vmatprep.subr.bf16.mxu0 %v6059_v58  ;;  %v6133_v58 = vcombine.high %v593_v62, %v597_v52  ;;  %v673_v48 = vld [vmem:[#allocation2 + $0x718] sm:$0xff] }
 0x1d9   :  { %2256 = vmatpush2.bf16.msra.mxu1 %v6194_v57  ;;  %v6005_v57 = vcombine.high %v465_v51, %v469_v56  ;;  %v541_v51 = vld [vmem:[#allocation2 + $0x2f8] sm:$0xff] }
 0x1da   :  { %2257 = vmatprep.subr.bf16.mxu1 %v6187_v59  ;;  %v457_v59 = vld [vmem:[#allocation2 + $0x58] sm:$0xff] }
 0x1db   :  { %2217 = vmatpush2.bf16.msra.mxu0 %v6058_v2  ;;  %v6132_v2 = vcombine.low %v593_v62, %v597_v52  ;;  %v5996_v11 = vcombine.low %v457_v59, %v461_v60  ;;  %v665_v56 = vld [vmem:[#allocation2 + $0x6d8] sm:$0xff] }
 0x1dc   :  { %2218 = vmatprep.subr.bf16.mxu0 %v6051_v4  ;;  %v6125_v4 = vcombine.high %v585_v63, %v589_v0  ;;  %v669_v62 = vld [vmem:[#allocation2 + $0x6f8] sm:$0xff] }
 0x1dd   :  { %2258 = vmatpush2.bf16.msra.mxu1 %v6186_v3  ;;  %v5997_v3 = vcombine.high %v457_v59, %v461_v60  ;;  %v533_v59 = vld [vmem:[#allocation2 + $0x2b8] sm:$0xff] }
 0x1de   :  { %2259 = vmatprep.subr.bf16.mxu1 %v6179_v7  ;;  %v449_v7 = vld [vmem:[#allocation2 + $0x18] sm:$0xff] }
 0x1df   :  { %2219 = vmatpush2.bf16.msra.mxu0 %v6050_v12  ;;  %v6124_v12 = vcombine.low %v585_v63, %v589_v0  ;;  %v5988_v19 = vcombine.low %v449_v7, %v453_v8  ;;  %v657_v60 = vld [vmem:[#allocation2 + $0x698] sm:$0xff] }
 0x1e0   :  { %2270 = vmatprep.subr.bf16.mxu0 %v6045_v14  ;;  %v6117_v14 = vcombine.high %v577_v9, %v581_v10  ;;  %v661_v63 = vld [vmem:[#allocation2 + $0x6b8] sm:$0xff] }
 0x1e1   :  { %2260 = vmatpush2.bf16.msra.mxu1 %v6178_v13  ;;  %v5989_v13 = vcombine.high %v449_v7, %v453_v8  ;;  %v525_v7 = vld [vmem:[#allocation2 + $0x278] sm:$0xff] }
 0x1e2   :  { %2311 = vmatprep.subr.bf16.mxu1 %v6173_v15  ;;  %2221 = vmatmul.mubr.bf16.vlgmr.msra.gmra.mxu0 %v7775_v37  ;;  %v569_v15 = vld [vmem:[#allocation2 + $0x3d8] sm:$0xff] }
 0x1e3   :  { %2271 = vmatpush1.bf16.msra.mxu0 %v6044_v20  ;;  %2302 = vmatprep.mubr.bf16.mxu0 %v7766_v5  ;;  %v6148_v5 = vcombine.low %v609_v34, %v613_v35  ;;  %v6116_v20 = vcombine.low %v577_v9, %v581_v10  ;;  %v6108_v27 = vcombine.low %v569_v15, %v573_v16  ;;  %v685_v34 = vld [vmem:[#allocation2 + $0x778] sm:$0xff] }
 0x1e4   :  { %2262 = vmatmul.mubr.bf16.vlgmr.msra.gmra.mxu1 %v7780_v45  ;;  %2272 = vmatprep.subr.bf16.mxu0 %v6037_v22  ;;  %v6237_v22 = vcombine.high %v697_v17, %v701_v18  ;;  %v649_v8 = vld [vmem:[#allocation2 + $0x658] sm:$0xff] }
 0x1e5   :  { %2312 = vmatpush1.bf16.msra.mxu1 %v6172_v21  ;;  %2343 = vmatprep.mubr.bf16.mxu1 %v7768_v6  ;;  %v6141_v6 = vcombine.high %v601_v49, %v605_v50  ;;  %v6109_v21 = vcombine.high %v569_v15, %v573_v16  ;;  %v677_v49 = vld [vmem:[#allocation2 + $0x738] sm:$0xff] }
 0x1e6   :  { %2313 = vmatprep.subr.bf16.mxu1 %v6165_v23  ;;  %v561_v23 = vld [vmem:[#allocation2 + $0x398] sm:$0xff] }
 0x1e7   :  { %2273 = vmatpush1.bf16.msra.mxu0 %v6036_v28  ;;  %v6236_v28 = vcombine.low %v697_v17, %v701_v18  ;;  %v6100_v35 = vcombine.low %v561_v23, %v565_v24  ;;  %v653_v9 = vld [vmem:[#allocation2 + $0x678] sm:$0xff] }
 0x1e8   :  { %2274 = vmatprep.subr.bf16.mxu0 %v6029_v30  ;;  %v6229_v30 = vcombine.high %v689_v25, %v693_v26  ;;  %v517_v15 = vld [vmem:[#allocation2 + $0x238] sm:$0xff] }
 0x1e9   :  { %2314 = vmatpush1.bf16.msra.mxu1 %v6164_v29  ;;  %v6101_v29 = vcombine.high %v561_v23, %v565_v24  ;;  %v641_v16 = vld [vmem:[#allocation2 + $0x618] sm:$0xff] }
 0x1ea   :  { %2315 = vmatprep.subr.bf16.mxu1 %v6157_v31  ;;  %v553_v31 = vld [vmem:[#allocation2 + $0x358] sm:$0xff] }
 0x1eb   :  { %2275 = vmatpush1.bf16.msra.mxu0 %v6028_v36  ;;  %v6228_v36 = vcombine.low %v689_v25, %v693_v26  ;;  %v6092_v50 = vcombine.low %v553_v31, %v557_v32  ;;  %v645_v17 = vld [vmem:[#allocation2 + $0x638] sm:$0xff] }
 0x1ec   :  { %2276 = vmatprep.subr.bf16.mxu0 %v6021_v42  ;;  %v6221_v42 = vcombine.high %v681_v33, %v685_v34  ;;  %v6180_v23 = vcombine.low %v641_v16, %v645_v17  ;;  %v702_v24 = vld [vmem:[#allocation11] sm:$0xff] }
 0x1ed   :  { %2316 = vmatpush1.bf16.msra.mxu1 %v6156_v38  ;;  %v6093_v38 = vcombine.high %v553_v31, %v557_v32  ;;  %v707_v25 = vrot.slane %v702_v24, %v7745_v40  ;;  %v711_v26 = vrot.slane %v702_v24, %v7751_v43 }
 0x1ee   :  { %2317 = vmatprep.subr.bf16.mxu1 %v6149_v46  ;;  %v545_v46 = vld [vmem:[#allocation2 + $0x318] sm:$0xff] }
 0x1ef   :  { %2277 = vmatpush1.bf16.msra.mxu0 %v6020_v55  ;;  %v6220_v55 = vcombine.low %v681_v33, %v685_v34  ;;  %v6084_v52 = vcombine.low %v545_v46, %v549_v47 }
 0x1f0   :  { %2278 = vmatprep.subr.bf16.mxu0 %v6013_v61  ;;  %v6213_v61 = vcombine.high %v673_v48, %v677_v49 }
 0x1f1   :  { %2318 = vmatpush1.bf16.msra.mxu1 %v6148_v5  ;;  %v6085_v5 = vcombine.high %v545_v46, %v549_v47 }
 0x1f2   :  { %2319 = vmatprep.subr.bf16.mxu1 %v6141_v6  ;;  %v537_v6 = vld [vmem:[#allocation2 + $0x2d8] sm:$0xff] }
 0x1f3   :  { %2279 = vmatpush1.bf16.msra.mxu0 %v6012_v53  ;;  %v6212_v53 = vcombine.low %v673_v48, %v677_v49  ;;  %v6076_v0 = vcombine.low %v537_v6, %v541_v51  ;;  %v715_v48 = vrot.slane %v702_v24, %v7748_v41 }
 0x1f4   :  { %2280 = vmatprep.subr.bf16.mxu0 %v6005_v57  ;;  %v6205_v57 = vcombine.high %v665_v56, %v669_v62 }
 0x1f5   :  { %2320 = vmatpush1.bf16.msra.mxu1 %v6140_v54  ;;  %v6077_v54 = vcombine.high %v537_v6, %v541_v51 }
 0x1f6   :  { %2321 = vmatprep.subr.bf16.mxu1 %v6133_v58  ;;  %v529_v58 = vld [vmem:[#allocation2 + $0x298] sm:$0xff] }
 0x1f7   :  { %2281 = vmatpush1.bf16.msra.mxu0 %v6004_v1  ;;  %v6204_v1 = vcombine.low %v665_v56, %v669_v62  ;;  %v6068_v10 = vcombine.low %v529_v58, %v533_v59 }
 0x1f8   :  { %2282 = vmatprep.subr.bf16.mxu0 %v5997_v3  ;;  %v6197_v3 = vcombine.high %v657_v60, %v661_v63 }
 0x1f9   :  { %2322 = vmatpush1.bf16.msra.mxu1 %v6132_v2  ;;  %v6069_v2 = vcombine.high %v529_v58, %v533_v59  ;;  %v722_v58 = vsub.s32 4, %v7742_v39  ;;  %v726_v59 = vsub.s32 5, %v7742_v39 }
 0x1fa   :  { %2323 = vmatprep.subr.bf16.mxu1 %v6125_v4  ;;  %v521_v4 = vld [vmem:[#allocation2 + $0x258] sm:$0xff] }
 0x1fb   :  { %2283 = vmatpush1.bf16.msra.mxu0 %v5996_v11  ;;  %v6196_v11 = vcombine.low %v657_v60, %v661_v63  ;;  %v6060_v18 = vcombine.low %v521_v4, %v525_v7  ;;  %v723_v60 = vrot.slane %v702_v24, %v722_v58  ;;  %v727_v63 = vrot.slane %v702_v24, %v726_v59 }
 0x1fc   :  { %2284 = vmatprep.subr.bf16.mxu0 %v5989_v13  ;;  %v6189_v13 = vcombine.high %v649_v8, %v653_v9 }
 0x1fd   :  { %2324 = vmatpush1.bf16.msra.mxu1 %v6124_v12  ;;  %v6061_v12 = vcombine.high %v521_v4, %v525_v7 }
 0x1fe   :  { %2325 = vmatprep.subr.bf16.mxu1 %v6117_v14  ;;  %v513_v14 = vld [vmem:[#allocation2 + $0x218] sm:$0xff] }
 0x1ff   :  { %2285 = vmatpush1.bf16.msra.mxu0 %v5988_v19  ;;  %v6188_v19 = vcombine.low %v649_v8, %v653_v9 }
 0x200   :  { %2286 = vmatprep.subr.bf16.mxu0 %v6109_v21  ;;  %v6181_v21 = vcombine.high %v641_v16, %v645_v17  ;;  %v730_v16 = vsub.s32 6, %v7742_v39  ;;  %v734_v17 = vsub.s32 7, %v7742_v39 }
 0x201   :  { %2326 = vmatpush1.bf16.msra.mxu1 %v6116_v20  ;;  %v6053_v20 = vcombine.high %v513_v14, %v517_v15 }
 0x202   :  { %2327 = vmatprep.subr.bf16.mxu1 %v6237_v22  ;;  %v6052_v22 = vcombine.low %v513_v14, %v517_v15 }
 0x203   :  { %2287 = vmatpush2.bf16.msra.mxu0 %v6108_v27 }
 0x204   :  { %2288 = vmatprep.subr.bf16.mxu0 %v6101_v29 }
 0x205   :  { %2328 = vmatpush2.bf16.msra.mxu1 %v6236_v28 }
 0x206   :  { %2329 = vmatprep.subr.bf16.mxu1 %v6229_v30 }
 0x207   :  { %2289 = vmatpush2.bf16.msra.mxu0 %v6100_v35 }
 0x208   :  { %2290 = vmatprep.subr.bf16.mxu0 %v6093_v38 }
 0x209   :  { %2330 = vmatpush2.bf16.msra.mxu1 %v6228_v36 }
 0x20a   :  { %2331 = vmatprep.subr.bf16.mxu1 %v6221_v42 }
 0x20b   :  { %2291 = vmatpush2.bf16.msra.mxu0 %v6092_v50 }
 0x20c   :  { %2292 = vmatprep.subr.bf16.mxu0 %v6085_v5 }
 0x20d   :  { %2332 = vmatpush2.bf16.msra.mxu1 %v6220_v55 }
 0x20e   :  { %2333 = vmatprep.subr.bf16.mxu1 %v6213_v61 }
 0x20f   :  { %2293 = vmatpush2.bf16.msra.mxu0 %v6084_v52 }
 0x210   :  { %2294 = vmatprep.subr.bf16.mxu0 %v6077_v54 }
 0x211   :  { %2334 = vmatpush2.bf16.msra.mxu1 %v6212_v53 }
 0x212   :  { %2335 = vmatprep.subr.bf16.mxu1 %v6205_v57 }
 0x213   :  { %2295 = vmatpush2.bf16.msra.mxu0 %v6076_v0 }
 0x214   :  { %2296 = vmatprep.subr.bf16.mxu0 %v6069_v2 }
 0x215   :  { %2336 = vmatpush2.bf16.msra.mxu1 %v6204_v1 }
 0x216   :  { %2337 = vmatprep.subr.bf16.mxu1 %v6197_v3 }
 0x217   :  { %2297 = vmatpush2.bf16.msra.mxu0 %v6068_v10 }
 0x218   :  { %2298 = vmatprep.subr.bf16.mxu0 %v6061_v12 }
 0x219   :  { %2338 = vmatpush2.bf16.msra.mxu1 %v6196_v11 }
 0x21a   :  { %2339 = vmatprep.subr.bf16.mxu1 %v6189_v13 }
 0x21b   :  { %2299 = vmatpush2.bf16.msra.mxu0 %v6060_v18  ;;  %v731_v18 = vrot.slane %v702_v24, %v730_v16 }
 0x21c   :  { %2300 = vmatprep.subr.bf16.mxu0 %v6053_v20 }
 0x21d   :  { %2340 = vmatpush2.bf16.msra.mxu1 %v6188_v19  ;;  %v735_v19 = vrot.slane %v702_v24, %v734_v17 }
 0x21e   :  { %2341 = vmatprep.subr.bf16.mxu1 %v6181_v21 }
 0x21f   :  { %2301 = vmatpush2.bf16.msra.mxu0 %v6052_v22 }
 0x221   :  { %2342 = vmatpush2.bf16.msra.mxu1 %v6180_v23 }
 0x222   :  { %v2058_v27 = vpop.f32.mrf.mxu0  ;;  %2303 = vmatmul.mubr.bf16.vlgmr.msra.gmra.mxu0 %v7775_v37  ;;  %v719_v37 = vrot.slane %v702_v24, %v7754_v44 }
 0x223   :  { %v2059_v28 = vadd.f32 %v2058_v27, %v707_v25 }
 0x224   :  { %v2099_v29 = vpop.f32.mrf.mxu1  ;;  %2344 = vmatmul.mubr.bf16.vlgmr.msra.gmra.mxu1 %v7780_v45  ;;  %v2060_v30 = vpop.f32.mrf.mxu0 }
 0x225   :  { %v7798_v31 = vadd.f32 %v2099_v29, %v2059_v28  ;;  %v2061_v32 = vadd.f32 %v2060_v30, %v711_v26 }
 0x226   :  { %v2101_v33 = vpop.f32.mrf.mxu1  ;;  %v2062_v34 = vpop.f32.mrf.mxu0 }
 0x227   :  { %v2352_v35 = vmax.f32 %v7798_v31, 0.0  ;;  %v2102_v36 = vadd.f32 %v2101_v33, %v2061_v32 }
 0x228   :  { %v2103_v38 = vpop.f32.mrf.mxu1  ;;  %v2063_v42 = vpop.f32.mrf.mxu0 }
 0x229   :  { %v2353_v46 = vmax.f32 %v2102_v36, 0.0 }
 0x22a   :  { %v2104_v47 = vpop.f32.mrf.mxu1 }
 0x262   :  { %v2140_v49 = vpop.f32.mrf.mxu0 }
 0x263   :  { %v2141_v50 = vadd.f32 %v2140_v49, %v715_v48 }
 0x264   :  { %v2181_v45 = vpop.f32.mrf.mxu1  ;;  %v2142_v55 = vpop.f32.mrf.mxu0 }
 0x265   :  { %v7803_v5 = vadd.f32 %v2181_v45, %v2141_v50  ;;  %v2143_v61 = vadd.f32 %v2142_v55, %v719_v37 }
 0x266   :  { %v2183_v6 = vpop.f32.mrf.mxu1  ;;  %v2144_v51 = vpop.f32.mrf.mxu0 }
 0x267   :  { %v2354_v56 = vmax.f32 %v7803_v5, 0.0  ;;  %v2184_v62 = vadd.f32 %v2183_v6, %v2143_v61 }
 0x268   :  { %v2185_v52 = vpop.f32.mrf.mxu1  ;;  %v2145_v53 = vpop.f32.mrf.mxu0 }
 0x269   :  { %v2355_v54 = vmax.f32 %v2184_v62, 0.0 }
 0x26a   :  { %v2186_v57 = vpop.f32.mrf.mxu1 }
 0x2a2   :  { %v2222_v0 = vpop.f32.mrf.mxu0 }
 0x2a3   :  { %v2223_v1 = vadd.f32 %v2222_v0, %v723_v60 }
 0x2a4   :  { %v2263_v2 = vpop.f32.mrf.mxu1  ;;  %v2224_v3 = vpop.f32.mrf.mxu0 }
 0x2a5   :  { %v7812_v4 = vadd.f32 %v2263_v2, %v2223_v1  ;;  %v2225_v7 = vadd.f32 %v2224_v3, %v727_v63 }
 0x2a6   :  { %v2265_v8 = vpop.f32.mrf.mxu1  ;;  %v2226_v9 = vpop.f32.mrf.mxu0 }
 0x2a7   :  { %v2356_v10 = vmax.f32 %v7812_v4, 0.0  ;;  %v7815_v11 = vadd.f32 %v2265_v8, %v2225_v7 }
 0x2a8   :  { %v2267_v12 = vpop.f32.mrf.mxu1  ;;  %v2227_v13 = vpop.f32.mrf.mxu0 }
 0x2a9   :  { %v2357_v14 = vmax.f32 %v7815_v11, 0.0 }
 0x2aa   :  { %v2268_v15 = vpop.f32.mrf.mxu1 }
 0x2e2   :  { %v2304_v20 = vpop.f32.mrf.mxu0 }
 0x2e3   :  { %v2305_v21 = vadd.f32 %v2304_v20, %v731_v18 }
 0x2e4   :  { %v2345_v22 = vpop.f32.mrf.mxu1  ;;  %v2306_v23 = vpop.f32.mrf.mxu0 }
 0x2e5   :  { %v7822_v25 = vadd.f32 %v2345_v22, %v2305_v21  ;;  %v2307_v26 = vadd.f32 %v2306_v23, %v735_v19 }
 0x2e6   :  { %v2347_v27 = vpop.f32.mrf.mxu1  ;;  %v2308_v28 = vpop.f32.mrf.mxu0 }
 0x2e7   :  { %v2358_v29 = vmax.f32 %v7822_v25, 0.0  ;;  %v7825_v30 = vadd.f32 %v2347_v27, %v2307_v26 }
 0x2e8   :  { %v2349_v32 = vpop.f32.mrf.mxu1  ;;  %v2309_v33 = vpop.f32.mrf.mxu0 }
 0x2e9   :  { %v2359_v34 = vmax.f32 %v7825_v30, 0.0 }
 0x2ea   :  { %v2350_v36 = vpop.f32.mrf.mxu1 }
 0x2eb   :  { %7658 = dma.done.wait [#allocation4 + $0x1], 57344 }
 0x2ec   :  { %7659 = vsyncadd [#allocation4 + $0x1], 4294909952  ;;  %v7828_v24 = vpack.c.bf16 %v2353_v46, %v2353_v46  ;;  %v7830_v38 = vpack.c.bf16 %v2355_v54, %v2355_v54  ;;  %v6822_v42 = vld [vmem:[#allocation3 + $0x18c] ss:$28 sps:$4 sm:$0xff]   ;;  %v6828_v49 = vld [vmem:[#allocation3 + $0x154] ss:$28 sps:$4 sm:$0xff]   ;;  %v7847_v31 = vpack.c.bf16 %v2357_v14, %v2357_v14 }
 0x2ed   :  { %v6824_v47 = vld [vmem:[#allocation3 + $0x50c] ss:$28 sps:$4 sm:$0xff]   ;;  %5225 = vmatprep.subr.bf16.mxu0 %v6822_v42  ;;  %v6830_v50 = vld [vmem:[#allocation3 + $0x4d4] ss:$28 sps:$4 sm:$0xff]   ;;  %v6834_v55 = vld [vmem:[#allocation3 + $0x11c] ss:$28 sps:$4 sm:$0xff]  }
 0x2ee   :  { %5257 = vmatprep.mubr.bf16.mxu0 %v7828_v24  ;;  %5298 = vmatprep.mubr.bf16.mxu1 %v7830_v38  ;;  %v6826_v48 = vld [vmem:[#allocation3 + $0x188] ss:$28 sps:$4 sm:$0xff]   ;;  %v6832_v45 = vld [vmem:[#allocation3 + $0x150] ss:$28 sps:$4 sm:$0xff]   ;;  %v6836_v61 = vld [vmem:[#allocation3 + $0x49c] ss:$28 sps:$4 sm:$0xff]  }
 0x2ef   :  { %v6827_v37 = vld [vmem:[#allocation3 + $0x508] ss:$28 sps:$4 sm:$0xff]   ;;  %5266 = vmatprep.subr.bf16.mxu1 %v6824_v47  ;;  %5226 = vmatpush1.bf16.msra.mxu0 %v6826_v48  ;;  %v6833_v46 = vld [vmem:[#allocation3 + $0x4d0] ss:$28 sps:$4 sm:$0xff]   ;;  %v6838_v6 = vld [vmem:[#allocation3 + $0x118] ss:$28 sps:$4 sm:$0xff]  }
 0x2f0   :  { %5267 = vmatpush1.bf16.msra.mxu1 %v6827_v37  ;;  %5227 = vmatprep.subr.bf16.mxu0 %v6828_v49  ;;  %v6839_v51 = vld [vmem:[#allocation3 + $0x498] ss:$28 sps:$4 sm:$0xff]   ;;  %v6840_v62 = vld [vmem:[#allocation3 + $0xe4] ss:$28 sps:$4 sm:$0xff]   ;;  %v6846_v57 = vld [vmem:[#allocation3 + $0xac] ss:$28 sps:$4 sm:$0xff]  }
 0x2f1   :  { %5268 = vmatprep.subr.bf16.mxu1 %v6830_v50  ;;  %v6842_v52 = vld [vmem:[#allocation3 + $0x464] ss:$28 sps:$4 sm:$0xff]   ;;  %v6848_v60 = vld [vmem:[#allocation3 + $0x42c] ss:$28 sps:$4 sm:$0xff]   ;;  %v6852_v1 = vld [vmem:[#allocation3 + $0x74] ss:$28 sps:$4 sm:$0xff]  }
 0x2f2   :  { %v6844_v53 = vld [vmem:[#allocation3 + $0xe0] ss:$28 sps:$4 sm:$0xff]   ;;  %v6850_v63 = vld [vmem:[#allocation3 + $0xa8] ss:$28 sps:$4 sm:$0xff]   ;;  %v6854_v2 = vld [vmem:[#allocation3 + $0x3f4] ss:$28 sps:$4 sm:$0xff]  }
 0x2f3   :  { %5228 = vmatpush1.bf16.msra.mxu0 %v6832_v45  ;;  %v6845_v54 = vld [vmem:[#allocation3 + $0x460] ss:$28 sps:$4 sm:$0xff]   ;;  %v6851_v0 = vld [vmem:[#allocation3 + $0x428] ss:$28 sps:$4 sm:$0xff]   ;;  %v6856_v3 = vld [vmem:[#allocation3 + $0x70] ss:$28 sps:$4 sm:$0xff]  }
 0x2f4   :  { %5269 = vmatpush1.bf16.msra.mxu1 %v6833_v46  ;;  %5229 = vmatprep.subr.bf16.mxu0 %v6834_v55  ;;  %v6857_v7 = vld [vmem:[#allocation3 + $0x3f0] ss:$28 sps:$4 sm:$0xff]   ;;  %v6858_v8 = vld [vmem:[#allocation3 + $0x3c] ss:$28 sps:$4 sm:$0xff]   ;;  %v6864_v15 = vld [vmem:[#allocation3 + $0x4] ss:$28 sps:$4 sm:$0xff]  }
 0x2f5   :  { %5270 = vmatprep.subr.bf16.mxu1 %v6836_v61  ;;  %v6860_v9 = vld [vmem:[#allocation3 + $0x3bc] ss:$28 sps:$4 sm:$0xff]   ;;  %v6866_v17 = vld [vmem:[#allocation3 + $0x384] ss:$28 sps:$4 sm:$0xff]   ;;  %v6870_v20 = vld [vmem:[#allocation3 + $0x34c] ss:$28 sps:$4 sm:$0xff]  }
 0x2f6   :  { %v6862_v12 = vld [vmem:[#allocation3 + $0x38] ss:$28 sps:$4 sm:$0xff]   ;;  %v6868_v18 = vld [vmem:[#allocation3] ss:$28 sps:$4 sm:$0xff]   ;;  %v6872_v21 = vld [vmem:[#allocation3 + $0x6cc] ss:$28 sps:$4 sm:$0xff]  }
 0x2f7   :  { %5230 = vmatpush1.bf16.msra.mxu0 %v6838_v6  ;;  %v6863_v13 = vld [vmem:[#allocation3 + $0x3b8] ss:$28 sps:$4 sm:$0xff]   ;;  %v6869_v19 = vld [vmem:[#allocation3 + $0x380] ss:$28 sps:$4 sm:$0xff]   ;;  %v6874_v22 = vld [vmem:[#allocation3 + $0x348] ss:$28 sps:$4 sm:$0xff]  }
 0x2f8   :  { %5271 = vmatpush1.bf16.msra.mxu1 %v6839_v51  ;;  %5231 = vmatprep.subr.bf16.mxu0 %v6840_v62  ;;  %v6875_v23 = vld [vmem:[#allocation3 + $0x6c8] ss:$28 sps:$4 sm:$0xff]   ;;  %v6876_v26 = vld [vmem:[#allocation3 + $0x314] ss:$28 sps:$4 sm:$0xff]   ;;  %v6882_v33 = vld [vmem:[#allocation3 + $0x2dc] ss:$28 sps:$4 sm:$0xff]  }
 0x2f9   :  { %5272 = vmatprep.subr.bf16.mxu1 %v6842_v52  ;;  %v6878_v27 = vld [vmem:[#allocation3 + $0x694] ss:$28 sps:$4 sm:$0xff]   ;;  %v6884_v36 = vld [vmem:[#allocation3 + $0x65c] ss:$28 sps:$4 sm:$0xff]   ;;  %v6888_v48 = vld [vmem:[#allocation3 + $0x2a4] ss:$28 sps:$4 sm:$0xff]  }
 0x2fa   :  { %v6880_v28 = vld [vmem:[#allocation3 + $0x310] ss:$28 sps:$4 sm:$0xff]   ;;  %v6886_v42 = vld [vmem:[#allocation3 + $0x2d8] ss:$28 sps:$4 sm:$0xff]   ;;  %v6890_v37 = vld [vmem:[#allocation3 + $0x624] ss:$28 sps:$4 sm:$0xff]  }
 0x2fb   :  { %5232 = vmatpush1.bf16.msra.mxu0 %v6844_v53  ;;  %v6881_v32 = vld [vmem:[#allocation3 + $0x690] ss:$28 sps:$4 sm:$0xff]   ;;  %v6887_v47 = vld [vmem:[#allocation3 + $0x658] ss:$28 sps:$4 sm:$0xff]   ;;  %v6892_v49 = vld [vmem:[#allocation3 + $0x2a0] ss:$28 sps:$4 sm:$0xff]  }
 0x2fc   :  { %5273 = vmatpush1.bf16.msra.mxu1 %v6845_v54  ;;  %5233 = vmatprep.subr.bf16.mxu0 %v6846_v57  ;;  %v6893_v50 = vld [vmem:[#allocation3 + $0x620] ss:$28 sps:$4 sm:$0xff]   ;;  %v6894_v45 = vld [vmem:[#allocation3 + $0x26c] ss:$28 sps:$4 sm:$0xff]   ;;  %v6900_v6 = vld [vmem:[#allocation3 + $0x234] ss:$28 sps:$4 sm:$0xff]  }
 0x2fd   :  { %5274 = vmatprep.subr.bf16.mxu1 %v6848_v60  ;;  %v6896_v46 = vld [vmem:[#allocation3 + $0x5ec] ss:$28 sps:$4 sm:$0xff]   ;;  %v6902_v51 = vld [vmem:[#allocation3 + $0x5b4] ss:$28 sps:$4 sm:$0xff]   ;;  %v6906_v53 = vld [vmem:[#allocation3 + $0x1fc] ss:$28 sps:$4 sm:$0xff]  }
 0x2fe   :  { %v6898_v55 = vld [vmem:[#allocation3 + $0x268] ss:$28 sps:$4 sm:$0xff]   ;;  %v6904_v62 = vld [vmem:[#allocation3 + $0x230] ss:$28 sps:$4 sm:$0xff]   ;;  %v6908_v54 = vld [vmem:[#allocation3 + $0x57c] ss:$28 sps:$4 sm:$0xff]  }
 0x2ff   :  { %5234 = vmatpush1.bf16.msra.mxu0 %v6850_v63  ;;  %v6899_v61 = vld [vmem:[#allocation3 + $0x5e8] ss:$28 sps:$4 sm:$0xff]   ;;  %v6905_v52 = vld [vmem:[#allocation3 + $0x5b0] ss:$28 sps:$4 sm:$0xff]   ;;  %v6910_v57 = vld [vmem:[#allocation3 + $0x1f8] ss:$28 sps:$4 sm:$0xff]  }
 0x300   :  { %5275 = vmatpush1.bf16.msra.mxu1 %v6851_v0  ;;  %5235 = vmatprep.subr.bf16.mxu0 %v6852_v1  ;;  %v6911_v60 = vld [vmem:[#allocation3 + $0x578] ss:$28 sps:$4 sm:$0xff]   ;;  %v6912_v63 = vld [vmem:[#allocation3 + $0x1c4] ss:$28 sps:$4 sm:$0xff]   ;;  %v6924_v5 = vld [vmem:[#allocation3 + $0x850] ss:$28 sps:$4 sm:$0xff]  }
 0x301   :  { %5276 = vmatprep.subr.bf16.mxu1 %v6854_v2  ;;  %v6914_v0 = vld [vmem:[#allocation3 + $0x544] ss:$28 sps:$4 sm:$0xff]   ;;  %v6935_v11 = vld [vmem:[#allocation3 + $0xb9c] ss:$28 sps:$4 sm:$0xff]   ;;  %s7672_s4 = smov [#allocation14]  }
 0x302   :  { %v6916_v1 = vld [vmem:[#allocation3 + $0x1c0] ss:$28 sps:$4 sm:$0xff]   ;;  %v6930_v14 = vld [vmem:[#allocation3 + $0x818] ss:$28 sps:$4 sm:$0xff]   ;;  %s5932_s6 = sshll.u32 %s7672_s4, 4  ;;  %s5933_s6 = int_to_ptr.vmem [resolvable:$true] %s5932_s6 }
 0x303   :  { %5236 = vmatpush1.bf16.msra.mxu0 %v6856_v3  ;;  %v6917_v2 = vld [vmem:[#allocation3 + $0x540] ss:$28 sps:$4 sm:$0xff]   ;;  %v6920_v3 = vld [vmem:[#allocation3 + $0x88c] ss:$28 sps:$4 sm:$0xff]   ;;  %v6933_v30 = vld [vmem:[#allocation3 + $0xb98] ss:$28 sps:$4 sm:$0xff]   ;;  %p7635_p8 = scmp.lt.s32.totalorder %s5933_s6, %s5933_s6 }
 0x304   :  { %5277 = vmatpush1.bf16.msra.mxu1 %v6857_v7  ;;  %5237 = vmatprep.subr.bf16.mxu0 %v6858_v8  ;;  %v6923_v7 = vld [vmem:[#allocation3 + $0xc0c] ss:$28 sps:$4 sm:$0xff]   ;;  %v7837_v8 = vpack.c.bf16 %v2352_v35, %v2352_v35  ;;  %v7852_v35 = vpack.c.bf16 %v2359_v34, %v2359_v34  ;;  %v6938_v34 = vld [vmem:[#allocation3 + $0x7e4] ss:$28 sps:$4 sm:$0xff]   ;;  %v7020_v4 = vld [vmem:[#allocation3 + $0x158] ss:$28 sps:$4 sm:$0xff]  }
 0x305   :  { %5278 = vmatprep.subr.bf16.mxu1 %v6860_v9  ;;  %v7842_v9 = vpack.c.bf16 %v2354_v56, %v2354_v56  ;;  %v6927_v56 = vld [vmem:[#allocation3 + $0xbd0] ss:$28 sps:$4 sm:$0xff]   ;;  %v7028_v25 = vld [vmem:[#allocation3 + $0x124] ss:$28 sps:$4 sm:$0xff]   ;;  %s7630_s17 = scalar_lea.vmem %s5933_s6, 896 }
 0x306   :  { %p7631_p7 = scmp.ne.s32.totalorder %s5933_s6, %s7630_s17  ;;  %p7636_p9 = scmp.lt.s32.totalorder %s7630_s17, %s7630_s17 }
 0x307   :  { %5238 = vmatpush1.bf16.msra.mxu0 %v6862_v12  ;;  %v6918_v12 = vld [vmem:[#allocation3 + $0x888] ss:$28 sps:$4 sm:$0xff]  }
 0x308   :  { %5279 = vmatpush1.bf16.msra.mxu1 %v6863_v13  ;;  %5239 = vmatprep.subr.bf16.mxu0 %v6864_v15  ;;  %v6921_v13 = vld [vmem:[#allocation3 + $0xc08] ss:$28 sps:$4 sm:$0xff]   ;;  %v6926_v15 = vld [vmem:[#allocation3 + $0x854] ss:$28 sps:$4 sm:$0xff]   ;;  %p7637_p10 = por %p7636_p9, %p7635_p8 }
 0x309   :  { %5280 = vmatprep.subr.bf16.mxu1 %v6866_v17  ;;  %v6929_v17 = vld [vmem:[#allocation3 + $0xbd4] ss:$28 sps:$4 sm:$0xff]  }
 0x30a   :  { %p7638_p11 = pnand %p7637_p10, %p7631_p7 }
 0x30b   :  { %5240 = vmatpush1.bf16.msra.mxu0 %v6868_v18  ;;  %v6932_v18 = vld [vmem:[#allocation3 + $0x81c] ss:$28 sps:$4 sm:$0xff]  }
 0x30c   :  { %5281 = vmatpush1.bf16.msra.mxu1 %v6869_v19  ;;  %5241 = vmatprep.subr.bf16.mxu0 %v6870_v20  ;;  %v6941_v19 = vld [vmem:[#allocation3 + $0xb64] ss:$28 sps:$4 sm:$0xff]  }
 0x30d   :  { %5282 = vmatprep.subr.bf16.mxu1 %v6872_v21  ;;  %v6936_v20 = vld [vmem:[#allocation3 + $0x7e0] ss:$28 sps:$4 sm:$0xff]  }
 0x30e   :  { %v6939_v21 = vld [vmem:[#allocation3 + $0xb60] ss:$28 sps:$4 sm:$0xff]  }
 0x30f   :  { %5242 = vmatpush2.bf16.msra.mxu0 %v6874_v22  ;;  %v6944_v22 = vld [vmem:[#allocation3 + $0x7ac] ss:$28 sps:$4 sm:$0xff]  }
 0x310   :  { %5283 = vmatpush2.bf16.msra.mxu1 %v6875_v23  ;;  %5243 = vmatprep.subr.bf16.mxu0 %v6876_v26  ;;  %v6947_v23 = vld [vmem:[#allocation3 + $0xb2c] ss:$28 sps:$4 sm:$0xff]  }
 0x311   :  { %5284 = vmatprep.subr.bf16.mxu1 %v6878_v27  ;;  %v6942_v26 = vld [vmem:[#allocation3 + $0x7a8] ss:$28 sps:$4 sm:$0xff]  }
 0x312   :  { %v6945_v27 = vld [vmem:[#allocation3 + $0xb28] ss:$28 sps:$4 sm:$0xff]  }
 0x313   :  { %5244 = vmatpush2.bf16.msra.mxu0 %v6880_v28  ;;  %v6950_v28 = vld [vmem:[#allocation3 + $0x774] ss:$28 sps:$4 sm:$0xff]  }
 0x314   :  { %5285 = vmatpush2.bf16.msra.mxu1 %v6881_v32  ;;  %5245 = vmatprep.subr.bf16.mxu0 %v6882_v33  ;;  %v6953_v32 = vld [vmem:[#allocation3 + $0xaf4] ss:$28 sps:$4 sm:$0xff]  }
 0x315   :  { %5286 = vmatprep.subr.bf16.mxu1 %v6884_v36  ;;  %v6948_v33 = vld [vmem:[#allocation3 + $0x770] ss:$28 sps:$4 sm:$0xff]  }
 0x316   :  { %v6951_v36 = vld [vmem:[#allocation3 + $0xaf0] ss:$28 sps:$4 sm:$0xff]  }
 0x317   :  { %5246 = vmatpush2.bf16.msra.mxu0 %v6886_v42  ;;  %v6956_v42 = vld [vmem:[#allocation3 + $0x73c] ss:$28 sps:$4 sm:$0xff]  }
 0x318   :  { %5287 = vmatpush2.bf16.msra.mxu1 %v6887_v47  ;;  %5247 = vmatprep.subr.bf16.mxu0 %v6888_v48  ;;  %v6959_v47 = vld [vmem:[#allocation3 + $0xabc] ss:$28 sps:$4 sm:$0xff]  }
 0x319   :  { %5288 = vmatprep.subr.bf16.mxu1 %v6890_v37  ;;  %v6954_v48 = vld [vmem:[#allocation3 + $0x738] ss:$28 sps:$4 sm:$0xff]  }
 0x31a   :  { %v6957_v37 = vld [vmem:[#allocation3 + $0xab8] ss:$28 sps:$4 sm:$0xff]  }
 0x31b   :  { %5248 = vmatpush2.bf16.msra.mxu0 %v6892_v49  ;;  %v6962_v49 = vld [vmem:[#allocation3 + $0x704] ss:$28 sps:$4 sm:$0xff]  }
 0x31c   :  { %5289 = vmatpush2.bf16.msra.mxu1 %v6893_v50  ;;  %5249 = vmatprep.subr.bf16.mxu0 %v6894_v45  ;;  %v6965_v50 = vld [vmem:[#allocation3 + $0xa84] ss:$28 sps:$4 sm:$0xff]  }
 0x31d   :  { %5290 = vmatprep.subr.bf16.mxu1 %v6896_v46  ;;  %v6960_v45 = vld [vmem:[#allocation3 + $0x700] ss:$28 sps:$4 sm:$0xff]  }
 0x31e   :  { %v6963_v46 = vld [vmem:[#allocation3 + $0xa80] ss:$28 sps:$4 sm:$0xff]  }
 0x31f   :  { %5250 = vmatpush2.bf16.msra.mxu0 %v6898_v55  ;;  %v6968_v55 = vld [vmem:[#allocation3 + $0xa4c] ss:$28 sps:$4 sm:$0xff]  }
 0x320   :  { %5291 = vmatpush2.bf16.msra.mxu1 %v6899_v61  ;;  %5251 = vmatprep.subr.bf16.mxu0 %v6900_v6  ;;  %v6971_v61 = vld [vmem:[#allocation3 + $0xdcc] ss:$28 sps:$4 sm:$0xff]  }
 0x321   :  { %5292 = vmatprep.subr.bf16.mxu1 %v6902_v51  ;;  %v6966_v6 = vld [vmem:[#allocation3 + $0xa48] ss:$28 sps:$4 sm:$0xff]  }
 0x322   :  { %v6969_v51 = vld [vmem:[#allocation3 + $0xdc8] ss:$28 sps:$4 sm:$0xff]  }
 0x323   :  { %5252 = vmatpush2.bf16.msra.mxu0 %v6904_v62  ;;  %v6974_v62 = vld [vmem:[#allocation3 + $0xa14] ss:$28 sps:$4 sm:$0xff]  }
 0x324   :  { %5293 = vmatpush2.bf16.msra.mxu1 %v6905_v52  ;;  %5253 = vmatprep.subr.bf16.mxu0 %v6906_v53  ;;  %v6977_v52 = vld [vmem:[#allocation3 + $0xd94] ss:$28 sps:$4 sm:$0xff]  }
 0x325   :  { %5294 = vmatprep.subr.bf16.mxu1 %v6908_v54  ;;  %v6972_v53 = vld [vmem:[#allocation3 + $0xa10] ss:$28 sps:$4 sm:$0xff]  }
 0x326   :  { %v6975_v54 = vld [vmem:[#allocation3 + $0xd90] ss:$28 sps:$4 sm:$0xff]  }
 0x327   :  { %5254 = vmatpush2.bf16.msra.mxu0 %v6910_v57  ;;  %v6980_v57 = vld [vmem:[#allocation3 + $0x9dc] ss:$28 sps:$4 sm:$0xff]  }
 0x328   :  { %5295 = vmatpush2.bf16.msra.mxu1 %v6911_v60  ;;  %5255 = vmatprep.subr.bf16.mxu0 %v6912_v63  ;;  %v6983_v60 = vld [vmem:[#allocation3 + $0xd5c] ss:$28 sps:$4 sm:$0xff]  }
 0x329   :  { %5296 = vmatprep.subr.bf16.mxu1 %v6914_v0  ;;  %v6978_v63 = vld [vmem:[#allocation3 + $0x9d8] ss:$28 sps:$4 sm:$0xff]  }
 0x32a   :  { %v6981_v0 = vld [vmem:[#allocation3 + $0xd58] ss:$28 sps:$4 sm:$0xff]  }
 0x32b   :  { %5256 = vmatpush2.bf16.msra.mxu0 %v6916_v1  ;;  %v6986_v1 = vld [vmem:[#allocation3 + $0x9a4] ss:$28 sps:$4 sm:$0xff]  }
 0x32c   :  { %5297 = vmatpush2.bf16.msra.mxu1 %v6917_v2  ;;  %5307 = vmatprep.subr.bf16.mxu0 %v6920_v3  ;;  %v6989_v2 = vld [vmem:[#allocation3 + $0xd24] ss:$28 sps:$4 sm:$0xff]  }
 0x32d   :  { %5348 = vmatprep.subr.bf16.mxu1 %v6923_v7  ;;  %v6984_v3 = vld [vmem:[#allocation3 + $0x9a0] ss:$28 sps:$4 sm:$0xff]  }
 0x32e   :  { %5258 = vmatmul.mubr.bf16.vlgmr.msra.gmra.mxu0 %v7837_v8  ;;  %v6987_v7 = vld [vmem:[#allocation3 + $0xd20] ss:$28 sps:$4 sm:$0xff]  }
 0x32f   :  { %5299 = vmatmul.mubr.bf16.vlgmr.msra.gmra.mxu1 %v7842_v9  ;;  %5308 = vmatpush1.bf16.msra.mxu0 %v6918_v12  ;;  %v6992_v12 = vld [vmem:[#allocation3 + $0x96c] ss:$28 sps:$4 sm:$0xff]  }
 0x330   :  { %5349 = vmatpush1.bf16.msra.mxu1 %v6921_v13  ;;  %5309 = vmatprep.subr.bf16.mxu0 %v6926_v15  ;;  %v6995_v13 = vld [vmem:[#allocation3 + $0xcec] ss:$28 sps:$4 sm:$0xff]  }
 0x331   :  { %5350 = vmatprep.subr.bf16.mxu1 %v6929_v17  ;;  %5339 = vmatprep.mubr.bf16.mxu0 %v7847_v31  ;;  %v6990_v15 = vld [vmem:[#allocation3 + $0x968] ss:$28 sps:$4 sm:$0xff]  }
 0x332   :  { %5380 = vmatprep.mubr.bf16.mxu1 %v7852_v35  ;;  %v6993_v17 = vld [vmem:[#allocation3 + $0xce8] ss:$28 sps:$4 sm:$0xff]  }
 0x333   :  { %5310 = vmatpush1.bf16.msra.mxu0 %v6924_v5  ;;  %v6998_v5 = vld [vmem:[#allocation3 + $0x934] ss:$28 sps:$4 sm:$0xff]  }
 0x334   :  { %5351 = vmatpush1.bf16.msra.mxu1 %v6927_v56  ;;  %5311 = vmatprep.subr.bf16.mxu0 %v6932_v18  ;;  %v7001_v56 = vld [vmem:[#allocation3 + $0xcb4] ss:$28 sps:$4 sm:$0xff]  }
 0x335   :  { %5352 = vmatprep.subr.bf16.mxu1 %v6935_v11  ;;  %v6996_v18 = vld [vmem:[#allocation3 + $0x930] ss:$28 sps:$4 sm:$0xff]  }
 0x336   :  { %v6999_v11 = vld [vmem:[#allocation3 + $0xcb0] ss:$28 sps:$4 sm:$0xff]  }
 0x337   :  { %5312 = vmatpush1.bf16.msra.mxu0 %v6930_v14  ;;  %v7004_v14 = vld [vmem:[#allocation3 + $0x8fc] ss:$28 sps:$4 sm:$0xff]  }
 0x338   :  { %5353 = vmatpush1.bf16.msra.mxu1 %v6933_v30  ;;  %5313 = vmatprep.subr.bf16.mxu0 %v6938_v34  ;;  %v7007_v30 = vld [vmem:[#allocation3 + $0xc7c] ss:$28 sps:$4 sm:$0xff]  }
 0x339   :  { %5354 = vmatprep.subr.bf16.mxu1 %v6941_v19  ;;  %v7002_v34 = vld [vmem:[#allocation3 + $0x8f8] ss:$28 sps:$4 sm:$0xff]  }
 0x33a   :  { %v7005_v19 = vld [vmem:[#allocation3 + $0xc78] ss:$28 sps:$4 sm:$0xff]  }
 0x33b   :  { %5314 = vmatpush1.bf16.msra.mxu0 %v6936_v20  ;;  %v7010_v20 = vld [vmem:[#allocation3 + $0x8c4] ss:$28 sps:$4 sm:$0xff]  }
 0x33c   :  { %5355 = vmatpush1.bf16.msra.mxu1 %v6939_v21  ;;  %5315 = vmatprep.subr.bf16.mxu0 %v6944_v22  ;;  %v7013_v21 = vld [vmem:[#allocation3 + $0xc44] ss:$28 sps:$4 sm:$0xff]  }
 0x33d   :  { %5356 = vmatprep.subr.bf16.mxu1 %v6947_v23  ;;  %v7008_v22 = vld [vmem:[#allocation3 + $0x8c0] ss:$28 sps:$4 sm:$0xff]  }
 0x33e   :  { %v7011_v23 = vld [vmem:[#allocation3 + $0xc40] ss:$28 sps:$4 sm:$0xff]  }
 0x33f   :  { %5316 = vmatpush1.bf16.msra.mxu0 %v6942_v26  ;;  %v7016_v26 = vld [vmem:[#allocation3 + $0x194] ss:$28 sps:$4 sm:$0xff]  }
 0x340   :  { %5357 = vmatpush1.bf16.msra.mxu1 %v6945_v27  ;;  %5317 = vmatprep.subr.bf16.mxu0 %v6950_v28  ;;  %v7019_v27 = vld [vmem:[#allocation3 + $0x514] ss:$28 sps:$4 sm:$0xff]   ;;  %v7861_v28 = vpack.c.bf16 %v2356_v10, %v2356_v10 }
 0x341   :  { %5358 = vmatprep.subr.bf16.mxu1 %v6953_v32  ;;  %v7866_v32 = vpack.c.bf16 %v2358_v29, %v2358_v29  ;;  %v7023_v10 = vld [vmem:[#allocation3 + $0x4d8] ss:$28 sps:$4 sm:$0xff]   ;;  %v7031_v29 = vld [vmem:[#allocation3 + $0x4a4] ss:$28 sps:$4 sm:$0xff]  }
 0x343   :  { %5318 = vmatpush1.bf16.msra.mxu0 %v6948_v33  ;;  %v7014_v33 = vld [vmem:[#allocation3 + $0x190] ss:$28 sps:$4 sm:$0xff]  }
 0x344   :  { %5359 = vmatpush1.bf16.msra.mxu1 %v6951_v36  ;;  %5319 = vmatprep.subr.bf16.mxu0 %v6956_v42  ;;  %v7017_v36 = vld [vmem:[#allocation3 + $0x510] ss:$28 sps:$4 sm:$0xff]   ;;  %v7022_v42 = vld [vmem:[#allocation3 + $0x15c] ss:$28 sps:$4 sm:$0xff]  }
 0x345   :  { %5360 = vmatprep.subr.bf16.mxu1 %v6959_v47  ;;  %v7025_v47 = vld [vmem:[#allocation3 + $0x4dc] ss:$28 sps:$4 sm:$0xff]  }
 0x347   :  { %5320 = vmatpush1.bf16.msra.mxu0 %v6954_v48  ;;  %v7026_v48 = vld [vmem:[#allocation3 + $0x120] ss:$28 sps:$4 sm:$0xff]  }
 0x348   :  { %5361 = vmatpush1.bf16.msra.mxu1 %v6957_v37  ;;  %5321 = vmatprep.subr.bf16.mxu0 %v6962_v49  ;;  %v7029_v37 = vld [vmem:[#allocation3 + $0x4a0] ss:$28 sps:$4 sm:$0xff]   ;;  %v7034_v49 = vld [vmem:[#allocation3 + $0xec] ss:$28 sps:$4 sm:$0xff]  }
 0x349   :  { %5362 = vmatprep.subr.bf16.mxu1 %v6965_v50  ;;  %v7037_v50 = vld [vmem:[#allocation3 + $0x46c] ss:$28 sps:$4 sm:$0xff]  }
 0x34b   :  { %5322 = vmatpush1.bf16.msra.mxu0 %v6960_v45  ;;  %v7032_v45 = vld [vmem:[#allocation3 + $0xe8] ss:$28 sps:$4 sm:$0xff]  }
 0x34c   :  { %5363 = vmatpush1.bf16.msra.mxu1 %v6963_v46  ;;  %5323 = vmatprep.subr.bf16.mxu0 %v6968_v55  ;;  %v7035_v46 = vld [vmem:[#allocation3 + $0x468] ss:$28 sps:$4 sm:$0xff]   ;;  %v7040_v55 = vld [vmem:[#allocation3 + $0xb4] ss:$28 sps:$4 sm:$0xff]  }
 0x34d   :  { %5364 = vmatprep.subr.bf16.mxu1 %v6971_v61  ;;  %v7043_v61 = vld [vmem:[#allocation3 + $0x434] ss:$28 sps:$4 sm:$0xff]  }
 0x34f   :  { %5324 = vmatpush2.bf16.msra.mxu0 %v6966_v6  ;;  %v7038_v6 = vld [vmem:[#allocation3 + $0xb0] ss:$28 sps:$4 sm:$0xff]  }
 0x350   :  { %5365 = vmatpush2.bf16.msra.mxu1 %v6969_v51  ;;  %5325 = vmatprep.subr.bf16.mxu0 %v6974_v62  ;;  %v7041_v51 = vld [vmem:[#allocation3 + $0x430] ss:$28 sps:$4 sm:$0xff]   ;;  %v7046_v62 = vld [vmem:[#allocation3 + $0x7c] ss:$28 sps:$4 sm:$0xff]  }
 0x351   :  { %5366 = vmatprep.subr.bf16.mxu1 %v6977_v52  ;;  %v7049_v52 = vld [vmem:[#allocation3 + $0x3fc] ss:$28 sps:$4 sm:$0xff]  }
 0x353   :  { %5326 = vmatpush2.bf16.msra.mxu0 %v6972_v53  ;;  %v7044_v53 = vld [vmem:[#allocation3 + $0x78] ss:$28 sps:$4 sm:$0xff]  }
 0x354   :  { %5367 = vmatpush2.bf16.msra.mxu1 %v6975_v54  ;;  %5327 = vmatprep.subr.bf16.mxu0 %v6980_v57  ;;  %v7047_v54 = vld [vmem:[#allocation3 + $0x3f8] ss:$28 sps:$4 sm:$0xff]   ;;  %v7052_v57 = vld [vmem:[#allocation3 + $0x44] ss:$28 sps:$4 sm:$0xff]  }
 0x355   :  { %5368 = vmatprep.subr.bf16.mxu1 %v6983_v60  ;;  %v7055_v60 = vld [vmem:[#allocation3 + $0x3c4] ss:$28 sps:$4 sm:$0xff]  }
 0x357   :  { %5328 = vmatpush2.bf16.msra.mxu0 %v6978_v63  ;;  %v7050_v63 = vld [vmem:[#allocation3 + $0x40] ss:$28 sps:$4 sm:$0xff]  }
 0x358   :  { %5369 = vmatpush2.bf16.msra.mxu1 %v6981_v0  ;;  %5329 = vmatprep.subr.bf16.mxu0 %v6986_v1  ;;  %v7053_v0 = vld [vmem:[#allocation3 + $0x3c0] ss:$28 sps:$4 sm:$0xff]   ;;  %v7058_v1 = vld [vmem:[#allocation3 + $0xc] ss:$28 sps:$4 sm:$0xff]  }
 0x359   :  { %5370 = vmatprep.subr.bf16.mxu1 %v6989_v2  ;;  %v7061_v2 = vld [vmem:[#allocation3 + $0x38c] ss:$28 sps:$4 sm:$0xff]  }
 0x35b   :  { %5330 = vmatpush2.bf16.msra.mxu0 %v6984_v3  ;;  %v7056_v3 = vld [vmem:[#allocation3 + $0x8] ss:$28 sps:$4 sm:$0xff]  }
 0x35c   :  { %5371 = vmatpush2.bf16.msra.mxu1 %v6987_v7  ;;  %5331 = vmatprep.subr.bf16.mxu0 %v6992_v12  ;;  %v7059_v7 = vld [vmem:[#allocation3 + $0x388] ss:$28 sps:$4 sm:$0xff]   ;;  %v7064_v12 = vld [vmem:[#allocation3 + $0x354] ss:$28 sps:$4 sm:$0xff]  }
 0x35d   :  { %5372 = vmatprep.subr.bf16.mxu1 %v6995_v13  ;;  %v7067_v13 = vld [vmem:[#allocation3 + $0x6d4] ss:$28 sps:$4 sm:$0xff]  }
 0x35f   :  { %5332 = vmatpush2.bf16.msra.mxu0 %v6990_v15  ;;  %v7062_v15 = vld [vmem:[#allocation3 + $0x350] ss:$28 sps:$4 sm:$0xff]  }
 0x360   :  { %5373 = vmatpush2.bf16.msra.mxu1 %v6993_v17  ;;  %5333 = vmatprep.subr.bf16.mxu0 %v6998_v5  ;;  %v7065_v17 = vld [vmem:[#allocation3 + $0x6d0] ss:$28 sps:$4 sm:$0xff]   ;;  %v7070_v5 = vld [vmem:[#allocation3 + $0x31c] ss:$28 sps:$4 sm:$0xff]  }
 0x361   :  { %5374 = vmatprep.subr.bf16.mxu1 %v7001_v56  ;;  %v7073_v56 = vld [vmem:[#allocation3 + $0x69c] ss:$28 sps:$4 sm:$0xff]  }
 0x363   :  { %5334 = vmatpush2.bf16.msra.mxu0 %v6996_v18  ;;  %v7068_v18 = vld [vmem:[#allocation3 + $0x318] ss:$28 sps:$4 sm:$0xff]  }
 0x364   :  { %5375 = vmatpush2.bf16.msra.mxu1 %v6999_v11  ;;  %5335 = vmatprep.subr.bf16.mxu0 %v7004_v14  ;;  %v7071_v11 = vld [vmem:[#allocation3 + $0x698] ss:$28 sps:$4 sm:$0xff]   ;;  %v7076_v14 = vld [vmem:[#allocation3 + $0x2e4] ss:$28 sps:$4 sm:$0xff]  }
 0x365   :  { %5376 = vmatprep.subr.bf16.mxu1 %v7007_v30  ;;  %v7079_v30 = vld [vmem:[#allocation3 + $0x664] ss:$28 sps:$4 sm:$0xff]  }
 0x367   :  { %5336 = vmatpush2.bf16.msra.mxu0 %v7002_v34  ;;  %v7074_v34 = vld [vmem:[#allocation3 + $0x2e0] ss:$28 sps:$4 sm:$0xff]  }
 0x368   :  { %5377 = vmatpush2.bf16.msra.mxu1 %v7005_v19  ;;  %5337 = vmatprep.subr.bf16.mxu0 %v7010_v20  ;;  %v7077_v19 = vld [vmem:[#allocation3 + $0x660] ss:$28 sps:$4 sm:$0xff]   ;;  %v7082_v20 = vld [vmem:[#allocation3 + $0x2ac] ss:$28 sps:$4 sm:$0xff]  }
 0x369   :  { %5378 = vmatprep.subr.bf16.mxu1 %v7013_v21  ;;  %v7085_v21 = vld [vmem:[#allocation3 + $0x62c] ss:$28 sps:$4 sm:$0xff]  }
 0x36b   :  { %5338 = vmatpush2.bf16.msra.mxu0 %v7008_v22  ;;  %v7080_v22 = vld [vmem:[#allocation3 + $0x2a8] ss:$28 sps:$4 sm:$0xff]  }
 0x36c   :  { %5379 = vmatpush2.bf16.msra.mxu1 %v7011_v23  ;;  %5389 = vmatprep.subr.bf16.mxu0 %v7016_v26  ;;  %v7083_v23 = vld [vmem:[#allocation3 + $0x628] ss:$28 sps:$4 sm:$0xff]   ;;  %v7088_v26 = vld [vmem:[#allocation3 + $0x274] ss:$28 sps:$4 sm:$0xff]  }
 0x36d   :  { %5430 = vmatprep.subr.bf16.mxu1 %v7019_v27  ;;  %v7091_v27 = vld [vmem:[#allocation3 + $0x5f4] ss:$28 sps:$4 sm:$0xff]  }
 0x36e   :  { %5340 = vmatmul.mubr.bf16.vlgmr.msra.gmra.mxu0 %v7861_v28 }
 0x36f   :  { %5381 = vmatmul.mubr.bf16.vlgmr.msra.gmra.mxu1 %v7866_v32  ;;  %5390 = vmatpush1.bf16.msra.mxu0 %v7014_v33  ;;  %v7086_v33 = vld [vmem:[#allocation3 + $0x270] ss:$28 sps:$4 sm:$0xff]  }
 0x370   :  { %5431 = vmatpush1.bf16.msra.mxu1 %v7017_v36  ;;  %5391 = vmatprep.subr.bf16.mxu0 %v7022_v42  ;;  %v7089_v36 = vld [vmem:[#allocation3 + $0x5f0] ss:$28 sps:$4 sm:$0xff]   ;;  %v7094_v42 = vld [vmem:[#allocation3 + $0x23c] ss:$28 sps:$4 sm:$0xff]  }
 0x371   :  { %5432 = vmatprep.subr.bf16.mxu1 %v7025_v47  ;;  %5421 = vmatprep.mubr.bf16.mxu0 %v7828_v24  ;;  %v7097_v47 = vld [vmem:[#allocation3 + $0x5bc] ss:$28 sps:$4 sm:$0xff]  }
 0x372   :  { %5462 = vmatprep.mubr.bf16.mxu1 %v7830_v38 }
 0x373   :  { %5392 = vmatpush1.bf16.msra.mxu0 %v7020_v4  ;;  %v7092_v4 = vld [vmem:[#allocation3 + $0x238] ss:$28 sps:$4 sm:$0xff]  }
 0x374   :  { %5433 = vmatpush1.bf16.msra.mxu1 %v7023_v10  ;;  %5393 = vmatprep.subr.bf16.mxu0 %v7028_v25  ;;  %v7095_v10 = vld [vmem:[#allocation3 + $0x5b8] ss:$28 sps:$4 sm:$0xff]   ;;  %v7100_v25 = vld [vmem:[#allocation3 + $0x204] ss:$28 sps:$4 sm:$0xff]  }
 0x375   :  { %5434 = vmatprep.subr.bf16.mxu1 %v7031_v29  ;;  %v7103_v29 = vld [vmem:[#allocation3 + $0x584] ss:$28 sps:$4 sm:$0xff]  }
 0x377   :  { %5394 = vmatpush1.bf16.msra.mxu0 %v7026_v48  ;;  %v7098_v48 = vld [vmem:[#allocation3 + $0x200] ss:$28 sps:$4 sm:$0xff]  }
 0x378   :  { %5435 = vmatpush1.bf16.msra.mxu1 %v7029_v37  ;;  %5395 = vmatprep.subr.bf16.mxu0 %v7034_v49  ;;  %v7101_v37 = vld [vmem:[#allocation3 + $0x580] ss:$28 sps:$4 sm:$0xff]   ;;  %v7106_v49 = vld [vmem:[#allocation3 + $0x1cc] ss:$28 sps:$4 sm:$0xff]  }
 0x379   :  { %5436 = vmatprep.subr.bf16.mxu1 %v7037_v50  ;;  %v7109_v50 = vld [vmem:[#allocation3 + $0x54c] ss:$28 sps:$4 sm:$0xff]  }
 0x37b   :  { %5396 = vmatpush1.bf16.msra.mxu0 %v7032_v45  ;;  %v7104_v45 = vld [vmem:[#allocation3 + $0x1c8] ss:$28 sps:$4 sm:$0xff]  }
 0x37c   :  { %5437 = vmatpush1.bf16.msra.mxu1 %v7035_v46  ;;  %5397 = vmatprep.subr.bf16.mxu0 %v7040_v55  ;;  %v7107_v46 = vld [vmem:[#allocation3 + $0x548] ss:$28 sps:$4 sm:$0xff]   ;;  %v7112_v55 = vld [vmem:[#allocation3 + $0x894] ss:$28 sps:$4 sm:$0xff]  }
 0x37d   :  { %5438 = vmatprep.subr.bf16.mxu1 %v7043_v61  ;;  %v7115_v61 = vld [vmem:[#allocation3 + $0xc14] ss:$28 sps:$4 sm:$0xff]  }
 0x37f   :  { %5398 = vmatpush1.bf16.msra.mxu0 %v7038_v6  ;;  %v7110_v6 = vld [vmem:[#allocation3 + $0x890] ss:$28 sps:$4 sm:$0xff]  }
 0x380   :  { %5439 = vmatpush1.bf16.msra.mxu1 %v7041_v51  ;;  %5399 = vmatprep.subr.bf16.mxu0 %v7046_v62  ;;  %v7113_v51 = vld [vmem:[#allocation3 + $0xc10] ss:$28 sps:$4 sm:$0xff]   ;;  %v7118_v62 = vld [vmem:[#allocation3 + $0x85c] ss:$28 sps:$4 sm:$0xff]  }
 0x381   :  { %5440 = vmatprep.subr.bf16.mxu1 %v7049_v52  ;;  %v7121_v52 = vld [vmem:[#allocation3 + $0xbdc] ss:$28 sps:$4 sm:$0xff]  }
 0x383   :  { %5400 = vmatpush1.bf16.msra.mxu0 %v7044_v53  ;;  %v7116_v53 = vld [vmem:[#allocation3 + $0x858] ss:$28 sps:$4 sm:$0xff]  }
 0x384   :  { %5441 = vmatpush1.bf16.msra.mxu1 %v7047_v54  ;;  %5401 = vmatprep.subr.bf16.mxu0 %v7052_v57  ;;  %v7119_v54 = vld [vmem:[#allocation3 + $0xbd8] ss:$28 sps:$4 sm:$0xff]   ;;  %v7124_v57 = vld [vmem:[#allocation3 + $0x824] ss:$28 sps:$4 sm:$0xff]  }
 0x385   :  { %5442 = vmatprep.subr.bf16.mxu1 %v7055_v60  ;;  %v7127_v60 = vld [vmem:[#allocation3 + $0xba4] ss:$28 sps:$4 sm:$0xff]  }
 0x387   :  { %5402 = vmatpush1.bf16.msra.mxu0 %v7050_v63  ;;  %v7122_v63 = vld [vmem:[#allocation3 + $0x820] ss:$28 sps:$4 sm:$0xff]  }
 0x388   :  { %5443 = vmatpush1.bf16.msra.mxu1 %v7053_v0  ;;  %5403 = vmatprep.subr.bf16.mxu0 %v7058_v1  ;;  %v7125_v0 = vld [vmem:[#allocation3 + $0xba0] ss:$28 sps:$4 sm:$0xff]   ;;  %v7130_v1 = vld [vmem:[#allocation3 + $0x7ec] ss:$28 sps:$4 sm:$0xff]  }
 0x389   :  { %5444 = vmatprep.subr.bf16.mxu1 %v7061_v2  ;;  %v7133_v2 = vld [vmem:[#allocation3 + $0xb6c] ss:$28 sps:$4 sm:$0xff]  }
 0x38b   :  { %5404 = vmatpush1.bf16.msra.mxu0 %v7056_v3  ;;  %v7128_v3 = vld [vmem:[#allocation3 + $0x7e8] ss:$28 sps:$4 sm:$0xff]  }
 0x38c   :  { %5445 = vmatpush1.bf16.msra.mxu1 %v7059_v7  ;;  %5405 = vmatprep.subr.bf16.mxu0 %v7064_v12  ;;  %v7131_v7 = vld [vmem:[#allocation3 + $0xb68] ss:$28 sps:$4 sm:$0xff]   ;;  %v7136_v12 = vld [vmem:[#allocation3 + $0x7b4] ss:$28 sps:$4 sm:$0xff]  }
 0x38d   :  { %5446 = vmatprep.subr.bf16.mxu1 %v7067_v13  ;;  %v7139_v13 = vld [vmem:[#allocation3 + $0xb34] ss:$28 sps:$4 sm:$0xff]  }
 0x38f   :  { %5406 = vmatpush2.bf16.msra.mxu0 %v7062_v15  ;;  %v7134_v15 = vld [vmem:[#allocation3 + $0x7b0] ss:$28 sps:$4 sm:$0xff]  }
 0x390   :  { %5447 = vmatpush2.bf16.msra.mxu1 %v7065_v17  ;;  %5407 = vmatprep.subr.bf16.mxu0 %v7070_v5  ;;  %v7137_v17 = vld [vmem:[#allocation3 + $0xb30] ss:$28 sps:$4 sm:$0xff]   ;;  %v7142_v5 = vld [vmem:[#allocation3 + $0x77c] ss:$28 sps:$4 sm:$0xff]  }
 0x391   :  { %5448 = vmatprep.subr.bf16.mxu1 %v7073_v56  ;;  %v7145_v56 = vld [vmem:[#allocation3 + $0xafc] ss:$28 sps:$4 sm:$0xff]  }
 0x393   :  { %5408 = vmatpush2.bf16.msra.mxu0 %v7068_v18  ;;  %v7140_v18 = vld [vmem:[#allocation3 + $0x778] ss:$28 sps:$4 sm:$0xff]  }
 0x394   :  { %5449 = vmatpush2.bf16.msra.mxu1 %v7071_v11  ;;  %5409 = vmatprep.subr.bf16.mxu0 %v7076_v14  ;;  %v7143_v11 = vld [vmem:[#allocation3 + $0xaf8] ss:$28 sps:$4 sm:$0xff]   ;;  %v7148_v14 = vld [vmem:[#allocation3 + $0x744] ss:$28 sps:$4 sm:$0xff]  }
 0x395   :  { %5450 = vmatprep.subr.bf16.mxu1 %v7079_v30  ;;  %v7151_v30 = vld [vmem:[#allocation3 + $0xac4] ss:$28 sps:$4 sm:$0xff]  }
 0x397   :  { %5410 = vmatpush2.bf16.msra.mxu0 %v7074_v34  ;;  %v7146_v34 = vld [vmem:[#allocation3 + $0x740] ss:$28 sps:$4 sm:$0xff]  }
 0x398   :  { %5451 = vmatpush2.bf16.msra.mxu1 %v7077_v19  ;;  %5411 = vmatprep.subr.bf16.mxu0 %v7082_v20  ;;  %v7149_v19 = vld [vmem:[#allocation3 + $0xac0] ss:$28 sps:$4 sm:$0xff]   ;;  %v7154_v20 = vld [vmem:[#allocation3 + $0x70c] ss:$28 sps:$4 sm:$0xff]  }
 0x399   :  { %5452 = vmatprep.subr.bf16.mxu1 %v7085_v21  ;;  %v7157_v21 = vld [vmem:[#allocation3 + $0xa8c] ss:$28 sps:$4 sm:$0xff]  }
 0x39b   :  { %5412 = vmatpush2.bf16.msra.mxu0 %v7080_v22  ;;  %v7152_v22 = vld [vmem:[#allocation3 + $0x708] ss:$28 sps:$4 sm:$0xff]  }
 0x39c   :  { %5453 = vmatpush2.bf16.msra.mxu1 %v7083_v23  ;;  %5413 = vmatprep.subr.bf16.mxu0 %v7088_v26  ;;  %v7155_v23 = vld [vmem:[#allocation3 + $0xa88] ss:$28 sps:$4 sm:$0xff]   ;;  %v7160_v26 = vld [vmem:[#allocation3 + $0xa54] ss:$28 sps:$4 sm:$0xff]  }
 0x39d   :  { %5454 = vmatprep.subr.bf16.mxu1 %v7091_v27  ;;  %v7163_v27 = vld [vmem:[#allocation3 + $0xdd4] ss:$28 sps:$4 sm:$0xff]  }
 0x39f   :  { %5414 = vmatpush2.bf16.msra.mxu0 %v7086_v33  ;;  %v7158_v33 = vld [vmem:[#allocation3 + $0xa50] ss:$28 sps:$4 sm:$0xff]  }
 0x3a0   :  { %5455 = vmatpush2.bf16.msra.mxu1 %v7089_v36  ;;  %5415 = vmatprep.subr.bf16.mxu0 %v7094_v42  ;;  %v7161_v36 = vld [vmem:[#allocation3 + $0xdd0] ss:$28 sps:$4 sm:$0xff]   ;;  %v7166_v42 = vld [vmem:[#allocation3 + $0xa1c] ss:$28 sps:$4 sm:$0xff]  }
 0x3a1   :  { %5456 = vmatprep.subr.bf16.mxu1 %v7097_v47  ;;  %v7169_v47 = vld [vmem:[#allocation3 + $0xd9c] ss:$28 sps:$4 sm:$0xff]  }
 0x3a3   :  { %5416 = vmatpush2.bf16.msra.mxu0 %v7092_v4  ;;  %v7164_v4 = vld [vmem:[#allocation3 + $0xa18] ss:$28 sps:$4 sm:$0xff]  }
 0x3a4   :  { %5457 = vmatpush2.bf16.msra.mxu1 %v7095_v10  ;;  %5417 = vmatprep.subr.bf16.mxu0 %v7100_v25  ;;  %v7167_v10 = vld [vmem:[#allocation3 + $0xd98] ss:$28 sps:$4 sm:$0xff]   ;;  %v7172_v25 = vld [vmem:[#allocation3 + $0x9e4] ss:$28 sps:$4 sm:$0xff]  }
 0x3a5   :  { %5458 = vmatprep.subr.bf16.mxu1 %v7103_v29  ;;  %v7175_v29 = vld [vmem:[#allocation3 + $0xd64] ss:$28 sps:$4 sm:$0xff]  }
 0x3a7   :  { %5418 = vmatpush2.bf16.msra.mxu0 %v7098_v48  ;;  %v7170_v48 = vld [vmem:[#allocation3 + $0x9e0] ss:$28 sps:$4 sm:$0xff]  }
 0x3a8   :  { %5459 = vmatpush2.bf16.msra.mxu1 %v7101_v37  ;;  %5419 = vmatprep.subr.bf16.mxu0 %v7106_v49  ;;  %v7173_v37 = vld [vmem:[#allocation3 + $0xd60] ss:$28 sps:$4 sm:$0xff]   ;;  %v7178_v49 = vld [vmem:[#allocation3 + $0x9ac] ss:$28 sps:$4 sm:$0xff]  }
 0x3a9   :  { %5460 = vmatprep.subr.bf16.mxu1 %v7109_v50  ;;  %v7181_v50 = vld [vmem:[#allocation3 + $0xd2c] ss:$28 sps:$4 sm:$0xff]  }
 0x3ab   :  { %5420 = vmatpush2.bf16.msra.mxu0 %v7104_v45  ;;  %v7176_v45 = vld [vmem:[#allocation3 + $0x9a8] ss:$28 sps:$4 sm:$0xff]  }
 0x3ac   :  { %5461 = vmatpush2.bf16.msra.mxu1 %v7107_v46  ;;  %5471 = vmatprep.subr.bf16.mxu0 %v7112_v55  ;;  %v7179_v46 = vld [vmem:[#allocation3 + $0xd28] ss:$28 sps:$4 sm:$0xff]   ;;  %v7184_v55 = vld [vmem:[#allocation3 + $0x974] ss:$28 sps:$4 sm:$0xff]  }
 0x3ad   :  { %5512 = vmatprep.subr.bf16.mxu1 %v7115_v61  ;;  %v7187_v61 = vld [vmem:[#allocation3 + $0xcf4] ss:$28 sps:$4 sm:$0xff]  }
 0x3ae   :  { %5422 = vmatmul.mubr.bf16.vlgmr.msra.gmra.mxu0 %v7837_v8 }
 0x3af   :  { %5463 = vmatmul.mubr.bf16.vlgmr.msra.gmra.mxu1 %v7842_v9  ;;  %5472 = vmatpush1.bf16.msra.mxu0 %v7110_v6  ;;  %v7182_v6 = vld [vmem:[#allocation3 + $0x970] ss:$28 sps:$4 sm:$0xff]  }
 0x3b0   :  { %5513 = vmatpush1.bf16.msra.mxu1 %v7113_v51  ;;  %5473 = vmatprep.subr.bf16.mxu0 %v7118_v62  ;;  %v7185_v51 = vld [vmem:[#allocation3 + $0xcf0] ss:$28 sps:$4 sm:$0xff]   ;;  %v7190_v62 = vld [vmem:[#allocation3 + $0x93c] ss:$28 sps:$4 sm:$0xff]  }
 0x3b1   :  { %5514 = vmatprep.subr.bf16.mxu1 %v7121_v52  ;;  %5503 = vmatprep.mubr.bf16.mxu0 %v7847_v31  ;;  %v7193_v52 = vld [vmem:[#allocation3 + $0xcbc] ss:$28 sps:$4 sm:$0xff]  }
 0x3b2   :  { %5544 = vmatprep.mubr.bf16.mxu1 %v7852_v35 }
 0x3b3   :  { %5474 = vmatpush1.bf16.msra.mxu0 %v7116_v53  ;;  %v7188_v53 = vld [vmem:[#allocation3 + $0x938] ss:$28 sps:$4 sm:$0xff]  }
 0x3b4   :  { %5515 = vmatpush1.bf16.msra.mxu1 %v7119_v54  ;;  %5475 = vmatprep.subr.bf16.mxu0 %v7124_v57  ;;  %v7191_v54 = vld [vmem:[#allocation3 + $0xcb8] ss:$28 sps:$4 sm:$0xff]   ;;  %v7196_v57 = vld [vmem:[#allocation3 + $0x904] ss:$28 sps:$4 sm:$0xff]  }
 0x3b5   :  { %5516 = vmatprep.subr.bf16.mxu1 %v7127_v60  ;;  %v7199_v60 = vld [vmem:[#allocation3 + $0xc84] ss:$28 sps:$4 sm:$0xff]  }
 0x3b7   :  { %5476 = vmatpush1.bf16.msra.mxu0 %v7122_v63  ;;  %v7194_v63 = vld [vmem:[#allocation3 + $0x900] ss:$28 sps:$4 sm:$0xff]  }
 0x3b8   :  { %5517 = vmatpush1.bf16.msra.mxu1 %v7125_v0  ;;  %5477 = vmatprep.subr.bf16.mxu0 %v7130_v1  ;;  %v7197_v0 = vld [vmem:[#allocation3 + $0xc80] ss:$28 sps:$4 sm:$0xff]   ;;  %v7202_v1 = vld [vmem:[#allocation3 + $0x8cc] ss:$28 sps:$4 sm:$0xff]  }
 0x3b9   :  { %5518 = vmatprep.subr.bf16.mxu1 %v7133_v2  ;;  %v7205_v2 = vld [vmem:[#allocation3 + $0xc4c] ss:$28 sps:$4 sm:$0xff]  }
 0x3bb   :  { %5478 = vmatpush1.bf16.msra.mxu0 %v7128_v3  ;;  %v7200_v3 = vld [vmem:[#allocation3 + $0x8c8] ss:$28 sps:$4 sm:$0xff]  }
 0x3bc   :  { %5519 = vmatpush1.bf16.msra.mxu1 %v7131_v7  ;;  %5479 = vmatprep.subr.bf16.mxu0 %v7136_v12  ;;  %v7203_v7 = vld [vmem:[#allocation3 + $0xc48] ss:$28 sps:$4 sm:$0xff]   ;;  %v7208_v12 = vld [vmem:[#allocation3 + $0x19c] ss:$28 sps:$4 sm:$0xff]  }
 0x3bd   :  { %5520 = vmatprep.subr.bf16.mxu1 %v7139_v13  ;;  %v7211_v13 = vld [vmem:[#allocation3 + $0x51c] ss:$28 sps:$4 sm:$0xff]  }
 0x3bf   :  { %5480 = vmatpush1.bf16.msra.mxu0 %v7134_v15  ;;  %v7206_v15 = vld [vmem:[#allocation3 + $0x198] ss:$28 sps:$4 sm:$0xff]  }
 0x3c0   :  { %5521 = vmatpush1.bf16.msra.mxu1 %v7137_v17  ;;  %5481 = vmatprep.subr.bf16.mxu0 %v7142_v5  ;;  %v7209_v17 = vld [vmem:[#allocation3 + $0x518] ss:$28 sps:$4 sm:$0xff]   ;;  %v7214_v5 = vld [vmem:[#allocation3 + $0x164] ss:$28 sps:$4 sm:$0xff]  }
 0x3c1   :  { %5522 = vmatprep.subr.bf16.mxu1 %v7145_v56  ;;  %v7217_v56 = vld [vmem:[#allocation3 + $0x4e4] ss:$28 sps:$4 sm:$0xff]  }
 0x3c3   :  { %5482 = vmatpush1.bf16.msra.mxu0 %v7140_v18  ;;  %v7212_v18 = vld [vmem:[#allocation3 + $0x160] ss:$28 sps:$4 sm:$0xff]  }
 0x3c4   :  { %5523 = vmatpush1.bf16.msra.mxu1 %v7143_v11  ;;  %5483 = vmatprep.subr.bf16.mxu0 %v7148_v14 }
 0x3c5   :  { %5524 = vmatprep.subr.bf16.mxu1 %v7151_v30  ;;  %v7215_v30 = vld [vmem:[#allocation3 + $0x4e0] ss:$28 sps:$4 sm:$0xff]  }
 0x3c7   :  { %5484 = vmatpush1.bf16.msra.mxu0 %v7146_v34  ;;  %v7220_v34 = vld [vmem:[#allocation3 + $0x12c] ss:$28 sps:$4 sm:$0xff]  }
 0x3c8   :  { %5525 = vmatpush1.bf16.msra.mxu1 %v7149_v19  ;;  %5485 = vmatprep.subr.bf16.mxu0 %v7154_v20 }
 0x3c9   :  { %5526 = vmatprep.subr.bf16.mxu1 %v7157_v21  ;;  %v7223_v21 = vld [vmem:[#allocation3 + $0x4ac] ss:$28 sps:$4 sm:$0xff]  }
 0x3cb   :  { %5486 = vmatpush1.bf16.msra.mxu0 %v7152_v22  ;;  %v7218_v22 = vld [vmem:[#allocation3 + $0x128] ss:$28 sps:$4 sm:$0xff]  }
 0x3cc   :  { %5527 = vmatpush1.bf16.msra.mxu1 %v7155_v23  ;;  %5487 = vmatprep.subr.bf16.mxu0 %v7160_v26 }
 0x3cd   :  { %5528 = vmatprep.subr.bf16.mxu1 %v7163_v27  ;;  %v7221_v27 = vld [vmem:[#allocation3 + $0x4a8] ss:$28 sps:$4 sm:$0xff]  }
 0x3cf   :  { %5488 = vmatpush2.bf16.msra.mxu0 %v7158_v33  ;;  %v7226_v33 = vld [vmem:[#allocation3 + $0xf4] ss:$28 sps:$4 sm:$0xff]  }
 0x3d0   :  { %5529 = vmatpush2.bf16.msra.mxu1 %v7161_v36  ;;  %5489 = vmatprep.subr.bf16.mxu0 %v7166_v42 }
 0x3d1   :  { %5530 = vmatprep.subr.bf16.mxu1 %v7169_v47  ;;  %v7229_v47 = vld [vmem:[#allocation3 + $0x474] ss:$28 sps:$4 sm:$0xff]  }
 0x3d3   :  { %5490 = vmatpush2.bf16.msra.mxu0 %v7164_v4  ;;  %v7224_v4 = vld [vmem:[#allocation3 + $0xf0] ss:$28 sps:$4 sm:$0xff]  }
 0x3d4   :  { %5531 = vmatpush2.bf16.msra.mxu1 %v7167_v10  ;;  %5491 = vmatprep.subr.bf16.mxu0 %v7172_v25  ;;  %v7227_v10 = vld [vmem:[#allocation3 + $0x470] ss:$28 sps:$4 sm:$0xff]   ;;  %v7232_v25 = vld [vmem:[#allocation3 + $0xbc] ss:$28 sps:$4 sm:$0xff]  }
 0x3d5   :  { %5532 = vmatprep.subr.bf16.mxu1 %v7175_v29  ;;  %v7235_v29 = vld [vmem:[#allocation3 + $0x43c] ss:$28 sps:$4 sm:$0xff]  }
 0x3d7   :  { %5492 = vmatpush2.bf16.msra.mxu0 %v7170_v48  ;;  %v7230_v48 = vld [vmem:[#allocation3 + $0xb8] ss:$28 sps:$4 sm:$0xff]  }
 0x3d8   :  { %5533 = vmatpush2.bf16.msra.mxu1 %v7173_v37  ;;  %5493 = vmatprep.subr.bf16.mxu0 %v7178_v49  ;;  %v7233_v37 = vld [vmem:[#allocation3 + $0x438] ss:$28 sps:$4 sm:$0xff]   ;;  %v7238_v49 = vld [vmem:[#allocation3 + $0x84] ss:$28 sps:$4 sm:$0xff]  }
 0x3d9   :  { %5534 = vmatprep.subr.bf16.mxu1 %v7181_v50  ;;  %v7241_v50 = vld [vmem:[#allocation3 + $0x404] ss:$28 sps:$4 sm:$0xff]  }
 0x3db   :  { %5494 = vmatpush2.bf16.msra.mxu0 %v7176_v45  ;;  %v7236_v45 = vld [vmem:[#allocation3 + $0x80] ss:$28 sps:$4 sm:$0xff]  }
 0x3dc   :  { %5535 = vmatpush2.bf16.msra.mxu1 %v7179_v46  ;;  %5495 = vmatprep.subr.bf16.mxu0 %v7184_v55  ;;  %v7239_v46 = vld [vmem:[#allocation3 + $0x400] ss:$28 sps:$4 sm:$0xff]   ;;  %v7244_v55 = vld [vmem:[#allocation3 + $0x4c] ss:$28 sps:$4 sm:$0xff]  }
 0x3dd   :  { %5536 = vmatprep.subr.bf16.mxu1 %v7187_v61  ;;  %v7247_v61 = vld [vmem:[#allocation3 + $0x3cc] ss:$28 sps:$4 sm:$0xff]  }
 0x3df   :  { %5496 = vmatpush2.bf16.msra.mxu0 %v7182_v6  ;;  %v7242_v6 = vld [vmem:[#allocation3 + $0x48] ss:$28 sps:$4 sm:$0xff]  }
 0x3e0   :  { %5537 = vmatpush2.bf16.msra.mxu1 %v7185_v51  ;;  %5497 = vmatprep.subr.bf16.mxu0 %v7190_v62  ;;  %v7245_v51 = vld [vmem:[#allocation3 + $0x3c8] ss:$28 sps:$4 sm:$0xff]   ;;  %v7250_v62 = vld [vmem:[#allocation3 + $0x14] ss:$28 sps:$4 sm:$0xff]  }
 0x3e1   :  { %5538 = vmatprep.subr.bf16.mxu1 %v7193_v52  ;;  %v7253_v52 = vld [vmem:[#allocation3 + $0x394] ss:$28 sps:$4 sm:$0xff]  }
 0x3e3   :  { %5498 = vmatpush2.bf16.msra.mxu0 %v7188_v53  ;;  %v7248_v53 = vld [vmem:[#allocation3 + $0x10] ss:$28 sps:$4 sm:$0xff]  }
 0x3e4   :  { %5539 = vmatpush2.bf16.msra.mxu1 %v7191_v54  ;;  %5499 = vmatprep.subr.bf16.mxu0 %v7196_v57  ;;  %v7251_v54 = vld [vmem:[#allocation3 + $0x390] ss:$28 sps:$4 sm:$0xff]   ;;  %v7256_v57 = vld [vmem:[#allocation3 + $0x35c] ss:$28 sps:$4 sm:$0xff]  }
 0x3e5   :  { %5540 = vmatprep.subr.bf16.mxu1 %v7199_v60  ;;  %v7259_v60 = vld [vmem:[#allocation3 + $0x6dc] ss:$28 sps:$4 sm:$0xff]  }
 0x3e7   :  { %5500 = vmatpush2.bf16.msra.mxu0 %v7194_v63  ;;  %v7254_v63 = vld [vmem:[#allocation3 + $0x358] ss:$28 sps:$4 sm:$0xff]  }
 0x3e8   :  { %5541 = vmatpush2.bf16.msra.mxu1 %v7197_v0  ;;  %5501 = vmatprep.subr.bf16.mxu0 %v7202_v1  ;;  %v7257_v0 = vld [vmem:[#allocation3 + $0x6d8] ss:$28 sps:$4 sm:$0xff]   ;;  %v7262_v1 = vld [vmem:[#allocation3 + $0x324] ss:$28 sps:$4 sm:$0xff]  }
 0x3e9   :  { %5542 = vmatprep.subr.bf16.mxu1 %v7205_v2  ;;  %v7265_v2 = vld [vmem:[#allocation3 + $0x6a4] ss:$28 sps:$4 sm:$0xff]  }
 0x3eb   :  { %5502 = vmatpush2.bf16.msra.mxu0 %v7200_v3  ;;  %v7260_v3 = vld [vmem:[#allocation3 + $0x320] ss:$28 sps:$4 sm:$0xff]  }
 0x3ec   :  { %5543 = vmatpush2.bf16.msra.mxu1 %v7203_v7  ;;  %5553 = vmatprep.subr.bf16.mxu0 %v7208_v12  ;;  %v7263_v7 = vld [vmem:[#allocation3 + $0x6a0] ss:$28 sps:$4 sm:$0xff]   ;;  %v7268_v12 = vld [vmem:[#allocation3 + $0x2ec] ss:$28 sps:$4 sm:$0xff]  }
 0x3ed   :  { %5594 = vmatprep.subr.bf16.mxu1 %v7211_v13  ;;  %v7271_v13 = vld [vmem:[#allocation3 + $0x66c] ss:$28 sps:$4 sm:$0xff]  }
 0x3ee   :  { %v7876_v11 = vpop.f32.mrf.mxu0  ;;  %5504 = vmatmul.mubr.bf16.vlgmr.msra.gmra.mxu0 %v7861_v28 }
 0x3ef   :  { %v7878_v14 = vpop.f32.mrf.mxu1  ;;  %5545 = vmatmul.mubr.bf16.vlgmr.msra.gmra.mxu1 %v7866_v32  ;;  %5554 = vmatpush1.bf16.msra.mxu0 %v7206_v15  ;;  %v7266_v15 = vld [vmem:[#allocation3 + $0x2e8] ss:$28 sps:$4 sm:$0xff]  }
 0x3f0   :  { %5595 = vmatpush1.bf16.msra.mxu1 %v7209_v17  ;;  %v7882_v19 = vpop.f32.mrf.mxu0  ;;  %5555 = vmatprep.subr.bf16.mxu0 %v7214_v5  ;;  %v7269_v17 = vld [vmem:[#allocation3 + $0x668] ss:$28 sps:$4 sm:$0xff]   ;;  %v7274_v5 = vld [vmem:[#allocation3 + $0x2b4] ss:$28 sps:$4 sm:$0xff]  }
 0x3f1   :  { %v7884_v20 = vpop.f32.mrf.mxu1  ;;  %5596 = vmatprep.subr.bf16.mxu1 %v7217_v56  ;;  %5585 = vmatprep.mubr.bf16.mxu0 %v7828_v24  ;;  %v7277_v56 = vld [vmem:[#allocation3 + $0x634] ss:$28 sps:$4 sm:$0xff]  }
 0x3f2   :  { %5626 = vmatprep.mubr.bf16.mxu1 %v7830_v38  ;;  %v5263_v23 = vpop.f32.mrf.mxu0 }
 0x3f3   :  { %v5304_v26 = vpop.f32.mrf.mxu1  ;;  %5556 = vmatpush1.bf16.msra.mxu0 %v7212_v18  ;;  %v7272_v18 = vld [vmem:[#allocation3 + $0x2b0] ss:$28 sps:$4 sm:$0xff]   ;;  %v7281_v23 = vld [vmem:[#allocation3 + $0x5f8] ss:$28 sps:$4 sm:$0xff]  }
 0x3f4   :  { %5597 = vmatpush1.bf16.msra.mxu1 %v7215_v30  ;;  %v5264_v36 = vpop.f32.mrf.mxu0  ;;  %5557 = vmatprep.subr.bf16.mxu0 %v7220_v34  ;;  %v7275_v30 = vld [vmem:[#allocation3 + $0x630] ss:$28 sps:$4 sm:$0xff]   ;;  %v7280_v34 = vld [vmem:[#allocation3 + $0x27c] ss:$28 sps:$4 sm:$0xff]   ;;  %v7286_v26 = vld [vmem:[#allocation3 + $0x244] ss:$28 sps:$4 sm:$0xff]  }
 0x3f5   :  { %v5305_v42 = vpop.f32.mrf.mxu1  ;;  %5598 = vmatprep.subr.bf16.mxu1 %v7223_v21  ;;  %v7283_v21 = vld [vmem:[#allocation3 + $0x5fc] ss:$28 sps:$4 sm:$0xff]  }
 0x3f6   :  { %v7287_v36 = vld [vmem:[#allocation3 + $0x5c0] ss:$28 sps:$4 sm:$0xff]   ;;  %v7292_v42 = vld [vmem:[#allocation3 + $0x20c] ss:$28 sps:$4 sm:$0xff]  }
 0x3f7   :  { %5558 = vmatpush1.bf16.msra.mxu0 %v7218_v22  ;;  %v7278_v22 = vld [vmem:[#allocation3 + $0x278] ss:$28 sps:$4 sm:$0xff]  }
 0x3f8   :  { %5599 = vmatpush1.bf16.msra.mxu1 %v7221_v27  ;;  %5559 = vmatprep.subr.bf16.mxu0 %v7226_v33  ;;  %v7289_v27 = vld [vmem:[#allocation3 + $0x5c4] ss:$28 sps:$4 sm:$0xff]  }
 0x3f9   :  { %5600 = vmatprep.subr.bf16.mxu1 %v7229_v47  ;;  %v7284_v33 = vld [vmem:[#allocation3 + $0x240] ss:$28 sps:$4 sm:$0xff]   ;;  %v7888_v47 = vld [vmem:[#allocation13] sm:$0xff] }
 0x3fb   :  { %5560 = vmatpush1.bf16.msra.mxu0 %v7224_v4  ;;  %v7295_v4 = vld [vmem:[#allocation3 + $0x58c] ss:$28 sps:$4 sm:$0xff]  }
 0x3fc   :  { %5601 = vmatpush1.bf16.msra.mxu1 %v7227_v10  ;;  %5561 = vmatprep.subr.bf16.mxu0 %v7232_v25  ;;  %v7290_v10 = vld [vmem:[#allocation3 + $0x208] ss:$28 sps:$4 sm:$0xff]  }
 0x3fd   :  { %5602 = vmatprep.subr.bf16.mxu1 %v7235_v29  ;;  %v7293_v25 = vld [vmem:[#allocation3 + $0x588] ss:$28 sps:$4 sm:$0xff]   ;;  %v7298_v29 = vld [vmem:[#allocation3 + $0x1d4] ss:$28 sps:$4 sm:$0xff]  }
 0x3ff   :  { %5562 = vmatpush1.bf16.msra.mxu0 %v7230_v48  ;;  %v7301_v48 = vld [vmem:[#allocation3 + $0x554] ss:$28 sps:$4 sm:$0xff]  }
 0x400   :  { %5603 = vmatpush1.bf16.msra.mxu1 %v7233_v37  ;;  %5563 = vmatprep.subr.bf16.mxu0 %v7238_v49  ;;  %v2889_v37 = vrot.slane %v7888_v47, %v7745_v40  ;;  %v7296_v49 = vld [vmem:[#allocation3 + $0x1d0] ss:$28 sps:$4 sm:$0xff]   ;;  %v7310_v40 = vld [vmem:[#allocation3 + $0x864] ss:$28 sps:$4 sm:$0xff]  }
 0x401   :  { %5604 = vmatprep.subr.bf16.mxu1 %v7241_v50  ;;  %v7299_v50 = vld [vmem:[#allocation3 + $0x550] ss:$28 sps:$4 sm:$0xff]  }
 0x403   :  { %5564 = vmatpush1.bf16.msra.mxu0 %v7236_v45  ;;  %v2893_v45 = vrot.slane %v7888_v47, %v7751_v43 }
 0x404   :  { %5605 = vmatpush1.bf16.msra.mxu1 %v7239_v46  ;;  %5565 = vmatprep.subr.bf16.mxu0 %v7244_v55  ;;  %v7304_v46 = vld [vmem:[#allocation3 + $0x89c] ss:$28 sps:$4 sm:$0xff]  }
 0x405   :  { %5606 = vmatprep.subr.bf16.mxu1 %v7247_v61  ;;  %v7307_v55 = vld [vmem:[#allocation3 + $0xc1c] ss:$28 sps:$4 sm:$0xff]   ;;  %v5260_v61 = vadd.f32 %v7876_v11, %v2889_v37 }
 0x407   :  { %5566 = vmatpush1.bf16.msra.mxu0 %v7242_v6  ;;  %v5262_v6 = vadd.f32 %v7882_v19, %v2893_v45  ;;  %v5301_v43 = vadd.f32 %v7878_v14, %v5260_v61  ;;  %v7308_v19 = vld [vmem:[#allocation3 + $0x860] ss:$28 sps:$4 sm:$0xff]  }
 0x408   :  { %5607 = vmatpush1.bf16.msra.mxu1 %v7245_v51  ;;  %5567 = vmatprep.subr.bf16.mxu0 %v7250_v62  ;;  %v7302_v51 = vld [vmem:[#allocation3 + $0x898] ss:$28 sps:$4 sm:$0xff]  }
 0x409   :  { %5608 = vmatprep.subr.bf16.mxu1 %v7253_v52  ;;  %v7305_v62 = vld [vmem:[#allocation3 + $0xc18] ss:$28 sps:$4 sm:$0xff]   ;;  %v7313_v52 = vld [vmem:[#allocation3 + $0xbe4] ss:$28 sps:$4 sm:$0xff]   ;;  %v5303_v11 = vadd.f32 %v7884_v20, %v5262_v6  ;;  %v7344_v6 = vld [vmem:[#allocation3 + $0x710] ss:$28 sps:$4 sm:$0xff]  }
 0x40b   :  { %5568 = vmatpush1.bf16.msra.mxu0 %v7248_v53 }
 0x40c   :  { %5609 = vmatpush1.bf16.msra.mxu1 %v7251_v54  ;;  %5569 = vmatprep.subr.bf16.mxu0 %v7256_v57 }
 0x40d   :  { %5610 = vmatprep.subr.bf16.mxu1 %v7259_v60  ;;  %v7311_v60 = vld [vmem:[#allocation3 + $0xbe0] ss:$28 sps:$4 sm:$0xff]  }
 0x40f   :  { %5570 = vmatpush2.bf16.msra.mxu0 %v7254_v63 }
 0x410   :  { %5611 = vmatpush2.bf16.msra.mxu1 %v7257_v0  ;;  %5571 = vmatprep.subr.bf16.mxu0 %v7262_v1  ;;  %v7316_v1 = vld [vmem:[#allocation3 + $0x82c] ss:$28 sps:$4 sm:$0xff]  }
 0x411   :  { %5612 = vmatprep.subr.bf16.mxu1 %v7265_v2  ;;  %v7319_v2 = vld [vmem:[#allocation3 + $0xbac] ss:$28 sps:$4 sm:$0xff]  }
 0x413   :  { %5572 = vmatpush2.bf16.msra.mxu0 %v7260_v3 }
 0x414   :  { %5613 = vmatpush2.bf16.msra.mxu1 %v7263_v7  ;;  %5573 = vmatprep.subr.bf16.mxu0 %v7268_v12 }
 0x415   :  { %5614 = vmatprep.subr.bf16.mxu1 %v7271_v13 }
 0x417   :  { %5574 = vmatpush2.bf16.msra.mxu0 %v7266_v15  ;;  %v7314_v15 = vld [vmem:[#allocation3 + $0x828] ss:$28 sps:$4 sm:$0xff]  }
 0x418   :  { %5615 = vmatpush2.bf16.msra.mxu1 %v7269_v17  ;;  %5575 = vmatprep.subr.bf16.mxu0 %v7274_v5  ;;  %v7317_v17 = vld [vmem:[#allocation3 + $0xba8] ss:$28 sps:$4 sm:$0xff]  }
 0x419   :  { %5616 = vmatprep.subr.bf16.mxu1 %v7277_v56 }
 0x41b   :  { %5576 = vmatpush2.bf16.msra.mxu0 %v7272_v18  ;;  %v7322_v18 = vld [vmem:[#allocation3 + $0x7f4] ss:$28 sps:$4 sm:$0xff]  }
 0x41c   :  { %5617 = vmatpush2.bf16.msra.mxu1 %v7275_v30  ;;  %5577 = vmatprep.subr.bf16.mxu0 %v7280_v34  ;;  %v7325_v30 = vld [vmem:[#allocation3 + $0xb74] ss:$28 sps:$4 sm:$0xff]  }
 0x41d   :  { %5618 = vmatprep.subr.bf16.mxu1 %v7283_v21  ;;  %v7320_v21 = vld [vmem:[#allocation3 + $0x7f0] ss:$28 sps:$4 sm:$0xff]  }
 0x41f   :  { %5578 = vmatpush2.bf16.msra.mxu0 %v7278_v22  ;;  %v7323_v22 = vld [vmem:[#allocation3 + $0xb70] ss:$28 sps:$4 sm:$0xff]  }
 0x420   :  { %5619 = vmatpush2.bf16.msra.mxu1 %v7281_v23  ;;  %5579 = vmatprep.subr.bf16.mxu0 %v7286_v26  ;;  %v7328_v23 = vld [vmem:[#allocation3 + $0x7bc] ss:$28 sps:$4 sm:$0xff]  }
 0x421   :  { %5620 = vmatprep.subr.bf16.mxu1 %v7289_v27  ;;  %v7331_v26 = vld [vmem:[#allocation3 + $0xb3c] ss:$28 sps:$4 sm:$0xff]  }
 0x422   :  { %v7326_v27 = vld [vmem:[#allocation3 + $0x7b8] ss:$28 sps:$4 sm:$0xff]  }
 0x423   :  { %5580 = vmatpush2.bf16.msra.mxu0 %v7284_v33  ;;  %v7329_v33 = vld [vmem:[#allocation3 + $0xb38] ss:$28 sps:$4 sm:$0xff]  }
 0x424   :  { %5621 = vmatpush2.bf16.msra.mxu1 %v7287_v36  ;;  %5581 = vmatprep.subr.bf16.mxu0 %v7292_v42  ;;  %v7334_v36 = vld [vmem:[#allocation3 + $0x784] ss:$28 sps:$4 sm:$0xff]  }
 0x425   :  { %5622 = vmatprep.subr.bf16.mxu1 %v7295_v4  ;;  %v7337_v42 = vld [vmem:[#allocation3 + $0xb04] ss:$28 sps:$4 sm:$0xff]  }
 0x426   :  { %v7332_v4 = vld [vmem:[#allocation3 + $0x780] ss:$28 sps:$4 sm:$0xff]  }
 0x427   :  { %5582 = vmatpush2.bf16.msra.mxu0 %v7290_v10  ;;  %v7335_v10 = vld [vmem:[#allocation3 + $0xb00] ss:$28 sps:$4 sm:$0xff]  }
 0x428   :  { %5623 = vmatpush2.bf16.msra.mxu1 %v7293_v25  ;;  %5583 = vmatprep.subr.bf16.mxu0 %v7298_v29  ;;  %v7340_v25 = vld [vmem:[#allocation3 + $0x74c] ss:$28 sps:$4 sm:$0xff]  }
 0x429   :  { %5624 = vmatprep.subr.bf16.mxu1 %v7301_v48  ;;  %v7343_v29 = vld [vmem:[#allocation3 + $0xacc] ss:$28 sps:$4 sm:$0xff]  }
 0x42b   :  { %5584 = vmatpush2.bf16.msra.mxu0 %v7296_v49  ;;  %v7338_v49 = vld [vmem:[#allocation3 + $0x748] ss:$28 sps:$4 sm:$0xff]  }
 0x42c   :  { %5625 = vmatpush2.bf16.msra.mxu1 %v7299_v50  ;;  %5635 = vmatprep.subr.bf16.mxu0 %v7304_v46  ;;  %v7341_v50 = vld [vmem:[#allocation3 + $0xac8] ss:$28 sps:$4 sm:$0xff]   ;;  %v7346_v46 = vld [vmem:[#allocation3 + $0x714] ss:$28 sps:$4 sm:$0xff]  }
 0x42d   :  { %5676 = vmatprep.subr.bf16.mxu1 %v7307_v55  ;;  %v7349_v55 = vld [vmem:[#allocation3 + $0xa94] ss:$28 sps:$4 sm:$0xff]  }
 0x42e   :  { %v5341_v53 = vpop.f32.mrf.mxu0  ;;  %5586 = vmatmul.mubr.bf16.vlgmr.msra.gmra.mxu0 %v7837_v8 }
 0x42f   :  { %v5382_v54 = vpop.f32.mrf.mxu1  ;;  %5627 = vmatmul.mubr.bf16.vlgmr.msra.gmra.mxu1 %v7842_v9  ;;  %v5342_v57 = vadd.f32 %v5341_v53, %v5301_v43  ;;  %5636 = vmatpush1.bf16.msra.mxu0 %v7302_v51  ;;  %v7347_v51 = vld [vmem:[#allocation3 + $0xa90] ss:$28 sps:$4 sm:$0xff]   ;;  %v7353_v43 = vld [vmem:[#allocation3 + $0xdd8] ss:$28 sps:$4 sm:$0xff]   ;;  %v7358_v53 = vld [vmem:[#allocation3 + $0xa24] ss:$28 sps:$4 sm:$0xff]  }
 0x430   :  { %5677 = vmatpush1.bf16.msra.mxu1 %v7305_v62  ;;  %v5343_v63 = vpop.f32.mrf.mxu0  ;;  %5637 = vmatprep.subr.bf16.mxu0 %v7310_v40  ;;  %v7352_v62 = vld [vmem:[#allocation3 + $0xa5c] ss:$28 sps:$4 sm:$0xff]  }
 0x431   :  { %v5384_v0 = vpop.f32.mrf.mxu1  ;;  %5678 = vmatprep.subr.bf16.mxu1 %v7313_v52  ;;  %v5383_v14 = vadd.f32 %v5382_v54, %v5342_v57  ;;  %v5344_v3 = vadd.f32 %v5343_v63, %v5303_v11  ;;  %5667 = vmatprep.mubr.bf16.mxu0 %v7847_v31  ;;  %v7355_v40 = vld [vmem:[#allocation3 + $0xddc] ss:$28 sps:$4 sm:$0xff]   ;;  %v7361_v54 = vld [vmem:[#allocation3 + $0xda4] ss:$28 sps:$4 sm:$0xff]  }
 0x432   :  { %5708 = vmatprep.mubr.bf16.mxu1 %v7852_v35  ;;  %v5345_v7 = vpop.f32.mrf.mxu0  ;;  %v7350_v52 = vld [vmem:[#allocation3 + $0xa58] ss:$28 sps:$4 sm:$0xff]   ;;  %v7356_v11 = vld [vmem:[#allocation3 + $0xa20] ss:$28 sps:$4 sm:$0xff]  }
 0x433   :  { %v5386_v12 = vpop.f32.mrf.mxu1  ;;  %v6686_v20 = vmul.f32 -1.442695, %v5383_v14  ;;  %v5385_v13 = vadd.f32 %v5384_v0, %v5344_v3  ;;  %5638 = vmatpush1.bf16.msra.mxu0 %v7308_v19  ;;  %v7359_v57 = vld [vmem:[#allocation3 + $0xda0] ss:$28 sps:$4 sm:$0xff]   ;;  %v7364_v19 = vld [vmem:[#allocation3 + $0x9ec] ss:$28 sps:$4 sm:$0xff]  }
 0x434   :  { %5679 = vmatpush1.bf16.msra.mxu1 %v7311_v60  ;;  %v5346_v5 = vpop.f32.mrf.mxu0  ;;  %5639 = vmatprep.subr.bf16.mxu0 %v7316_v1  ;;  %v7367_v60 = vld [vmem:[#allocation3 + $0xd6c] ss:$28 sps:$4 sm:$0xff]   ;;  %v7370_v14 = vld [vmem:[#allocation3 + $0x9b4] ss:$28 sps:$4 sm:$0xff]  }
 0x435   :  { %v5387_v56 = vpop.f32.mrf.mxu1  ;;  %5680 = vmatprep.subr.bf16.mxu1 %v7319_v2  ;;  %7462 = vpow2.f32 %v6686_v20  ;;  %v6687_v34 = vmul.f32 -1.442695, %v5385_v13  ;;  %v7362_v0 = vld [vmem:[#allocation3 + $0x9e8] ss:$28 sps:$4 sm:$0xff]   ;;  %v7373_v3 = vld [vmem:[#allocation3 + $0xd34] ss:$28 sps:$4 sm:$0xff]  }
 0x436   :  { %v7365_v1 = vld [vmem:[#allocation3 + $0xd68] ss:$28 sps:$4 sm:$0xff]   ;;  %v7368_v7 = vld [vmem:[#allocation3 + $0x9b0] ss:$28 sps:$4 sm:$0xff]   ;;  %v7376_v20 = vld [vmem:[#allocation3 + $0x97c] ss:$28 sps:$4 sm:$0xff]  }
 0x437   :  { %7464 = vpow2.f32 %v6687_v34  ;;  %5640 = vmatpush1.bf16.msra.mxu0 %v7314_v15  ;;  %v7371_v12 = vld [vmem:[#allocation3 + $0xd30] ss:$28 sps:$4 sm:$0xff]   ;;  %v7379_v13 = vld [vmem:[#allocation3 + $0xcfc] ss:$28 sps:$4 sm:$0xff]   ;;  %v7382_v5 = vld [vmem:[#allocation3 + $0x944] ss:$28 sps:$4 sm:$0xff]  }
 0x438   :  { %5681 = vmatpush1.bf16.msra.mxu1 %v7317_v17  ;;  %5641 = vmatprep.subr.bf16.mxu0 %v7322_v18  ;;  %v7374_v15 = vld [vmem:[#allocation3 + $0x978] ss:$28 sps:$4 sm:$0xff]   ;;  %v7385_v56 = vld [vmem:[#allocation3 + $0xcc4] ss:$28 sps:$4 sm:$0xff]   ;;  %v7388_v34 = vld [vmem:[#allocation3 + $0x90c] ss:$28 sps:$4 sm:$0xff]  }
 0x439   :  { %5682 = vmatprep.subr.bf16.mxu1 %v7325_v30  ;;  %v7377_v17 = vld [vmem:[#allocation3 + $0xcf8] ss:$28 sps:$4 sm:$0xff]   ;;  %v7380_v18 = vld [vmem:[#allocation3 + $0x940] ss:$28 sps:$4 sm:$0xff]  }
 0x43a   :  { %v7383_v30 = vld [vmem:[#allocation3 + $0xcc0] ss:$28 sps:$4 sm:$0xff]  }
 0x43b   :  { %5642 = vmatpush1.bf16.msra.mxu0 %v7320_v21  ;;  %v7391_v21 = vld [vmem:[#allocation3 + $0xc8c] ss:$28 sps:$4 sm:$0xff]  }
 0x43c   :  { %5683 = vmatpush1.bf16.msra.mxu1 %v7323_v22  ;;  %5643 = vmatprep.subr.bf16.mxu0 %v7328_v23  ;;  %v7386_v22 = vld [vmem:[#allocation3 + $0x908] ss:$28 sps:$4 sm:$0xff]  }
 0x43d   :  { %5684 = vmatprep.subr.bf16.mxu1 %v7331_v26  ;;  %v7389_v23 = vld [vmem:[#allocation3 + $0xc88] ss:$28 sps:$4 sm:$0xff]   ;;  %v7394_v26 = vld [vmem:[#allocation3 + $0x8d4] ss:$28 sps:$4 sm:$0xff]  }
 0x43f   :  { %5644 = vmatpush1.bf16.msra.mxu0 %v7326_v27  ;;  %v7397_v27 = vld [vmem:[#allocation3 + $0xc54] ss:$28 sps:$4 sm:$0xff]  }
 0x440   :  { %5685 = vmatpush1.bf16.msra.mxu1 %v7329_v33  ;;  %5645 = vmatprep.subr.bf16.mxu0 %v7334_v36  ;;  %v7392_v33 = vld [vmem:[#allocation3 + $0x8d0] ss:$28 sps:$4 sm:$0xff]  }
 0x441   :  { %5686 = vmatprep.subr.bf16.mxu1 %v7337_v42  ;;  %v7395_v36 = vld [vmem:[#allocation3 + $0xc50] ss:$28 sps:$4 sm:$0xff]   ;;  %v7398_v42 = vld [vmem:[#allocation3 + $0x360] ss:$28 sps:$4 sm:$0xff]  }
 0x442   :  { %v7463_v48 = vpop.eup %7462 }
 0x443   :  { %v5898_v37 = vadd.f32 1.0, %v7463_v48  ;;  %5646 = vmatpush1.bf16.msra.mxu0 %v7332_v4  ;;  %v7399_v4 = vld [vmem:[#allocation3 + $0x6e0] ss:$28 sps:$4 sm:$0xff]   ;;  %v7403_v48 = vld [vmem:[#allocation3 + $0x6a8] ss:$28 sps:$4 sm:$0xff]  }
 0x444   :  { %5687 = vmatpush1.bf16.msra.mxu1 %v7335_v10  ;;  %v7465_v45 = vpop.eup %7464  ;;  %5647 = vmatprep.subr.bf16.mxu0 %v7340_v25  ;;  %v7400_v10 = vld [vmem:[#allocation3 + $0x1a0] ss:$28 sps:$4 sm:$0xff]  }
 0x445   :  { %5688 = vmatprep.subr.bf16.mxu1 %v7343_v29  ;;  %7466 = vrcp.f32 %v5898_v37  ;;  %v5899_v61 = vadd.f32 1.0, %v7465_v45  ;;  %v7401_v25 = vld [vmem:[#allocation3 + $0x520] ss:$28 sps:$4 sm:$0xff]   ;;  %v7402_v29 = vld [vmem:[#allocation3 + $0x328] ss:$28 sps:$4 sm:$0xff]  }
 0x446   :  { %v7405_v45 = vld [vmem:[#allocation3 + $0x4e8] ss:$28 sps:$4 sm:$0xff]  }
 0x447   :  { %7468 = vrcp.f32 %v5899_v61  ;;  %5648 = vmatpush1.bf16.msra.mxu0 %v7338_v49  ;;  %v7406_v61 = vld [vmem:[#allocation3 + $0x2f0] ss:$28 sps:$4 sm:$0xff]  }
 0x448   :  { %5689 = vmatpush1.bf16.msra.mxu1 %v7341_v50  ;;  %5649 = vmatprep.subr.bf16.mxu0 %v7346_v46  ;;  %v7404_v50 = vld [vmem:[#allocation3 + $0x168] ss:$28 sps:$4 sm:$0xff]  }
 0x449   :  { %5690 = vmatprep.subr.bf16.mxu1 %v7349_v55 }
 0x44b   :  { %5650 = vmatpush1.bf16.msra.mxu0 %v7344_v6  ;;  %v7407_v6 = vld [vmem:[#allocation3 + $0x670] ss:$28 sps:$4 sm:$0xff]  }
 0x44c   :  { %5691 = vmatpush1.bf16.msra.mxu1 %v7347_v51  ;;  %5651 = vmatprep.subr.bf16.mxu0 %v7352_v62 }
 0x44d   :  { %5692 = vmatprep.subr.bf16.mxu1 %v7355_v40  ;;  %v7408_v40 = vld [vmem:[#allocation3 + $0x130] ss:$28 sps:$4 sm:$0xff]  }
 0x44f   :  { %5652 = vmatpush2.bf16.msra.mxu0 %v7350_v52  ;;  %v7409_v52 = vld [vmem:[#allocation3 + $0x4b0] ss:$28 sps:$4 sm:$0xff]  }
 0x450   :  { %5693 = vmatpush2.bf16.msra.mxu1 %v7353_v43  ;;  %5653 = vmatprep.subr.bf16.mxu0 %v7358_v53 }
 0x451   :  { %5694 = vmatprep.subr.bf16.mxu1 %v7361_v54  ;;  %v7410_v54 = vld [vmem:[#allocation3 + $0x2b8] ss:$28 sps:$4 sm:$0xff]  }
 0x452   :  { %v7467_v63 = vpop.eup %7466 }
 0x453   :  { %5919 = vst [vmem:[#allocation14] sm:$0xff] %v7467_v63  ;;  %5654 = vmatpush2.bf16.msra.mxu0 %v7356_v11  ;;  %v7411_v11 = vld [vmem:[#allocation3 + $0x638] ss:$28 sps:$4 sm:$0xff]   ;;  %v7417_v63 = vld [vmem:[#allocation3 + $0x440] ss:$28 sps:$4 sm:$0xff]  }
 0x454   :  { %5695 = vmatpush2.bf16.msra.mxu1 %v7359_v57  ;;  %v7469_v2 = vpop.eup %7468  ;;  %5655 = vmatprep.subr.bf16.mxu0 %v7364_v19  ;;  %v7412_v57 = vld [vmem:[#allocation3 + $0xf8] ss:$28 sps:$4 sm:$0xff]  }
 0x455   :  { %5696 = vmatprep.subr.bf16.mxu1 %v7367_v60  ;;  %5920 = vst [vmem:[#allocation14 + $0x8] sm:$0xff] %v7469_v2  ;;  %v7413_v19 = vld [vmem:[#allocation3 + $0x478] ss:$28 sps:$4 sm:$0xff]   ;;  %v7416_v60 = vld [vmem:[#allocation3 + $0xc0] ss:$28 sps:$4 sm:$0xff]  }
 0x456   :  { %v7420_v2 = vld [vmem:[#allocation3 + $0x88] ss:$28 sps:$4 sm:$0xff]  }
 0x457   :  { %5656 = vmatpush2.bf16.msra.mxu0 %v7362_v0  ;;  %v7418_v0 = vld [vmem:[#allocation3 + $0x248] ss:$28 sps:$4 sm:$0xff]  }
 0x458   :  { %5697 = vmatpush2.bf16.msra.mxu1 %v7365_v1  ;;  %5657 = vmatprep.subr.bf16.mxu0 %v7370_v14  ;;  %v7419_v1 = vld [vmem:[#allocation3 + $0x5c8] ss:$28 sps:$4 sm:$0xff]  }
 0x459   :  { %5698 = vmatprep.subr.bf16.mxu1 %v7373_v3  ;;  %v7421_v14 = vld [vmem:[#allocation3 + $0x408] ss:$28 sps:$4 sm:$0xff]   ;;  %v7422_v3 = vld [vmem:[#allocation3 + $0x210] ss:$28 sps:$4 sm:$0xff]  }
 0x45b   :  { %5658 = vmatpush2.bf16.msra.mxu0 %v7368_v7  ;;  %v7423_v7 = vld [vmem:[#allocation3 + $0x590] ss:$28 sps:$4 sm:$0xff]  }
 0x45c   :  { %5699 = vmatpush2.bf16.msra.mxu1 %v7371_v12  ;;  %5659 = vmatprep.subr.bf16.mxu0 %v7376_v20  ;;  %v7424_v12 = vld [vmem:[#allocation3 + $0x50] ss:$28 sps:$4 sm:$0xff]  }
 0x45d   :  { %5700 = vmatprep.subr.bf16.mxu1 %v7379_v13  ;;  %v7425_v20 = vld [vmem:[#allocation3 + $0x3d0] ss:$28 sps:$4 sm:$0xff]   ;;  %v7426_v13 = vld [vmem:[#allocation3 + $0x1d8] ss:$28 sps:$4 sm:$0xff]  }
 0x45f   :  { %5660 = vmatpush2.bf16.msra.mxu0 %v7374_v15  ;;  %v7427_v15 = vld [vmem:[#allocation3 + $0x558] ss:$28 sps:$4 sm:$0xff]  }
 0x460   :  { %5701 = vmatpush2.bf16.msra.mxu1 %v7377_v17  ;;  %5661 = vmatprep.subr.bf16.mxu0 %v7382_v5  ;;  %v7428_v17 = vld [vmem:[#allocation3 + $0x18] ss:$28 sps:$4 sm:$0xff]  }
 0x461   :  { %5702 = vmatprep.subr.bf16.mxu1 %v7385_v56  ;;  %v7429_v5 = vld [vmem:[#allocation3 + $0x398] ss:$28 sps:$4 sm:$0xff]   ;;  %v7430_v56 = vld [vmem:[#allocation3 + $0xa60] ss:$28 sps:$4 sm:$0xff]  }
 0x463   :  { %5662 = vmatpush2.bf16.msra.mxu0 %v7380_v18  ;;  %v7431_v18 = vld [vmem:[#allocation3 + $0xde0] ss:$28 sps:$4 sm:$0xff]  }
 0x464   :  { %5703 = vmatpush2.bf16.msra.mxu1 %v7383_v30  ;;  %5663 = vmatprep.subr.bf16.mxu0 %v7388_v34  ;;  %v7432_v30 = vld [vmem:[#allocation3 + $0x8a0] ss:$28 sps:$4 sm:$0xff]  }
 0x465   :  { %5704 = vmatprep.subr.bf16.mxu1 %v7391_v21  ;;  %v7433_v34 = vld [vmem:[#allocation3 + $0xc20] ss:$28 sps:$4 sm:$0xff]   ;;  %v7434_v21 = vld [vmem:[#allocation3 + $0xa28] ss:$28 sps:$4 sm:$0xff]  }
 0x467   :  { %5664 = vmatpush2.bf16.msra.mxu0 %v7386_v22  ;;  %v7435_v22 = vld [vmem:[#allocation3 + $0xda8] ss:$28 sps:$4 sm:$0xff]  }
 0x468   :  { %5705 = vmatpush2.bf16.msra.mxu1 %v7389_v23  ;;  %5665 = vmatprep.subr.bf16.mxu0 %v7394_v26  ;;  %v7436_v23 = vld [vmem:[#allocation3 + $0x868] ss:$28 sps:$4 sm:$0xff]  }
 0x469   :  { %5706 = vmatprep.subr.bf16.mxu1 %v7397_v27  ;;  %v7437_v26 = vld [vmem:[#allocation3 + $0xbe8] ss:$28 sps:$4 sm:$0xff]   ;;  %v7438_v27 = vld [vmem:[#allocation3 + $0x9f0] ss:$28 sps:$4 sm:$0xff]  }
 0x46b   :  { %5666 = vmatpush2.bf16.msra.mxu0 %v7392_v33  ;;  %v7439_v33 = vld [vmem:[#allocation3 + $0xd70] ss:$28 sps:$4 sm:$0xff]  }
 0x46c   :  { %5707 = vmatpush2.bf16.msra.mxu1 %v7395_v36  ;;  %6695 = vmatprep.subr.bf16.mxu0 %v7398_v42  ;;  %v7440_v36 = vld [vmem:[#allocation3 + $0x830] ss:$28 sps:$4 sm:$0xff]  }
 0x46d   :  { %6717 = vmatprep.subr.bf16.mxu1 %v7399_v4  ;;  %v7441_v42 = vld [vmem:[#allocation3 + $0xbb0] ss:$28 sps:$4 sm:$0xff]   ;;  %v7444_v4 = vld [vmem:[#allocation3 + $0x7f8] ss:$28 sps:$4 sm:$0xff]  }
 0x46e   :  { %v7902_v37 = vpop.f32.mrf.mxu0  ;;  %5668 = vmatmul.mubr.bf16.vlgmr.msra.gmra.mxu0 %v7861_v28 }
 0x46f   :  { %v7904_v49 = vpop.f32.mrf.mxu1  ;;  %5709 = vmatmul.mubr.bf16.vlgmr.msra.gmra.mxu1 %v7866_v32  ;;  %6696 = vmatpush3.bf16.msra.mxu0 %v7400_v10  ;;  %v7445_v10 = vld [vmem:[#allocation3 + $0xb78] ss:$28 sps:$4 sm:$0xff]  }
 0x470   :  { %6718 = vmatpush3.bf16.msra.mxu1 %v7401_v25  ;;  %v7908_v46 = vpop.f32.mrf.mxu0  ;;  %6697 = vmatprep.subr.bf16.mxu0 %v7402_v29  ;;  %v7446_v25 = vld [vmem:[#allocation3 + $0x980] ss:$28 sps:$4 sm:$0xff]  }
 0x471   :  { %v7910_v55 = vpop.f32.mrf.mxu1  ;;  %6719 = vmatprep.subr.bf16.mxu1 %v7403_v48  ;;  %5749 = vmatprep.mubr.bf16.mxu0 %v7828_v24  ;;  %v7414_v24 = vld [vmem:[#allocation3 + $0x280] ss:$28 sps:$4 sm:$0xff]   ;;  %v7450_v48 = vld [vmem:[#allocation3 + $0x948] ss:$28 sps:$4 sm:$0xff]  }
 0x472   :  { %5789 = vmatprep.mubr.bf16.mxu1 %v7830_v38  ;;  %v5427_v51 = vpop.f32.mrf.mxu0  ;;  %v7415_v38 = vld [vmem:[#allocation3 + $0x600] ss:$28 sps:$4 sm:$0xff]  }
 0x473   :  { %v5468_v62 = vpop.f32.mrf.mxu1  ;;  %6698 = vmatpush3.bf16.msra.mxu0 %v7404_v50  ;;  %v7447_v29 = vld [vmem:[#allocation3 + $0xd00] ss:$28 sps:$4 sm:$0xff]   ;;  %v7451_v50 = vld [vmem:[#allocation3 + $0xcc8] ss:$28 sps:$4 sm:$0xff]   ;;  %v7455_v51 = vld [vmem:[#allocation3 + $0xc90] ss:$28 sps:$4 sm:$0xff]  }
 0x474   :  { %6720 = vmatpush3.bf16.msra.mxu1 %v7405_v45  ;;  %v5428_v43 = vpop.f32.mrf.mxu0  ;;  %6699 = vmatprep.subr.bf16.mxu0 %v7406_v61  ;;  %v7452_v45 = vld [vmem:[#allocation3 + $0x788] ss:$28 sps:$4 sm:$0xff]   ;;  %v7456_v62 = vld [vmem:[#allocation3 + $0x750] ss:$28 sps:$4 sm:$0xff]  }
 0x475   :  { %v5469_v53 = vpop.f32.mrf.mxu1  ;;  %6721 = vmatprep.subr.bf16.mxu1 %v7407_v6  ;;  %v7453_v61 = vld [vmem:[#allocation3 + $0xb08] ss:$28 sps:$4 sm:$0xff]   ;;  %v7454_v6 = vld [vmem:[#allocation3 + $0x910] ss:$28 sps:$4 sm:$0xff]   ;;  %v7459_v43 = vld [vmem:[#allocation3 + $0xc58] ss:$28 sps:$4 sm:$0xff]  }
 0x476   :  { %v2897_v53 = vrot.slane %v7888_v47, %v7748_v41 }
 0x477   :  { %6700 = vmatpush3.bf16.msra.mxu0 %v7408_v40  ;;  %v7457_v40 = vld [vmem:[#allocation3 + $0xad0] ss:$28 sps:$4 sm:$0xff]  }
 0x478   :  { %6722 = vmatpush3.bf16.msra.mxu1 %v7409_v52  ;;  %6701 = vmatprep.subr.bf16.mxu0 %v7410_v54  ;;  %v7458_v52 = vld [vmem:[#allocation3 + $0x8d8] ss:$28 sps:$4 sm:$0xff]   ;;  %v2901_v54 = vrot.slane %v7888_v47, %v7754_v44 }
 0x479   :  { %6723 = vmatprep.subr.bf16.mxu1 %v7411_v11  ;;  %v7460_v11 = vld [vmem:[#allocation3 + $0x718] ss:$28 sps:$4 sm:$0xff]  }
 0x47b   :  { %6702 = vmatpush3.bf16.msra.mxu0 %v7412_v57  ;;  %v7461_v57 = vld [vmem:[#allocation3 + $0xa98] ss:$28 sps:$4 sm:$0xff]  }
 0x47c   :  { %6724 = vmatpush3.bf16.msra.mxu1 %v7413_v19  ;;  %6703 = vmatprep.subr.bf16.mxu0 %v7414_v24  ;;  %v5424_v19 = vadd.f32 %v7902_v37, %v2897_v53  ;;  %v5426_v24 = vadd.f32 %v7908_v46, %v2901_v54 }
 0x47d   :  { %6725 = vmatprep.subr.bf16.mxu1 %v7415_v38 }
 0x47e   :  { %v5465_v38 = vadd.f32 %v7904_v49, %v5424_v19  ;;  %v5467_v41 = vadd.f32 %v7910_v55, %v5426_v24 }
 0x47f   :  { %6704 = vmatpush3.bf16.msra.mxu0 %v7416_v60 }
 0x480   :  { %6726 = vmatpush3.bf16.msra.mxu1 %v7417_v63  ;;  %6705 = vmatprep.subr.bf16.mxu0 %v7418_v0 }
 0x481   :  { %6727 = vmatprep.subr.bf16.mxu1 %v7419_v1 }
 0x483   :  { %6706 = vmatpush3.bf16.msra.mxu0 %v7420_v2 }
 0x484   :  { %6728 = vmatpush3.bf16.msra.mxu1 %v7421_v14  ;;  %6707 = vmatprep.subr.bf16.mxu0 %v7422_v3 }
 0x485   :  { %6729 = vmatprep.subr.bf16.mxu1 %v7423_v7 }
 0x487   :  { %6708 = vmatpush3.bf16.msra.mxu0 %v7424_v12 }
 0x488   :  { %6730 = vmatpush3.bf16.msra.mxu1 %v7425_v20  ;;  %6709 = vmatprep.subr.bf16.mxu0 %v7426_v13 }
 0x489   :  { %6731 = vmatprep.subr.bf16.mxu1 %v7427_v15 }
 0x48b   :  { %6710 = vmatpush3.bf16.msra.mxu0 %v7428_v17 }
 0x48c   :  { %6732 = vmatpush3.bf16.msra.mxu1 %v7429_v5  ;;  %6739 = vmatprep.subr.bf16.mxu0 %v7430_v56 }
 0x48d   :  { %6761 = vmatprep.subr.bf16.mxu1 %v7431_v18 }
 0x48e   :  { %5750 = vmatmul.mubr.bf16.vlgmr.msra.gmra.mxu0 %v7837_v8  ;;  %v7442_v8 = vld [vmem:[#allocation3 + $0x9b8] ss:$28 sps:$4 sm:$0xff]  }
 0x48f   :  { %5790 = vmatmul.mubr.bf16.vlgmr.msra.gmra.mxu1 %v7842_v9  ;;  %6740 = vmatpush3.bf16.msra.mxu0 %v7432_v30  ;;  %v7443_v9 = vld [vmem:[#allocation3 + $0xd38] ss:$28 sps:$4 sm:$0xff]  }
 0x490   :  { %6762 = vmatpush3.bf16.msra.mxu1 %v7433_v34  ;;  %6741 = vmatprep.subr.bf16.mxu0 %v7434_v21 }
 0x491   :  { %6763 = vmatprep.subr.bf16.mxu1 %v7435_v22  ;;  %5829 = vmatprep.mubr.bf16.mxu0 %v7847_v31  ;;  %v7448_v31 = vld [vmem:[#allocation3 + $0x7c0] ss:$28 sps:$4 sm:$0xff]  }
 0x492   :  { %5869 = vmatprep.mubr.bf16.mxu1 %v7852_v35  ;;  %v7449_v35 = vld [vmem:[#allocation3 + $0xb40] ss:$28 sps:$4 sm:$0xff]  }
 0x493   :  { %6742 = vmatpush3.bf16.msra.mxu0 %v7436_v23 }
 0x494   :  { %6764 = vmatpush3.bf16.msra.mxu1 %v7437_v26  ;;  %6743 = vmatprep.subr.bf16.mxu0 %v7438_v27  ;;  %v2905_v26 = vrot.slane %v7888_v47, %v722_v58  ;;  %v2909_v27 = vrot.slane %v7888_v47, %v726_v59 }
 0x495   :  { %6765 = vmatprep.subr.bf16.mxu1 %v7439_v33 }
 0x497   :  { %6744 = vmatpush3.bf16.msra.mxu0 %v7440_v36 }
 0x498   :  { %6766 = vmatpush3.bf16.msra.mxu1 %v7441_v42  ;;  %6745 = vmatprep.subr.bf16.mxu0 %v7442_v8 }
 0x499   :  { %6767 = vmatprep.subr.bf16.mxu1 %v7443_v9 }
 0x49b   :  { %6746 = vmatpush3.bf16.msra.mxu0 %v7444_v4 }
 0x49c   :  { %6768 = vmatpush3.bf16.msra.mxu1 %v7445_v10  ;;  %6747 = vmatprep.subr.bf16.mxu0 %v7446_v25 }
 0x49d   :  { %6769 = vmatprep.subr.bf16.mxu1 %v7447_v29 }
 0x49f   :  { %6748 = vmatpush3.bf16.msra.mxu0 %v7448_v31 }
 0x4a0   :  { %6770 = vmatpush3.bf16.msra.mxu1 %v7449_v35  ;;  %6749 = vmatprep.subr.bf16.mxu0 %v7450_v48 }
 0x4a1   :  { %6771 = vmatprep.subr.bf16.mxu1 %v7451_v50 }
 0x4a3   :  { %6750 = vmatpush3.bf16.msra.mxu0 %v7452_v45 }
 0x4a4   :  { %6772 = vmatpush3.bf16.msra.mxu1 %v7453_v61  ;;  %6751 = vmatprep.subr.bf16.mxu0 %v7454_v6 }
 0x4a5   :  { %6773 = vmatprep.subr.bf16.mxu1 %v7455_v51 }
 0x4a7   :  { %6752 = vmatpush3.bf16.msra.mxu0 %v7456_v62 }
 0x4a8   :  { %6774 = vmatpush3.bf16.msra.mxu1 %v7457_v40  ;;  %6753 = vmatprep.subr.bf16.mxu0 %v7458_v52 }
 0x4a9   :  { %6775 = vmatprep.subr.bf16.mxu1 %v7459_v43 }
 0x4ab   :  { %6754 = vmatpush3.bf16.msra.mxu0 %v7460_v11 }
 0x4ac   :  { %6776 = vmatpush3.bf16.msra.mxu1 %v7461_v57 }
 0x4ae   :  { %v5505_v60 = vpop.f32.mrf.mxu0  ;;  %5830 = vmatmul.mubr.bf16.vlgmr.msra.gmra.mxu0 %v7861_v28 }
 0x4af   :  { %v5546_v63 = vpop.f32.mrf.mxu1  ;;  %5870 = vmatmul.mubr.bf16.vlgmr.msra.gmra.mxu1 %v7866_v32  ;;  %v5506_v44 = vadd.f32 %v5505_v60, %v5465_v38 }
 0x4b0   :  { %v5507_v0 = vpop.f32.mrf.mxu0 }
 0x4b1   :  { %v5548_v1 = vpop.f32.mrf.mxu1  ;;  %v5547_v2 = vadd.f32 %v5546_v63, %v5506_v44  ;;  %v5508_v14 = vadd.f32 %v5507_v0, %v5467_v41  ;;  %v2913_v41 = vrot.slane %v7888_v47, %v730_v16 }
 0x4b2   :  { %v5509_v37 = vpop.f32.mrf.mxu0 }
 0x4b3   :  { %v5550_v3 = vpop.f32.mrf.mxu1  ;;  %v6688_v46 = vmul.f32 -1.442695, %v5547_v2  ;;  %v5549_v7 = vadd.f32 %v5548_v1, %v5508_v14 }
 0x4b4   :  { %v5510_v12 = vpop.f32.mrf.mxu0 }
 0x4b5   :  { %v5551_v20 = vpop.f32.mrf.mxu1  ;;  %7470 = vpow2.f32 %v6688_v46  ;;  %v6689_v49 = vmul.f32 -1.442695, %v5549_v7 }
 0x4b7   :  { %7472 = vpow2.f32 %v6689_v49 }
 0x4c2   :  { %v7471_v13 = vpop.eup %7470 }
 0x4c3   :  { %v5900_v28 = vadd.f32 1.0, %v7471_v13 }
 0x4c4   :  { %v7473_v15 = vpop.eup %7472 }
 0x4c5   :  { %7474 = vrcp.f32 %v5900_v28  ;;  %v5901_v32 = vadd.f32 1.0, %v7473_v15 }
 0x4c7   :  { %7476 = vrcp.f32 %v5901_v32 }
 0x4d2   :  { %v7475_v55 = vpop.eup %7474 }
 0x4d3   :  { %5921 = vst [vmem:[#allocation14 + $0x10] sm:$0xff] %v7475_v55 }
 0x4d4   :  { %v7477_v17 = vpop.eup %7476 }
 0x4d5   :  { %5922 = vst [vmem:[#allocation14 + $0x18] sm:$0xff] %v7477_v17 }
 0x4ee   :  { %v5587_v5 = vpop.f32.mrf.mxu0 }
 0x4ef   :  { %v5628_v56 = vpop.f32.mrf.mxu1  ;;  %v5588_v33 = vadd.f32 %v5587_v5, %v2905_v26 }
 0x4f0   :  { %v5589_v18 = vpop.f32.mrf.mxu0 }
 0x4f1   :  { %v5630_v30 = vpop.f32.mrf.mxu1  ;;  %v5590_v36 = vadd.f32 %v5589_v18, %v2909_v27  ;;  %v5629_v42 = vadd.f32 %v5628_v56, %v5588_v33 }
 0x4f2   :  { %v5591_v34 = vpop.f32.mrf.mxu0 }
 0x4f3   :  { %v5632_v21 = vpop.f32.mrf.mxu1  ;;  %v5631_v4 = vadd.f32 %v5630_v30, %v5590_v36 }
 0x4f4   :  { %v5592_v22 = vpop.f32.mrf.mxu0 }
 0x4f5   :  { %v5633_v23 = vpop.f32.mrf.mxu1 }
 0x52e   :  { %v5669_v8 = vpop.f32.mrf.mxu0 }
 0x52f   :  { %v5710_v9 = vpop.f32.mrf.mxu1  ;;  %v5670_v10 = vadd.f32 %v5669_v8, %v5629_v42 }
 0x530   :  { %v5671_v25 = vpop.f32.mrf.mxu0 }
 0x531   :  { %v5712_v29 = vpop.f32.mrf.mxu1  ;;  %v5711_v31 = vadd.f32 %v5710_v9, %v5670_v10  ;;  %v5672_v35 = vadd.f32 %v5671_v25, %v5631_v4 }
 0x532   :  { %v5673_v48 = vpop.f32.mrf.mxu0 }
 0x533   :  { %v5714_v50 = vpop.f32.mrf.mxu1  ;;  %v6690_v45 = vmul.f32 -1.442695, %v5711_v31  ;;  %v5713_v61 = vadd.f32 %v5712_v29, %v5672_v35 }
 0x534   :  { %v5674_v58 = vpop.f32.mrf.mxu0 }
 0x535   :  { %v5715_v6 = vpop.f32.mrf.mxu1  ;;  %7478 = vpow2.f32 %v6690_v45  ;;  %v6691_v51 = vmul.f32 -1.442695, %v5713_v61 }
 0x537   :  { %7480 = vpow2.f32 %v6691_v51 }
 0x542   :  { %v7479_v59 = vpop.eup %7478 }
 0x543   :  { %v5902_v62 = vadd.f32 1.0, %v7479_v59 }
 0x544   :  { %v7481_v40 = vpop.eup %7480 }
 0x545   :  { %7482 = vrcp.f32 %v5902_v62  ;;  %v5903_v52 = vadd.f32 1.0, %v7481_v40 }
 0x547   :  { %7484 = vrcp.f32 %v5903_v52 }
 0x54e   :  { %v6711_v43 = vpop.f32.mrf.mxu0 }
 0x54f   :  { %v6733_v53 = vpop.f32.mrf.mxu1 }
 0x550   :  { %v6712_v54 = vpop.f32.mrf.mxu0 }
 0x551   :  { %v6734_v11 = vpop.f32.mrf.mxu1  ;;  %v6713_v44 = vadd.f32 %v6712_v54, %v6711_v43 }
 0x552   :  { %v7483_v57 = vpop.eup %7482  ;;  %v6714_v19 = vpop.f32.mrf.mxu0  ;;  %v6735_v1 = vadd.f32 %v6734_v11, %v6733_v53 }
 0x553   :  { %v6736_v24 = vpop.f32.mrf.mxu1  ;;  %5923 = vst [vmem:[#allocation14 + $0x20] sm:$0xff] %v7483_v57  ;;  %v5752_v0 = vadd.f32 %v6713_v44, %v2913_v41 }
 0x554   :  { %v7485_v38 = vpop.eup %7484  ;;  %v6715_v60 = vpop.f32.mrf.mxu0 }
 0x555   :  { %v6737_v63 = vpop.f32.mrf.mxu1  ;;  %5924 = vst [vmem:[#allocation14 + $0x28] sm:$0xff] %v7485_v38  ;;  %v5792_v46 = vadd.f32 %v6735_v1, %v5752_v0 }
 0x56e   :  { %v6755_v2 = vpop.f32.mrf.mxu0 }
 0x56f   :  { %v6777_v14 = vpop.f32.mrf.mxu1 }
 0x570   :  { %v6756_v37 = vpop.f32.mrf.mxu0 }
 0x571   :  { %v6778_v3 = vpop.f32.mrf.mxu1  ;;  %v6757_v7 = vadd.f32 %v6756_v37, %v6755_v2 }
 0x572   :  { %v6758_v12 = vpop.f32.mrf.mxu0  ;;  %v6779_v13 = vadd.f32 %v6778_v3, %v6777_v14 }
 0x573   :  { %v6780_v20 = vpop.f32.mrf.mxu1  ;;  %v5832_v49 = vadd.f32 %v6757_v7, %v5792_v46 }
 0x574   :  { %v6759_v28 = vpop.f32.mrf.mxu0 }
 0x575   :  { %v6781_v15 = vpop.f32.mrf.mxu1  ;;  %v5872_v32 = vadd.f32 %v6779_v13, %v5832_v49 }
 0x577   :  { %v6692_v55 = vmul.f32 -1.442695, %v5872_v32 }
 0x579   :  { %7486 = vpow2.f32 %v6692_v55 }
 0x586   :  { %v7487_v39 = vpop.eup %7486 }
 0x587   :  { %v5904_v16 = vadd.f32 1.0, %v7487_v39 }
 0x589   :  { %7488 = vrcp.f32 %v5904_v16 }
 0x596   :  { %v7489_v47 = vpop.eup %7488 }
 0x597   :  { %5925 = vst [vmem:[#allocation14 + $0x30] sm:$0xff] %v7489_v47 }
 0x598   :  { %7641 = shalt.err (!%p7638_p11)
}
 0x599   :  { %5935 = dma.vmem_to_hbm [thread:$0]  %s5933_s6, 896, %s7948_s8, [#allocation7]  }
 0x59a   :  { %7660 = dma.done.wait [#allocation7], 896  }
 0x59b   :  { %7661 = vsyncadd [#allocation7], 4294966400 }
 0x59c   :  { %5939 = vsyncpa [#allocation6], 1 }
 0x59d   :  { %5940 = vsyncpa [#allocation9], 1 }
 0x59e   :  { %5941 = vsyncpa [#allocation12], 1 }
 0x59f   :  { %5942 = vsyncpa [#allocation7], 1 }
 0x5a0   :  { %5943 = vsyncmov [#allocation4] }
 0x5a3   :  { %s5944_s2 = vpop.sfrf %5943 }
 0x5a4   :  { %p6693_p12 = scmp.ne.s32.totalorder %s5944_s2, 0 }
 0x5a6   :  { %5948 = shalt.err (%p6693_p12)  }
 0x5a7   :  { %5950 = vsyncmov [#allocation4 + $0x1] }
 0x5aa   :  { %s5951_s20 = vpop.sfrf %5950 }
 0x5ab   :  { %p6694_p13 = scmp.ne.s32.totalorder %s5951_s20, 0 }
 0x5ad   :  { %5955 = shalt.err (%p6694_p13)  }

</bundles_post_ra>
